<compile_context>
chip_gen: v7x
topology: tpu7x:2x2x1
jax: 0.10.0
libtpu: 0.0.40
codegen_flags: <defaults>
</compile_context>

<pallas_src>
import functools
import math

import jax
import jax.numpy as jnp
from jax.experimental import pallas as pl
from jax.experimental.pallas import tpu as pltpu


hidden_dim = 100
input_dim = 7
num_layers = 3
output_dim = 1  # NUMBER_PREDICTIONS

HP = 128  # hidden dim padded to one full 128-lane vreg width


def _fused_lstm_fc_kernel(x_ref, wx_ref, wh_ref, b_ref, wfc_ref, bfc_ref,
                          out_ref, proj_scr, seq_scr):
    """All LSTM layers + final FC, single invocation (no grid).

    x_ref  : (T*B, HP)       layer-0 input, time-major rows (row t*B+b = x[b,t]),
                             lanes >= input_dim are 0
    wx_ref : (L, HP, 4*HP)   per-layer W_ih^T, zero-padded; gate g occupies the
                             aligned lane chunk [g*HP, g*HP + H)
    wh_ref : (L, HP, 4*HP)   per-layer W_hh^T, zero-padded identically
    b_ref  : (L, 1, 4*HP)    per-layer (b_ih + b_hh), zero-padded per gate chunk
    wfc_ref: (HP, O)         FC weight (rows >= hidden_dim are 0)
    bfc_ref: (1, O)          FC bias
    out_ref: (B, O)
    proj_scr: (T*B, 4*HP) f32 VMEM  -- whole-sequence input projection, per layer
    seq_scr : (T*B, HP)   f32 VMEM  -- current layer's output sequence
    """
    L = wx_ref.shape[0]
    TB, Hp = seq_scr.shape
    B = out_ref.shape[0]
    T = TB // B

    h = jnp.zeros((B, Hp), jnp.float32)
    c = jnp.zeros((B, Hp), jnp.float32)

    for l in range(L):  # static layer loop
        src = x_ref if l == 0 else seq_scr
        # One big MXU-friendly matmul: input projection for the WHOLE sequence.
        proj_scr[...] = jnp.dot(src[...], wx_ref[l],
                                preferred_element_type=jnp.float32)
        # Hoisted bias broadcast (JAX does not CSE broadcast_in_dim).
        bias_l = jnp.broadcast_to(b_ref[l], (B, 4 * Hp))

        # h/c carried purely in vregs across the (static, fully unrolled) T loop.
        h = jnp.zeros((B, Hp), jnp.float32)
        c = jnp.zeros((B, Hp), jnp.float32)
        for t in range(T):
            gates = (
                proj_scr[pl.ds(t * B, B), :]
                + jnp.dot(h, wh_ref[l], preferred_element_type=jnp.float32)
                + bias_l
            )                                                     # (B, 4*HP)

            # Aligned 128-lane gate slices: [i, f, g, o].
            i_g = jax.nn.sigmoid(gates[:, 0 * Hp:1 * Hp])
            f_g = jax.nn.sigmoid(gates[:, 1 * Hp:2 * Hp])
            g_g = jnp.tanh(gates[:, 2 * Hp:3 * Hp])
            o_g = jax.nn.sigmoid(gates[:, 3 * Hp:4 * Hp])

            c = f_g * c + i_g * g_g
            h = o_g * jnp.tanh(c)

            if l < L - 1:
                # Stash this layer's output sequence for the next layer's
                # whole-sequence input projection (top layer needs no stash).
                seq_scr[pl.ds(t * B, B), :] = h

    # Final FC on the top layer's last hidden state (still resident in vregs).
    out_ref[...] = (
        jnp.dot(h, wfc_ref[...], preferred_element_type=jnp.float32)
        + bfc_ref[...]
    ).astype(out_ref.dtype)


def fused_forward(fused, x_btd):
    """x_btd: (B, T, input_dim) batch-first. Returns (B, output_dim)."""
    B, T, D = x_btd.shape
    L = fused["wx_all"].shape[0]
    O = fused["w_fc"].shape[1]
    TB = T * B

    # Time-major flatten: row t*B + b = x[b, t, :]; lane-pad D -> HP (zeros).
    x_tbd = jnp.transpose(x_btd, (1, 0, 2)).astype(jnp.float32)        # (T, B, D)
    x_flat = jnp.zeros((TB, HP), jnp.float32).at[:, :D].set(
        x_tbd.reshape(TB, D))

    return pl.pallas_call(
        _fused_lstm_fc_kernel,
        out_shape=jax.ShapeDtypeStruct((B, O), jnp.float32),
        in_specs=[
            pl.BlockSpec((TB, HP), lambda: (0, 0)),
            pl.BlockSpec((L, HP, 4 * HP), lambda: (0, 0, 0)),
            pl.BlockSpec((L, HP, 4 * HP), lambda: (0, 0, 0)),
            pl.BlockSpec((L, 1, 4 * HP), lambda: (0, 0, 0)),
            pl.BlockSpec((HP, O), lambda: (0, 0)),
            pl.BlockSpec((1, O), lambda: (0, 0)),
        ],
        out_specs=pl.BlockSpec((B, O), lambda: (0, 0)),
        scratch_shapes=[
            pltpu.VMEM((TB, 4 * HP), jnp.float32),  # whole-seq input projection
            pltpu.VMEM((TB, HP), jnp.float32),      # current layer output seq
        ],
    )(x_flat, fused["wx_all"], fused["wh_all"], fused["b_all"],
      fused["w_fc"], fused["b_fc"])


@jax.jit
def lstm_forward(fused, x_btd):
    return fused_forward(fused, x_btd)


def init_params(key, input_dim, hidden_dim, num_layers, output_dim):
    """Raw PyTorch-layout params: uniform(-1/sqrt(H), 1/sqrt(H))."""
    k = 1.0 / math.sqrt(hidden_dim)
    params = {"layers": []}
    for layer in range(num_layers):
        d_in = input_dim if layer == 0 else hidden_dim
        key, k1, k2, k3, k4 = jax.random.split(key, 5)
        params["layers"].append(dict(
            w_ih=jax.random.uniform(k1, (4 * hidden_dim, d_in), jnp.float32, -k, k),
            w_hh=jax.random.uniform(k2, (4 * hidden_dim, hidden_dim), jnp.float32, -k, k),
            b_ih=jax.random.uniform(k3, (4 * hidden_dim,), jnp.float32, -k, k),
            b_hh=jax.random.uniform(k4, (4 * hidden_dim,), jnp.float32, -k, k),
        ))
    key, k5, k6 = jax.random.split(key, 3)
    params["w_fc"] = jax.random.uniform(k5, (output_dim, hidden_dim), jnp.float32, -k, k)
    params["b_fc"] = jax.random.uniform(k6, (output_dim,), jnp.float32, -k, k)
    return params


def prepare_fused_params(params, hidden_dim):
    """Pack raw weights into the padded layout used by the kernel.

    Per layer: wx = W_ih^T in rows [0, d_in), wh = W_hh^T in rows [0, H),
    both (HP, 4*HP); gate g occupies lane chunk [g*HP, g*HP + H).
    INVARIANT: all padding (weight rows/cols, bias lanes, FC rows) is exactly 0
    and initial h0/c0 are 0, so padded state lanes remain 0 through the whole
    recurrence (sigmoid(0)=0.5 only ever multiplies zeros).
    """
    H = hidden_dim
    wx_all, wh_all, b_all = [], [], []
    for lp in params["layers"]:
        w_ih_t = lp["w_ih"].T            # (d_in, 4H)
        w_hh_t = lp["w_hh"].T            # (H, 4H)
        d_in = w_ih_t.shape[0]
        assert d_in <= HP and H <= HP
        bias = lp["b_ih"] + lp["b_hh"]   # (4H,)
        wx = jnp.zeros((HP, 4 * HP), jnp.float32)
        wh = jnp.zeros((HP, 4 * HP), jnp.float32)
        b = jnp.zeros((4 * HP,), jnp.float32)
        for g in range(4):
            wx = wx.at[0:d_in, g * HP:g * HP + H].set(w_ih_t[:, g * H:(g + 1) * H])
            wh = wh.at[0:H, g * HP:g * HP + H].set(w_hh_t[:, g * H:(g + 1) * H])
            b = b.at[g * HP:g * HP + H].set(bias[g * H:(g + 1) * H])
        wx_all.append(wx)
        wh_all.append(wh)
        b_all.append(b.reshape(1, 4 * HP))
    O = params["w_fc"].shape[0]
    w_fc = jnp.zeros((HP, O), jnp.float32).at[0:H, :].set(params["w_fc"].T)
    return dict(
        wx_all=jnp.stack(wx_all),            # (L, HP, 4*HP)
        wh_all=jnp.stack(wh_all),            # (L, HP, 4*HP)
        b_all=jnp.stack(b_all),              # (L, 1, 4*HP)
        w_fc=w_fc,                           # (HP, O)
        b_fc=params["b_fc"].reshape(1, O),   # (1, O)
    )


def _reference_forward(params, x_btd):
    """Pure-JAX reference (lax.scan, f32, unpadded) for validation."""
    def cell(lp, carry, x_t):
        h, c = carry
        gates = x_t @ lp["w_ih"].T + h @ lp["w_hh"].T + lp["b_ih"] + lp["b_hh"]
        H = h.shape[1]
        i = jax.nn.sigmoid(gates[:, :H])
        f = jax.nn.sigmoid(gates[:, H:2 * H])
        g = jnp.tanh(gates[:, 2 * H:3 * H])
        o = jax.nn.sigmoid(gates[:, 3 * H:])
        c_new = f * c + i * g
        h_new = o * jnp.tanh(c_new)
        return (h_new, c_new), h_new

    seq = jnp.transpose(x_btd, (1, 0, 2)).astype(jnp.float32)  # (T, B, D)
    B = x_btd.shape[0]
    for lp in params["layers"]:
        H = lp["w_hh"].shape[1]
        init = (jnp.zeros((B, H), jnp.float32), jnp.zeros((B, H), jnp.float32))
        _, seq = jax.lax.scan(functools.partial(cell, lp), init, seq)
    return seq[-1] @ params["w_fc"].T + params["b_fc"]


if __name__ == "__main__":
    key = jax.random.PRNGKey(0)
    kp, kx = jax.random.split(key)

    # B=8 fills all 8 f32 sublanes per vreg (review item: free VPU/EUP/MXU util).
    B, T = 8, 8
    params = init_params(kp, input_dim, hidden_dim, num_layers, output_dim)
    fused = prepare_fused_params(params, hidden_dim)
    x = jax.random.normal(kx, (B, T, input_dim), dtype=jnp.float32)

    out = lstm_forward(fused, x)
    out = jax.block_until_ready(out)
    assert out.shape == (B, output_dim)

    ref = _reference_forward(params, x)
    assert jnp.allclose(out, ref, atol=1e-4, rtol=1e-4), (out, ref)

    print("KERNEL_OK")
</pallas_src>

<mosaic_0001>
module attributes {stable_mosaic.version = 11 : i64} {
  func.func @_fused_lstm_fc_kernel(%arg0: memref<64x128xf32, #tpu.memory_space<vmem>>, %arg1: memref<3x128x512xf32, #tpu.memory_space<vmem>>, %arg2: memref<3x128x512xf32, #tpu.memory_space<vmem>>, %arg3: memref<3x1x512xf32, #tpu.memory_space<vmem>>, %arg4: memref<128x1xf32, #tpu.memory_space<vmem>>, %arg5: memref<1x1xf32, #tpu.memory_space<vmem>>, %arg6: memref<8x1xf32, #tpu.memory_space<vmem>>, %arg7: memref<64x512xf32, #tpu.memory_space<vmem>>, %arg8: memref<64x128xf32, #tpu.memory_space<vmem>>) attributes {dimension_semantics = [], scalar_prefetch = 0 : i64, scratch_operands = 2 : i64, tpu.core_type = #tpu.core_type<tc>} {
    %c0 = arith.constant 0 : index
    %c0_0 = arith.constant 0 : index
    %0 = vector.load %arg0[%c0, %c0_0] : memref<64x128xf32, #tpu.memory_space<vmem>>, vector<64x128xf32>
    %c0_1 = arith.constant 0 : index
    %c0_2 = arith.constant 0 : index
    %c0_3 = arith.constant 0 : index
    %1 = vector.load %arg1[%c0_1, %c0_2, %c0_3] : memref<3x128x512xf32, #tpu.memory_space<vmem>>, vector<1x128x512xf32>
    %2 = vector.shape_cast %1 : vector<1x128x512xf32> to vector<128x512xf32>
    %cst = arith.constant dense<0.000000e+00> : vector<64x512xf32>
    %3 = tpu.matmul %0, %2, %cst {dimension_numbers = #tpu.dot_dimension_numbers<[1], [0], [0], [1], [0, 0, 1, 1], [], []>} : vector<64x128xf32>, vector<128x512xf32>, vector<64x512xf32> -> vector<64x512xf32>
    %c0_4 = arith.constant 0 : index
    %c0_5 = arith.constant 0 : index
    %4 = vector.load %arg7[%c0_4, %c0_5] : memref<64x512xf32, #tpu.memory_space<vmem>>, vector<64x512xf32>
    tpu.vector_store %arg7[%c0_4, %c0_5], %3 {strides = array<i32>} : memref<64x512xf32, #tpu.memory_space<vmem>>, vector<64x512xf32>,
    %c0_6 = arith.constant 0 : index
    %c0_7 = arith.constant 0 : index
    %c0_8 = arith.constant 0 : index
    %5 = vector.load %arg3[%c0_6, %c0_7, %c0_8] : memref<3x1x512xf32, #tpu.memory_space<vmem>>, vector<1x1x512xf32>
    %6 = vector.shape_cast %5 : vector<1x1x512xf32> to vector<1x512xf32>
    %7 = vector.shape_cast %6 : vector<1x512xf32> to vector<1x512xf32>
    %8 = vector.broadcast %7 : vector<1x512xf32> to vector<8x512xf32>
    %cst_9 = arith.constant 0.000000e+00 : f32
    %9 = vector.broadcast %cst_9 : f32 to vector<8x128xf32>
    %cst_10 = arith.constant 0.000000e+00 : f32
    %10 = vector.broadcast %cst_10 : f32 to vector<8x128xf32>
    %c0_11 = arith.constant 0 : index
    %c0_12 = arith.constant 0 : index
    %11 = vector.load %arg7[%c0_11, %c0_12] : memref<64x512xf32, #tpu.memory_space<vmem>>, vector<8x512xf32>
    %c0_13 = arith.constant 0 : index
    %c0_14 = arith.constant 0 : index
    %c0_15 = arith.constant 0 : index
    %12 = vector.load %arg2[%c0_13, %c0_14, %c0_15] : memref<3x128x512xf32, #tpu.memory_space<vmem>>, vector<1x128x512xf32>
    %13 = vector.shape_cast %12 : vector<1x128x512xf32> to vector<128x512xf32>
    %cst_16 = arith.constant dense<0.000000e+00> : vector<8x512xf32>
    %14 = tpu.matmul %9, %13, %cst_16 {dimension_numbers = #tpu.dot_dimension_numbers<[1], [0], [0], [1], [0, 0, 1, 1], [], []>} : vector<8x128xf32>, vector<128x512xf32>, vector<8x512xf32> -> vector<8x512xf32>
    %15 = arith.addf %11, %14 : vector<8x512xf32>
    %16 = arith.addf %15, %8 : vector<8x512xf32>
    %17 = vector.extract_strided_slice %16 {offsets = [0, 0], sizes = [8, 128], strides = [1, 1]} : vector<8x512xf32> to vector<8x128xf32>
    %18 = arith.negf %17 : vector<8x128xf32>
    %19 = math.exp %18 : vector<8x128xf32>
    %cst_17 = arith.constant 1.000000e+00 : f32
    %20 = vector.broadcast %cst_17 : f32 to vector<8x128xf32>
    %21 = arith.addf %20, %19 : vector<8x128xf32>
    %22 = arith.divf %20, %21 : vector<8x128xf32>
    %23 = vector.extract_strided_slice %16 {offsets = [0, 128], sizes = [8, 128], strides = [1, 1]} : vector<8x512xf32> to vector<8x128xf32>
    %24 = arith.negf %23 : vector<8x128xf32>
    %25 = math.exp %24 : vector<8x128xf32>
    %cst_18 = arith.constant 1.000000e+00 : f32
    %26 = vector.broadcast %cst_18 : f32 to vector<8x128xf32>
    %27 = arith.addf %26, %25 : vector<8x128xf32>
    %28 = arith.divf %26, %27 : vector<8x128xf32>
    %29 = vector.extract_strided_slice %16 {offsets = [0, 256], sizes = [8, 128], strides = [1, 1]} : vector<8x512xf32> to vector<8x128xf32>
    %30 = math.tanh %29 : vector<8x128xf32>
    %31 = vector.extract_strided_slice %16 {offsets = [0, 384], sizes = [8, 128], strides = [1, 1]} : vector<8x512xf32> to vector<8x128xf32>
    %32 = arith.negf %31 : vector<8x128xf32>
    %33 = math.exp %32 : vector<8x128xf32>
    %cst_19 = arith.constant 1.000000e+00 : f32
    %34 = vector.broadcast %cst_19 : f32 to vector<8x128xf32>
    %35 = arith.addf %34, %33 : vector<8x128xf32>
    %36 = arith.divf %34, %35 : vector<8x128xf32>
    %37 = arith.mulf %28, %10 : vector<8x128xf32>
    %38 = arith.mulf %22, %30 : vector<8x128xf32>
    %39 = arith.addf %37, %38 : vector<8x128xf32>
    %40 = math.tanh %39 : vector<8x128xf32>
    %41 = arith.mulf %36, %40 : vector<8x128xf32>
    %c0_20 = arith.constant 0 : index
    %c0_21 = arith.constant 0 : index
    %42 = vector.load %arg8[%c0_20, %c0_21] : memref<64x128xf32, #tpu.memory_space<vmem>>, vector<8x128xf32>
    tpu.vector_store %arg8[%c0_20, %c0_21], %41 {strides = array<i32>} : memref<64x128xf32, #tpu.memory_space<vmem>>, vector<8x128xf32>,
    %c8 = arith.constant 8 : index
    %c0_22 = arith.constant 0 : index
    %43 = vector.load %arg7[%c8, %c0_22] : memref<64x512xf32, #tpu.memory_space<vmem>>, vector<8x512xf32>
    %c0_23 = arith.constant 0 : index
    %c0_24 = arith.constant 0 : index
    %c0_25 = arith.constant 0 : index
    %44 = vector.load %arg2[%c0_23, %c0_24, %c0_25] : memref<3x128x512xf32, #tpu.memory_space<vmem>>, vector<1x128x512xf32>
    %45 = vector.shape_cast %44 : vector<1x128x512xf32> to vector<128x512xf32>
    %cst_26 = arith.constant dense<0.000000e+00> : vector<8x512xf32>
    %46 = tpu.matmul %41, %45, %cst_26 {dimension_numbers = #tpu.dot_dimension_numbers<[1], [0], [0], [1], [0, 0, 1, 1], [], []>} : vector<8x128xf32>, vector<128x512xf32>, vector<8x512xf32> -> vector<8x512xf32>
    %47 = arith.addf %43, %46 : vector<8x512xf32>
    %48 = arith.addf %47, %8 : vector<8x512xf32>
    %49 = vector.extract_strided_slice %48 {offsets = [0, 0], sizes = [8, 128], strides = [1, 1]} : vector<8x512xf32> to vector<8x128xf32>
    %50 = arith.negf %49 : vector<8x128xf32>
    %51 = math.exp %50 : vector<8x128xf32>
    %cst_27 = arith.constant 1.000000e+00 : f32
    %52 = vector.broadcast %cst_27 : f32 to vector<8x128xf32>
    %53 = arith.addf %52, %51 : vector<8x128xf32>
    %54 = arith.divf %52, %53 : vector<8x128xf32>
    %55 = vector.extract_strided_slice %48 {offsets = [0, 128], sizes = [8, 128], strides = [1, 1]} : vector<8x512xf32> to vector<8x128xf32>
    %56 = arith.negf %55 : vector<8x128xf32>
    %57 = math.exp %56 : vector<8x128xf32>
    %cst_28 = arith.constant 1.000000e+00 : f32
    %58 = vector.broadcast %cst_28 : f32 to vector<8x128xf32>
    %59 = arith.addf %58, %57 : vector<8x128xf32>
    %60 = arith.divf %58, %59 : vector<8x128xf32>
    %61 = vector.extract_strided_slice %48 {offsets = [0, 256], sizes = [8, 128], strides = [1, 1]} : vector<8x512xf32> to vector<8x128xf32>
    %62 = math.tanh %61 : vector<8x128xf32>
    %63 = vector.extract_strided_slice %48 {offsets = [0, 384], sizes = [8, 128], strides = [1, 1]} : vector<8x512xf32> to vector<8x128xf32>
    %64 = arith.negf %63 : vector<8x128xf32>
    %65 = math.exp %64 : vector<8x128xf32>
    %cst_29 = arith.constant 1.000000e+00 : f32
    %66 = vector.broadcast %cst_29 : f32 to vector<8x128xf32>
    %67 = arith.addf %66, %65 : vector<8x128xf32>
    %68 = arith.divf %66, %67 : vector<8x128xf32>
    %69 = arith.mulf %60, %39 : vector<8x128xf32>
    %70 = arith.mulf %54, %62 : vector<8x128xf32>
    %71 = arith.addf %69, %70 : vector<8x128xf32>
    %72 = math.tanh %71 : vector<8x128xf32>
    %73 = arith.mulf %68, %72 : vector<8x128xf32>
    %c8_30 = arith.constant 8 : index
    %c0_31 = arith.constant 0 : index
    %74 = vector.load %arg8[%c8_30, %c0_31] : memref<64x128xf32, #tpu.memory_space<vmem>>, vector<8x128xf32>
    tpu.vector_store %arg8[%c8_30, %c0_31], %73 {strides = array<i32>} : memref<64x128xf32, #tpu.memory_space<vmem>>, vector<8x128xf32>,
    %c16 = arith.constant 16 : index
    %c0_32 = arith.constant 0 : index
    %75 = vector.load %arg7[%c16, %c0_32] : memref<64x512xf32, #tpu.memory_space<vmem>>, vector<8x512xf32>
    %c0_33 = arith.constant 0 : index
    %c0_34 = arith.constant 0 : index
    %c0_35 = arith.constant 0 : index
    %76 = vector.load %arg2[%c0_33, %c0_34, %c0_35] : memref<3x128x512xf32, #tpu.memory_space<vmem>>, vector<1x128x512xf32>
    %77 = vector.shape_cast %76 : vector<1x128x512xf32> to vector<128x512xf32>
    %cst_36 = arith.constant dense<0.000000e+00> : vector<8x512xf32>
    %78 = tpu.matmul %73, %77, %cst_36 {dimension_numbers = #tpu.dot_dimension_numbers<[1], [0], [0], [1], [0, 0, 1, 1], [], []>} : vector<8x128xf32>, vector<128x512xf32>, vector<8x512xf32> -> vector<8x512xf32>
    %79 = arith.addf %75, %78 : vector<8x512xf32>
    %80 = arith.addf %79, %8 : vector<8x512xf32>
    %81 = vector.extract_strided_slice %80 {offsets = [0, 0], sizes = [8, 128], strides = [1, 1]} : vector<8x512xf32> to vector<8x128xf32>
    %82 = arith.negf %81 : vector<8x128xf32>
    %83 = math.exp %82 : vector<8x128xf32>
    %cst_37 = arith.constant 1.000000e+00 : f32
    %84 = vector.broadcast %cst_37 : f32 to vector<8x128xf32>
    %85 = arith.addf %84, %83 : vector<8x128xf32>
    %86 = arith.divf %84, %85 : vector<8x128xf32>
    %87 = vector.extract_strided_slice %80 {offsets = [0, 128], sizes = [8, 128], strides = [1, 1]} : vector<8x512xf32> to vector<8x128xf32>
    %88 = arith.negf %87 : vector<8x128xf32>
    %89 = math.exp %88 : vector<8x128xf32>
    %cst_38 = arith.constant 1.000000e+00 : f32
    %90 = vector.broadcast %cst_38 : f32 to vector<8x128xf32>
    %91 = arith.addf %90, %89 : vector<8x128xf32>
    %92 = arith.divf %90, %91 : vector<8x128xf32>
    %93 = vector.extract_strided_slice %80 {offsets = [0, 256], sizes = [8, 128], strides = [1, 1]} : vector<8x512xf32> to vector<8x128xf32>
    %94 = math.tanh %93 : vector<8x128xf32>
    %95 = vector.extract_strided_slice %80 {offsets = [0, 384], sizes = [8, 128], strides = [1, 1]} : vector<8x512xf32> to vector<8x128xf32>
    %96 = arith.negf %95 : vector<8x128xf32>
    %97 = math.exp %96 : vector<8x128xf32>
    %cst_39 = arith.constant 1.000000e+00 : f32
    %98 = vector.broadcast %cst_39 : f32 to vector<8x128xf32>
    %99 = arith.addf %98, %97 : vector<8x128xf32>
    %100 = arith.divf %98, %99 : vector<8x128xf32>
    %101 = arith.mulf %92, %71 : vector<8x128xf32>
    %102 = arith.mulf %86, %94 : vector<8x128xf32>
    %103 = arith.addf %101, %102 : vector<8x128xf32>
    %104 = math.tanh %103 : vector<8x128xf32>
    %105 = arith.mulf %100, %104 : vector<8x128xf32>
    %c16_40 = arith.constant 16 : index
    %c0_41 = arith.constant 0 : index
    %106 = vector.load %arg8[%c16_40, %c0_41] : memref<64x128xf32, #tpu.memory_space<vmem>>, vector<8x128xf32>
    tpu.vector_store %arg8[%c16_40, %c0_41], %105 {strides = array<i32>} : memref<64x128xf32, #tpu.memory_space<vmem>>, vector<8x128xf32>,
    %c24 = arith.constant 24 : index
    %c0_42 = arith.constant 0 : index
    %107 = vector.load %arg7[%c24, %c0_42] : memref<64x512xf32, #tpu.memory_space<vmem>>, vector<8x512xf32>
    %c0_43 = arith.constant 0 : index
    %c0_44 = arith.constant 0 : index
    %c0_45 = arith.constant 0 : index
    %108 = vector.load %arg2[%c0_43, %c0_44, %c0_45] : memref<3x128x512xf32, #tpu.memory_space<vmem>>, vector<1x128x512xf32>
    %109 = vector.shape_cast %108 : vector<1x128x512xf32> to vector<128x512xf32>
    %cst_46 = arith.constant dense<0.000000e+00> : vector<8x512xf32>
    %110 = tpu.matmul %105, %109, %cst_46 {dimension_numbers = #tpu.dot_dimension_numbers<[1], [0], [0], [1], [0, 0, 1, 1], [], []>} : vector<8x128xf32>, vector<128x512xf32>, vector<8x512xf32> -> vector<8x512xf32>
    %111 = arith.addf %107, %110 : vector<8x512xf32>
    %112 = arith.addf %111, %8 : vector<8x512xf32>
    %113 = vector.extract_strided_slice %112 {offsets = [0, 0], sizes = [8, 128], strides = [1, 1]} : vector<8x512xf32> to vector<8x128xf32>
    %114 = arith.negf %113 : vector<8x128xf32>
    %115 = math.exp %114 : vector<8x128xf32>
    %cst_47 = arith.constant 1.000000e+00 : f32
    %116 = vector.broadcast %cst_47 : f32 to vector<8x128xf32>
    %117 = arith.addf %116, %115 : vector<8x128xf32>
    %118 = arith.divf %116, %117 : vector<8x128xf32>
    %119 = vector.extract_strided_slice %112 {offsets = [0, 128], sizes = [8, 128], strides = [1, 1]} : vector<8x512xf32> to vector<8x128xf32>
    %120 = arith.negf %119 : vector<8x128xf32>
    %121 = math.exp %120 : vector<8x128xf32>
    %cst_48 = arith.constant 1.000000e+00 : f32
    %122 = vector.broadcast %cst_48 : f32 to vector<8x128xf32>
    %123 = arith.addf %122, %121 : vector<8x128xf32>
    %124 = arith.divf %122, %123 : vector<8x128xf32>
    %125 = vector.extract_strided_slice %112 {offsets = [0, 256], sizes = [8, 128], strides = [1, 1]} : vector<8x512xf32> to vector<8x128xf32>
    %126 = math.tanh %125 : vector<8x128xf32>
    %127 = vector.extract_strided_slice %112 {offsets = [0, 384], sizes = [8, 128], strides = [1, 1]} : vector<8x512xf32> to vector<8x128xf32>
    %128 = arith.negf %127 : vector<8x128xf32>
    %129 = math.exp %128 : vector<8x128xf32>
    %cst_49 = arith.constant 1.000000e+00 : f32
    %130 = vector.broadcast %cst_49 : f32 to vector<8x128xf32>
    %131 = arith.addf %130, %129 : vector<8x128xf32>
    %132 = arith.divf %130, %131 : vector<8x128xf32>
    %133 = arith.mulf %124, %103 : vector<8x128xf32>
    %134 = arith.mulf %118, %126 : vector<8x128xf32>
    %135 = arith.addf %133, %134 : vector<8x128xf32>
    %136 = math.tanh %135 : vector<8x128xf32>
    %137 = arith.mulf %132, %136 : vector<8x128xf32>
    %c24_50 = arith.constant 24 : index
    %c0_51 = arith.constant 0 : index
    %138 = vector.load %arg8[%c24_50, %c0_51] : memref<64x128xf32, #tpu.memory_space<vmem>>, vector<8x128xf32>
    tpu.vector_store %arg8[%c24_50, %c0_51], %137 {strides = array<i32>} : memref<64x128xf32, #tpu.memory_space<vmem>>, vector<8x128xf32>,
    %c32 = arith.constant 32 : index
    %c0_52 = arith.constant 0 : index
    %139 = vector.load %arg7[%c32, %c0_52] : memref<64x512xf32, #tpu.memory_space<vmem>>, vector<8x512xf32>
    %c0_53 = arith.constant 0 : index
    %c0_54 = arith.constant 0 : index
    %c0_55 = arith.constant 0 : index
    %140 = vector.load %arg2[%c0_53, %c0_54, %c0_55] : memref<3x128x512xf32, #tpu.memory_space<vmem>>, vector<1x128x512xf32>
    %141 = vector.shape_cast %140 : vector<1x128x512xf32> to vector<128x512xf32>
    %cst_56 = arith.constant dense<0.000000e+00> : vector<8x512xf32>
    %142 = tpu.matmul %137, %141, %cst_56 {dimension_numbers = #tpu.dot_dimension_numbers<[1], [0], [0], [1], [0, 0, 1, 1], [], []>} : vector<8x128xf32>, vector<128x512xf32>, vector<8x512xf32> -> vector<8x512xf32>
    %143 = arith.addf %139, %142 : vector<8x512xf32>
    %144 = arith.addf %143, %8 : vector<8x512xf32>
    %145 = vector.extract_strided_slice %144 {offsets = [0, 0], sizes = [8, 128], strides = [1, 1]} : vector<8x512xf32> to vector<8x128xf32>
    %146 = arith.negf %145 : vector<8x128xf32>
    %147 = math.exp %146 : vector<8x128xf32>
    %cst_57 = arith.constant 1.000000e+00 : f32
    %148 = vector.broadcast %cst_57 : f32 to vector<8x128xf32>
    %149 = arith.addf %148, %147 : vector<8x128xf32>
    %150 = arith.divf %148, %149 : vector<8x128xf32>
    %151 = vector.extract_strided_slice %144 {offsets = [0, 128], sizes = [8, 128], strides = [1, 1]} : vector<8x512xf32> to vector<8x128xf32>
    %152 = arith.negf %151 : vector<8x128xf32>
    %153 = math.exp %152 : vector<8x128xf32>
    %cst_58 = arith.constant 1.000000e+00 : f32
    %154 = vector.broadcast %cst_58 : f32 to vector<8x128xf32>
    %155 = arith.addf %154, %153 : vector<8x128xf32>
    %156 = arith.divf %154, %155 : vector<8x128xf32>
    %157 = vector.extract_strided_slice %144 {offsets = [0, 256], sizes = [8, 128], strides = [1, 1]} : vector<8x512xf32> to vector<8x128xf32>
    %158 = math.tanh %157 : vector<8x128xf32>
    %159 = vector.extract_strided_slice %144 {offsets = [0, 384], sizes = [8, 128], strides = [1, 1]} : vector<8x512xf32> to vector<8x128xf32>
    %160 = arith.negf %159 : vector<8x128xf32>
    %161 = math.exp %160 : vector<8x128xf32>
    %cst_59 = arith.constant 1.000000e+00 : f32
    %162 = vector.broadcast %cst_59 : f32 to vector<8x128xf32>
    %163 = arith.addf %162, %161 : vector<8x128xf32>
    %164 = arith.divf %162, %163 : vector<8x128xf32>
    %165 = arith.mulf %156, %135 : vector<8x128xf32>
    %166 = arith.mulf %150, %158 : vector<8x128xf32>
    %167 = arith.addf %165, %166 : vector<8x128xf32>
    %168 = math.tanh %167 : vector<8x128xf32>
    %169 = arith.mulf %164, %168 : vector<8x128xf32>
    %c32_60 = arith.constant 32 : index
    %c0_61 = arith.constant 0 : index
    %170 = vector.load %arg8[%c32_60, %c0_61] : memref<64x128xf32, #tpu.memory_space<vmem>>, vector<8x128xf32>
    tpu.vector_store %arg8[%c32_60, %c0_61], %169 {strides = array<i32>} : memref<64x128xf32, #tpu.memory_space<vmem>>, vector<8x128xf32>,
    %c40 = arith.constant 40 : index
    %c0_62 = arith.constant 0 : index
    %171 = vector.load %arg7[%c40, %c0_62] : memref<64x512xf32, #tpu.memory_space<vmem>>, vector<8x512xf32>
    %c0_63 = arith.constant 0 : index
    %c0_64 = arith.constant 0 : index
    %c0_65 = arith.constant 0 : index
    %172 = vector.load %arg2[%c0_63, %c0_64, %c0_65] : memref<3x128x512xf32, #tpu.memory_space<vmem>>, vector<1x128x512xf32>
    %173 = vector.shape_cast %172 : vector<1x128x512xf32> to vector<128x512xf32>
    %cst_66 = arith.constant dense<0.000000e+00> : vector<8x512xf32>
    %174 = tpu.matmul %169, %173, %cst_66 {dimension_numbers = #tpu.dot_dimension_numbers<[1], [0], [0], [1], [0, 0, 1, 1], [], []>} : vector<8x128xf32>, vector<128x512xf32>, vector<8x512xf32> -> vector<8x512xf32>
    %175 = arith.addf %171, %174 : vector<8x512xf32>
    %176 = arith.addf %175, %8 : vector<8x512xf32>
    %177 = vector.extract_strided_slice %176 {offsets = [0, 0], sizes = [8, 128], strides = [1, 1]} : vector<8x512xf32> to vector<8x128xf32>
    %178 = arith.negf %177 : vector<8x128xf32>
    %179 = math.exp %178 : vector<8x128xf32>
    %cst_67 = arith.constant 1.000000e+00 : f32
    %180 = vector.broadcast %cst_67 : f32 to vector<8x128xf32>
    %181 = arith.addf %180, %179 : vector<8x128xf32>
    %182 = arith.divf %180, %181 : vector<8x128xf32>
    %183 = vector.extract_strided_slice %176 {offsets = [0, 128], sizes = [8, 128], strides = [1, 1]} : vector<8x512xf32> to vector<8x128xf32>
    %184 = arith.negf %183 : vector<8x128xf32>
    %185 = math.exp %184 : vector<8x128xf32>
    %cst_68 = arith.constant 1.000000e+00 : f32
    %186 = vector.broadcast %cst_68 : f32 to vector<8x128xf32>
    %187 = arith.addf %186, %185 : vector<8x128xf32>
    %188 = arith.divf %186, %187 : vector<8x128xf32>
    %189 = vector.extract_strided_slice %176 {offsets = [0, 256], sizes = [8, 128], strides = [1, 1]} : vector<8x512xf32> to vector<8x128xf32>
    %190 = math.tanh %189 : vector<8x128xf32>
    %191 = vector.extract_strided_slice %176 {offsets = [0, 384], sizes = [8, 128], strides = [1, 1]} : vector<8x512xf32> to vector<8x128xf32>
    %192 = arith.negf %191 : vector<8x128xf32>
    %193 = math.exp %192 : vector<8x128xf32>
    %cst_69 = arith.constant 1.000000e+00 : f32
    %194 = vector.broadcast %cst_69 : f32 to vector<8x128xf32>
    %195 = arith.addf %194, %193 : vector<8x128xf32>
    %196 = arith.divf %194, %195 : vector<8x128xf32>
    %197 = arith.mulf %188, %167 : vector<8x128xf32>
    %198 = arith.mulf %182, %190 : vector<8x128xf32>
    %199 = arith.addf %197, %198 : vector<8x128xf32>
    %200 = math.tanh %199 : vector<8x128xf32>
    %201 = arith.mulf %196, %200 : vector<8x128xf32>
    %c40_70 = arith.constant 40 : index
    %c0_71 = arith.constant 0 : index
    %202 = vector.load %arg8[%c40_70, %c0_71] : memref<64x128xf32, #tpu.memory_space<vmem>>, vector<8x128xf32>
    tpu.vector_store %arg8[%c40_70, %c0_71], %201 {strides = array<i32>} : memref<64x128xf32, #tpu.memory_space<vmem>>, vector<8x128xf32>,
    %c48 = arith.constant 48 : index
    %c0_72 = arith.constant 0 : index
    %203 = vector.load %arg7[%c48, %c0_72] : memref<64x512xf32, #tpu.memory_space<vmem>>, vector<8x512xf32>
    %c0_73 = arith.constant 0 : index
    %c0_74 = arith.constant 0 : index
    %c0_75 = arith.constant 0 : index
    %204 = vector.load %arg2[%c0_73, %c0_74, %c0_75] : memref<3x128x512xf32, #tpu.memory_space<vmem>>, vector<1x128x512xf32>
    %205 = vector.shape_cast %204 : vector<1x128x512xf32> to vector<128x512xf32>
    %cst_76 = arith.constant dense<0.000000e+00> : vector<8x512xf32>
    %206 = tpu.matmul %201, %205, %cst_76 {dimension_numbers = #tpu.dot_dimension_numbers<[1], [0], [0], [1], [0, 0, 1, 1], [], []>} : vector<8x128xf32>, vector<128x512xf32>, vector<8x512xf32> -> vector<8x512xf32>
    %207 = arith.addf %203, %206 : vector<8x512xf32>
    %208 = arith.addf %207, %8 : vector<8x512xf32>
    %209 = vector.extract_strided_slice %208 {offsets = [0, 0], sizes = [8, 128], strides = [1, 1]} : vector<8x512xf32> to vector<8x128xf32>
    %210 = arith.negf %209 : vector<8x128xf32>
    %211 = math.exp %210 : vector<8x128xf32>
    %cst_77 = arith.constant 1.000000e+00 : f32
    %212 = vector.broadcast %cst_77 : f32 to vector<8x128xf32>
    %213 = arith.addf %212, %211 : vector<8x128xf32>
    %214 = arith.divf %212, %213 : vector<8x128xf32>
    %215 = vector.extract_strided_slice %208 {offsets = [0, 128], sizes = [8, 128], strides = [1, 1]} : vector<8x512xf32> to vector<8x128xf32>
    %216 = arith.negf %215 : vector<8x128xf32>
    %217 = math.exp %216 : vector<8x128xf32>
    %cst_78 = arith.constant 1.000000e+00 : f32
    %218 = vector.broadcast %cst_78 : f32 to vector<8x128xf32>
    %219 = arith.addf %218, %217 : vector<8x128xf32>
    %220 = arith.divf %218, %219 : vector<8x128xf32>
    %221 = vector.extract_strided_slice %208 {offsets = [0, 256], sizes = [8, 128], strides = [1, 1]} : vector<8x512xf32> to vector<8x128xf32>
    %222 = math.tanh %221 : vector<8x128xf32>
    %223 = vector.extract_strided_slice %208 {offsets = [0, 384], sizes = [8, 128], strides = [1, 1]} : vector<8x512xf32> to vector<8x128xf32>
    %224 = arith.negf %223 : vector<8x128xf32>
    %225 = math.exp %224 : vector<8x128xf32>
    %cst_79 = arith.constant 1.000000e+00 : f32
    %226 = vector.broadcast %cst_79 : f32 to vector<8x128xf32>
    %227 = arith.addf %226, %225 : vector<8x128xf32>
    %228 = arith.divf %226, %227 : vector<8x128xf32>
    %229 = arith.mulf %220, %199 : vector<8x128xf32>
    %230 = arith.mulf %214, %222 : vector<8x128xf32>
    %231 = arith.addf %229, %230 : vector<8x128xf32>
    %232 = math.tanh %231 : vector<8x128xf32>
    %233 = arith.mulf %228, %232 : vector<8x128xf32>
    %c48_80 = arith.constant 48 : index
    %c0_81 = arith.constant 0 : index
    %234 = vector.load %arg8[%c48_80, %c0_81] : memref<64x128xf32, #tpu.memory_space<vmem>>, vector<8x128xf32>
    tpu.vector_store %arg8[%c48_80, %c0_81], %233 {strides = array<i32>} : memref<64x128xf32, #tpu.memory_space<vmem>>, vector<8x128xf32>,
    %c56 = arith.constant 56 : index
    %c0_82 = arith.constant 0 : index
    %235 = vector.load %arg7[%c56, %c0_82] : memref<64x512xf32, #tpu.memory_space<vmem>>, vector<8x512xf32>
    %c0_83 = arith.constant 0 : index
    %c0_84 = arith.constant 0 : index
    %c0_85 = arith.constant 0 : index
    %236 = vector.load %arg2[%c0_83, %c0_84, %c0_85] : memref<3x128x512xf32, #tpu.memory_space<vmem>>, vector<1x128x512xf32>
    %237 = vector.shape_cast %236 : vector<1x128x512xf32> to vector<128x512xf32>
    %cst_86 = arith.constant dense<0.000000e+00> : vector<8x512xf32>
    %238 = tpu.matmul %233, %237, %cst_86 {dimension_numbers = #tpu.dot_dimension_numbers<[1], [0], [0], [1], [0, 0, 1, 1], [], []>} : vector<8x128xf32>, vector<128x512xf32>, vector<8x512xf32> -> vector<8x512xf32>
    %239 = arith.addf %235, %238 : vector<8x512xf32>
    %240 = arith.addf %239, %8 : vector<8x512xf32>
    %241 = vector.extract_strided_slice %240 {offsets = [0, 0], sizes = [8, 128], strides = [1, 1]} : vector<8x512xf32> to vector<8x128xf32>
    %242 = arith.negf %241 : vector<8x128xf32>
    %243 = math.exp %242 : vector<8x128xf32>
    %cst_87 = arith.constant 1.000000e+00 : f32
    %244 = vector.broadcast %cst_87 : f32 to vector<8x128xf32>
    %245 = arith.addf %244, %243 : vector<8x128xf32>
    %246 = arith.divf %244, %245 : vector<8x128xf32>
    %247 = vector.extract_strided_slice %240 {offsets = [0, 128], sizes = [8, 128], strides = [1, 1]} : vector<8x512xf32> to vector<8x128xf32>
    %248 = arith.negf %247 : vector<8x128xf32>
    %249 = math.exp %248 : vector<8x128xf32>
    %cst_88 = arith.constant 1.000000e+00 : f32
    %250 = vector.broadcast %cst_88 : f32 to vector<8x128xf32>
    %251 = arith.addf %250, %249 : vector<8x128xf32>
    %252 = arith.divf %250, %251 : vector<8x128xf32>
    %253 = vector.extract_strided_slice %240 {offsets = [0, 256], sizes = [8, 128], strides = [1, 1]} : vector<8x512xf32> to vector<8x128xf32>
    %254 = math.tanh %253 : vector<8x128xf32>
    %255 = vector.extract_strided_slice %240 {offsets = [0, 384], sizes = [8, 128], strides = [1, 1]} : vector<8x512xf32> to vector<8x128xf32>
    %256 = arith.negf %255 : vector<8x128xf32>
    %257 = math.exp %256 : vector<8x128xf32>
    %cst_89 = arith.constant 1.000000e+00 : f32
    %258 = vector.broadcast %cst_89 : f32 to vector<8x128xf32>
    %259 = arith.addf %258, %257 : vector<8x128xf32>
    %260 = arith.divf %258, %259 : vector<8x128xf32>
    %261 = arith.mulf %252, %231 : vector<8x128xf32>
    %262 = arith.mulf %246, %254 : vector<8x128xf32>
    %263 = arith.addf %261, %262 : vector<8x128xf32>
    %264 = math.tanh %263 : vector<8x128xf32>
    %265 = arith.mulf %260, %264 : vector<8x128xf32>
    %c56_90 = arith.constant 56 : index
    %c0_91 = arith.constant 0 : index
    %266 = vector.load %arg8[%c56_90, %c0_91] : memref<64x128xf32, #tpu.memory_space<vmem>>, vector<8x128xf32>
    tpu.vector_store %arg8[%c56_90, %c0_91], %265 {strides = array<i32>} : memref<64x128xf32, #tpu.memory_space<vmem>>, vector<8x128xf32>,
    %c0_92 = arith.constant 0 : index
    %c0_93 = arith.constant 0 : index
    %267 = vector.load %arg8[%c0_92, %c0_93] : memref<64x128xf32, #tpu.memory_space<vmem>>, vector<64x128xf32>
    %c1 = arith.constant 1 : index
    %c0_94 = arith.constant 0 : index
    %c0_95 = arith.constant 0 : index
    %268 = vector.load %arg1[%c1, %c0_94, %c0_95] : memref<3x128x512xf32, #tpu.memory_space<vmem>>, vector<1x128x512xf32>
    %269 = vector.shape_cast %268 : vector<1x128x512xf32> to vector<128x512xf32>
    %cst_96 = arith.constant dense<0.000000e+00> : vector<64x512xf32>
    %270 = tpu.matmul %267, %269, %cst_96 {dimension_numbers = #tpu.dot_dimension_numbers<[1], [0], [0], [1], [0, 0, 1, 1], [], []>} : vector<64x128xf32>, vector<128x512xf32>, vector<64x512xf32> -> vector<64x512xf32>
    %c0_97 = arith.constant 0 : index
    %c0_98 = arith.constant 0 : index
    %271 = vector.load %arg7[%c0_97, %c0_98] : memref<64x512xf32, #tpu.memory_space<vmem>>, vector<64x512xf32>
    tpu.vector_store %arg7[%c0_97, %c0_98], %270 {strides = array<i32>} : memref<64x512xf32, #tpu.memory_space<vmem>>, vector<64x512xf32>,
    %c1_99 = arith.constant 1 : index
    %c0_100 = arith.constant 0 : index
    %c0_101 = arith.constant 0 : index
    %272 = vector.load %arg3[%c1_99, %c0_100, %c0_101] : memref<3x1x512xf32, #tpu.memory_space<vmem>>, vector<1x1x512xf32>
    %273 = vector.shape_cast %272 : vector<1x1x512xf32> to vector<1x512xf32>
    %274 = vector.shape_cast %273 : vector<1x512xf32> to vector<1x512xf32>
    %275 = vector.broadcast %274 : vector<1x512xf32> to vector<8x512xf32>
    %cst_102 = arith.constant 0.000000e+00 : f32
    %276 = vector.broadcast %cst_102 : f32 to vector<8x128xf32>
    %cst_103 = arith.constant 0.000000e+00 : f32
    %277 = vector.broadcast %cst_103 : f32 to vector<8x128xf32>
    %c0_104 = arith.constant 0 : index
    %c0_105 = arith.constant 0 : index
    %278 = vector.load %arg7[%c0_104, %c0_105] : memref<64x512xf32, #tpu.memory_space<vmem>>, vector<8x512xf32>
    %c1_106 = arith.constant 1 : index
    %c0_107 = arith.constant 0 : index
    %c0_108 = arith.constant 0 : index
    %279 = vector.load %arg2[%c1_106, %c0_107, %c0_108] : memref<3x128x512xf32, #tpu.memory_space<vmem>>, vector<1x128x512xf32>
    %280 = vector.shape_cast %279 : vector<1x128x512xf32> to vector<128x512xf32>
    %cst_109 = arith.constant dense<0.000000e+00> : vector<8x512xf32>
    %281 = tpu.matmul %276, %280, %cst_109 {dimension_numbers = #tpu.dot_dimension_numbers<[1], [0], [0], [1], [0, 0, 1, 1], [], []>} : vector<8x128xf32>, vector<128x512xf32>, vector<8x512xf32> -> vector<8x512xf32>
    %282 = arith.addf %278, %281 : vector<8x512xf32>
    %283 = arith.addf %282, %275 : vector<8x512xf32>
    %284 = vector.extract_strided_slice %283 {offsets = [0, 0], sizes = [8, 128], strides = [1, 1]} : vector<8x512xf32> to vector<8x128xf32>
    %285 = arith.negf %284 : vector<8x128xf32>
    %286 = math.exp %285 : vector<8x128xf32>
    %cst_110 = arith.constant 1.000000e+00 : f32
    %287 = vector.broadcast %cst_110 : f32 to vector<8x128xf32>
    %288 = arith.addf %287, %286 : vector<8x128xf32>
    %289 = arith.divf %287, %288 : vector<8x128xf32>
    %290 = vector.extract_strided_slice %283 {offsets = [0, 128], sizes = [8, 128], strides = [1, 1]} : vector<8x512xf32> to vector<8x128xf32>
    %291 = arith.negf %290 : vector<8x128xf32>
    %292 = math.exp %291 : vector<8x128xf32>
    %cst_111 = arith.constant 1.000000e+00 : f32
    %293 = vector.broadcast %cst_111 : f32 to vector<8x128xf32>
    %294 = arith.addf %293, %292 : vector<8x128xf32>
    %295 = arith.divf %293, %294 : vector<8x128xf32>
    %296 = vector.extract_strided_slice %283 {offsets = [0, 256], sizes = [8, 128], strides = [1, 1]} : vector<8x512xf32> to vector<8x128xf32>
    %297 = math.tanh %296 : vector<8x128xf32>
    %298 = vector.extract_strided_slice %283 {offsets = [0, 384], sizes = [8, 128], strides = [1, 1]} : vector<8x512xf32> to vector<8x128xf32>
    %299 = arith.negf %298 : vector<8x128xf32>
    %300 = math.exp %299 : vector<8x128xf32>
    %cst_112 = arith.constant 1.000000e+00 : f32
    %301 = vector.broadcast %cst_112 : f32 to vector<8x128xf32>
    %302 = arith.addf %301, %300 : vector<8x128xf32>
    %303 = arith.divf %301, %302 : vector<8x128xf32>
    %304 = arith.mulf %295, %277 : vector<8x128xf32>
    %305 = arith.mulf %289, %297 : vector<8x128xf32>
    %306 = arith.addf %304, %305 : vector<8x128xf32>
    %307 = math.tanh %306 : vector<8x128xf32>
    %308 = arith.mulf %303, %307 : vector<8x128xf32>
    %c0_113 = arith.constant 0 : index
    %c0_114 = arith.constant 0 : index
    %309 = vector.load %arg8[%c0_113, %c0_114] : memref<64x128xf32, #tpu.memory_space<vmem>>, vector<8x128xf32>
    tpu.vector_store %arg8[%c0_113, %c0_114], %308 {strides = array<i32>} : memref<64x128xf32, #tpu.memory_space<vmem>>, vector<8x128xf32>,
    %c8_115 = arith.constant 8 : index
    %c0_116 = arith.constant 0 : index
    %310 = vector.load %arg7[%c8_115, %c0_116] : memref<64x512xf32, #tpu.memory_space<vmem>>, vector<8x512xf32>
    %c1_117 = arith.constant 1 : index
    %c0_118 = arith.constant 0 : index
    %c0_119 = arith.constant 0 : index
    %311 = vector.load %arg2[%c1_117, %c0_118, %c0_119] : memref<3x128x512xf32, #tpu.memory_space<vmem>>, vector<1x128x512xf32>
    %312 = vector.shape_cast %311 : vector<1x128x512xf32> to vector<128x512xf32>
    %cst_120 = arith.constant dense<0.000000e+00> : vector<8x512xf32>
    %313 = tpu.matmul %308, %312, %cst_120 {dimension_numbers = #tpu.dot_dimension_numbers<[1], [0], [0], [1], [0, 0, 1, 1], [], []>} : vector<8x128xf32>, vector<128x512xf32>, vector<8x512xf32> -> vector<8x512xf32>
    %314 = arith.addf %310, %313 : vector<8x512xf32>
    %315 = arith.addf %314, %275 : vector<8x512xf32>
    %316 = vector.extract_strided_slice %315 {offsets = [0, 0], sizes = [8, 128], strides = [1, 1]} : vector<8x512xf32> to vector<8x128xf32>
    %317 = arith.negf %316 : vector<8x128xf32>
    %318 = math.exp %317 : vector<8x128xf32>
    %cst_121 = arith.constant 1.000000e+00 : f32
    %319 = vector.broadcast %cst_121 : f32 to vector<8x128xf32>
    %320 = arith.addf %319, %318 : vector<8x128xf32>
    %321 = arith.divf %319, %320 : vector<8x128xf32>
    %322 = vector.extract_strided_slice %315 {offsets = [0, 128], sizes = [8, 128], strides = [1, 1]} : vector<8x512xf32> to vector<8x128xf32>
    %323 = arith.negf %322 : vector<8x128xf32>
    %324 = math.exp %323 : vector<8x128xf32>
    %cst_122 = arith.constant 1.000000e+00 : f32
    %325 = vector.broadcast %cst_122 : f32 to vector<8x128xf32>
    %326 = arith.addf %325, %324 : vector<8x128xf32>
    %327 = arith.divf %325, %326 : vector<8x128xf32>
    %328 = vector.extract_strided_slice %315 {offsets = [0, 256], sizes = [8, 128], strides = [1, 1]} : vector<8x512xf32> to vector<8x128xf32>
    %329 = math.tanh %328 : vector<8x128xf32>
    %330 = vector.extract_strided_slice %315 {offsets = [0, 384], sizes = [8, 128], strides = [1, 1]} : vector<8x512xf32> to vector<8x128xf32>
    %331 = arith.negf %330 : vector<8x128xf32>
    %332 = math.exp %331 : vector<8x128xf32>
    %cst_123 = arith.constant 1.000000e+00 : f32
    %333 = vector.broadcast %cst_123 : f32 to vector<8x128xf32>
    %334 = arith.addf %333, %332 : vector<8x128xf32>
    %335 = arith.divf %333, %334 : vector<8x128xf32>
    %336 = arith.mulf %327, %306 : vector<8x128xf32>
    %337 = arith.mulf %321, %329 : vector<8x128xf32>
    %338 = arith.addf %336, %337 : vector<8x128xf32>
    %339 = math.tanh %338 : vector<8x128xf32>
    %340 = arith.mulf %335, %339 : vector<8x128xf32>
    %c8_124 = arith.constant 8 : index
    %c0_125 = arith.constant 0 : index
    %341 = vector.load %arg8[%c8_124, %c0_125] : memref<64x128xf32, #tpu.memory_space<vmem>>, vector<8x128xf32>
    tpu.vector_store %arg8[%c8_124, %c0_125], %340 {strides = array<i32>} : memref<64x128xf32, #tpu.memory_space<vmem>>, vector<8x128xf32>,
    %c16_126 = arith.constant 16 : index
    %c0_127 = arith.constant 0 : index
    %342 = vector.load %arg7[%c16_126, %c0_127] : memref<64x512xf32, #tpu.memory_space<vmem>>, vector<8x512xf32>
    %c1_128 = arith.constant 1 : index
    %c0_129 = arith.constant 0 : index
    %c0_130 = arith.constant 0 : index
    %343 = vector.load %arg2[%c1_128, %c0_129, %c0_130] : memref<3x128x512xf32, #tpu.memory_space<vmem>>, vector<1x128x512xf32>
    %344 = vector.shape_cast %343 : vector<1x128x512xf32> to vector<128x512xf32>
    %cst_131 = arith.constant dense<0.000000e+00> : vector<8x512xf32>
    %345 = tpu.matmul %340, %344, %cst_131 {dimension_numbers = #tpu.dot_dimension_numbers<[1], [0], [0], [1], [0, 0, 1, 1], [], []>} : vector<8x128xf32>, vector<128x512xf32>, vector<8x512xf32> -> vector<8x512xf32>
    %346 = arith.addf %342, %345 : vector<8x512xf32>
    %347 = arith.addf %346, %275 : vector<8x512xf32>
    %348 = vector.extract_strided_slice %347 {offsets = [0, 0], sizes = [8, 128], strides = [1, 1]} : vector<8x512xf32> to vector<8x128xf32>
    %349 = arith.negf %348 : vector<8x128xf32>
    %350 = math.exp %349 : vector<8x128xf32>
    %cst_132 = arith.constant 1.000000e+00 : f32
    %351 = vector.broadcast %cst_132 : f32 to vector<8x128xf32>
    %352 = arith.addf %351, %350 : vector<8x128xf32>
    %353 = arith.divf %351, %352 : vector<8x128xf32>
    %354 = vector.extract_strided_slice %347 {offsets = [0, 128], sizes = [8, 128], strides = [1, 1]} : vector<8x512xf32> to vector<8x128xf32>
    %355 = arith.negf %354 : vector<8x128xf32>
    %356 = math.exp %355 : vector<8x128xf32>
    %cst_133 = arith.constant 1.000000e+00 : f32
    %357 = vector.broadcast %cst_133 : f32 to vector<8x128xf32>
    %358 = arith.addf %357, %356 : vector<8x128xf32>
    %359 = arith.divf %357, %358 : vector<8x128xf32>
    %360 = vector.extract_strided_slice %347 {offsets = [0, 256], sizes = [8, 128], strides = [1, 1]} : vector<8x512xf32> to vector<8x128xf32>
    %361 = math.tanh %360 : vector<8x128xf32>
    %362 = vector.extract_strided_slice %347 {offsets = [0, 384], sizes = [8, 128], strides = [1, 1]} : vector<8x512xf32> to vector<8x128xf32>
    %363 = arith.negf %362 : vector<8x128xf32>
    %364 = math.exp %363 : vector<8x128xf32>
    %cst_134 = arith.constant 1.000000e+00 : f32
    %365 = vector.broadcast %cst_134 : f32 to vector<8x128xf32>
    %366 = arith.addf %365, %364 : vector<8x128xf32>
    %367 = arith.divf %365, %366 : vector<8x128xf32>
    %368 = arith.mulf %359, %338 : vector<8x128xf32>
    %369 = arith.mulf %353, %361 : vector<8x128xf32>
    %370 = arith.addf %368, %369 : vector<8x128xf32>
    %371 = math.tanh %370 : vector<8x128xf32>
    %372 = arith.mulf %367, %371 : vector<8x128xf32>
    %c16_135 = arith.constant 16 : index
    %c0_136 = arith.constant 0 : index
    %373 = vector.load %arg8[%c16_135, %c0_136] : memref<64x128xf32, #tpu.memory_space<vmem>>, vector<8x128xf32>
    tpu.vector_store %arg8[%c16_135, %c0_136], %372 {strides = array<i32>} : memref<64x128xf32, #tpu.memory_space<vmem>>, vector<8x128xf32>,
    %c24_137 = arith.constant 24 : index
    %c0_138 = arith.constant 0 : index
    %374 = vector.load %arg7[%c24_137, %c0_138] : memref<64x512xf32, #tpu.memory_space<vmem>>, vector<8x512xf32>
    %c1_139 = arith.constant 1 : index
    %c0_140 = arith.constant 0 : index
    %c0_141 = arith.constant 0 : index
    %375 = vector.load %arg2[%c1_139, %c0_140, %c0_141] : memref<3x128x512xf32, #tpu.memory_space<vmem>>, vector<1x128x512xf32>
    %376 = vector.shape_cast %375 : vector<1x128x512xf32> to vector<128x512xf32>
    %cst_142 = arith.constant dense<0.000000e+00> : vector<8x512xf32>
    %377 = tpu.matmul %372, %376, %cst_142 {dimension_numbers = #tpu.dot_dimension_numbers<[1], [0], [0], [1], [0, 0, 1, 1], [], []>} : vector<8x128xf32>, vector<128x512xf32>, vector<8x512xf32> -> vector<8x512xf32>
    %378 = arith.addf %374, %377 : vector<8x512xf32>
    %379 = arith.addf %378, %275 : vector<8x512xf32>
    %380 = vector.extract_strided_slice %379 {offsets = [0, 0], sizes = [8, 128], strides = [1, 1]} : vector<8x512xf32> to vector<8x128xf32>
    %381 = arith.negf %380 : vector<8x128xf32>
    %382 = math.exp %381 : vector<8x128xf32>
    %cst_143 = arith.constant 1.000000e+00 : f32
    %383 = vector.broadcast %cst_143 : f32 to vector<8x128xf32>
    %384 = arith.addf %383, %382 : vector<8x128xf32>
    %385 = arith.divf %383, %384 : vector<8x128xf32>
    %386 = vector.extract_strided_slice %379 {offsets = [0, 128], sizes = [8, 128], strides = [1, 1]} : vector<8x512xf32> to vector<8x128xf32>
    %387 = arith.negf %386 : vector<8x128xf32>
    %388 = math.exp %387 : vector<8x128xf32>
    %cst_144 = arith.constant 1.000000e+00 : f32
    %389 = vector.broadcast %cst_144 : f32 to vector<8x128xf32>
    %390 = arith.addf %389, %388 : vector<8x128xf32>
    %391 = arith.divf %389, %390 : vector<8x128xf32>
    %392 = vector.extract_strided_slice %379 {offsets = [0, 256], sizes = [8, 128], strides = [1, 1]} : vector<8x512xf32> to vector<8x128xf32>
    %393 = math.tanh %392 : vector<8x128xf32>
    %394 = vector.extract_strided_slice %379 {offsets = [0, 384], sizes = [8, 128], strides = [1, 1]} : vector<8x512xf32> to vector<8x128xf32>
    %395 = arith.negf %394 : vector<8x128xf32>
    %396 = math.exp %395 : vector<8x128xf32>
    %cst_145 = arith.constant 1.000000e+00 : f32
    %397 = vector.broadcast %cst_145 : f32 to vector<8x128xf32>
    %398 = arith.addf %397, %396 : vector<8x128xf32>
    %399 = arith.divf %397, %398 : vector<8x128xf32>
    %400 = arith.mulf %391, %370 : vector<8x128xf32>
    %401 = arith.mulf %385, %393 : vector<8x128xf32>
    %402 = arith.addf %400, %401 : vector<8x128xf32>
    %403 = math.tanh %402 : vector<8x128xf32>
    %404 = arith.mulf %399, %403 : vector<8x128xf32>
    %c24_146 = arith.constant 24 : index
    %c0_147 = arith.constant 0 : index
    %405 = vector.load %arg8[%c24_146, %c0_147] : memref<64x128xf32, #tpu.memory_space<vmem>>, vector<8x128xf32>
    tpu.vector_store %arg8[%c24_146, %c0_147], %404 {strides = array<i32>} : memref<64x128xf32, #tpu.memory_space<vmem>>, vector<8x128xf32>,
    %c32_148 = arith.constant 32 : index
    %c0_149 = arith.constant 0 : index
    %406 = vector.load %arg7[%c32_148, %c0_149] : memref<64x512xf32, #tpu.memory_space<vmem>>, vector<8x512xf32>
    %c1_150 = arith.constant 1 : index
    %c0_151 = arith.constant 0 : index
    %c0_152 = arith.constant 0 : index
    %407 = vector.load %arg2[%c1_150, %c0_151, %c0_152] : memref<3x128x512xf32, #tpu.memory_space<vmem>>, vector<1x128x512xf32>
    %408 = vector.shape_cast %407 : vector<1x128x512xf32> to vector<128x512xf32>
    %cst_153 = arith.constant dense<0.000000e+00> : vector<8x512xf32>
    %409 = tpu.matmul %404, %408, %cst_153 {dimension_numbers = #tpu.dot_dimension_numbers<[1], [0], [0], [1], [0, 0, 1, 1], [], []>} : vector<8x128xf32>, vector<128x512xf32>, vector<8x512xf32> -> vector<8x512xf32>
    %410 = arith.addf %406, %409 : vector<8x512xf32>
    %411 = arith.addf %410, %275 : vector<8x512xf32>
    %412 = vector.extract_strided_slice %411 {offsets = [0, 0], sizes = [8, 128], strides = [1, 1]} : vector<8x512xf32> to vector<8x128xf32>
    %413 = arith.negf %412 : vector<8x128xf32>
    %414 = math.exp %413 : vector<8x128xf32>
    %cst_154 = arith.constant 1.000000e+00 : f32
    %415 = vector.broadcast %cst_154 : f32 to vector<8x128xf32>
    %416 = arith.addf %415, %414 : vector<8x128xf32>
    %417 = arith.divf %415, %416 : vector<8x128xf32>
    %418 = vector.extract_strided_slice %411 {offsets = [0, 128], sizes = [8, 128], strides = [1, 1]} : vector<8x512xf32> to vector<8x128xf32>
    %419 = arith.negf %418 : vector<8x128xf32>
    %420 = math.exp %419 : vector<8x128xf32>
    %cst_155 = arith.constant 1.000000e+00 : f32
    %421 = vector.broadcast %cst_155 : f32 to vector<8x128xf32>
    %422 = arith.addf %421, %420 : vector<8x128xf32>
    %423 = arith.divf %421, %422 : vector<8x128xf32>
    %424 = vector.extract_strided_slice %411 {offsets = [0, 256], sizes = [8, 128], strides = [1, 1]} : vector<8x512xf32> to vector<8x128xf32>
    %425 = math.tanh %424 : vector<8x128xf32>
    %426 = vector.extract_strided_slice %411 {offsets = [0, 384], sizes = [8, 128], strides = [1, 1]} : vector<8x512xf32> to vector<8x128xf32>
    %427 = arith.negf %426 : vector<8x128xf32>
    %428 = math.exp %427 : vector<8x128xf32>
    %cst_156 = arith.constant 1.000000e+00 : f32
    %429 = vector.broadcast %cst_156 : f32 to vector<8x128xf32>
    %430 = arith.addf %429, %428 : vector<8x128xf32>
    %431 = arith.divf %429, %430 : vector<8x128xf32>
    %432 = arith.mulf %423, %402 : vector<8x128xf32>
    %433 = arith.mulf %417, %425 : vector<8x128xf32>
    %434 = arith.addf %432, %433 : vector<8x128xf32>
    %435 = math.tanh %434 : vector<8x128xf32>
    %436 = arith.mulf %431, %435 : vector<8x128xf32>
    %c32_157 = arith.constant 32 : index
    %c0_158 = arith.constant 0 : index
    %437 = vector.load %arg8[%c32_157, %c0_158] : memref<64x128xf32, #tpu.memory_space<vmem>>, vector<8x128xf32>
    tpu.vector_store %arg8[%c32_157, %c0_158], %436 {strides = array<i32>} : memref<64x128xf32, #tpu.memory_space<vmem>>, vector<8x128xf32>,
    %c40_159 = arith.constant 40 : index
    %c0_160 = arith.constant 0 : index
    %438 = vector.load %arg7[%c40_159, %c0_160] : memref<64x512xf32, #tpu.memory_space<vmem>>, vector<8x512xf32>
    %c1_161 = arith.constant 1 : index
    %c0_162 = arith.constant 0 : index
    %c0_163 = arith.constant 0 : index
    %439 = vector.load %arg2[%c1_161, %c0_162, %c0_163] : memref<3x128x512xf32, #tpu.memory_space<vmem>>, vector<1x128x512xf32>
    %440 = vector.shape_cast %439 : vector<1x128x512xf32> to vector<128x512xf32>
    %cst_164 = arith.constant dense<0.000000e+00> : vector<8x512xf32>
    %441 = tpu.matmul %436, %440, %cst_164 {dimension_numbers = #tpu.dot_dimension_numbers<[1], [0], [0], [1], [0, 0, 1, 1], [], []>} : vector<8x128xf32>, vector<128x512xf32>, vector<8x512xf32> -> vector<8x512xf32>
    %442 = arith.addf %438, %441 : vector<8x512xf32>
    %443 = arith.addf %442, %275 : vector<8x512xf32>
    %444 = vector.extract_strided_slice %443 {offsets = [0, 0], sizes = [8, 128], strides = [1, 1]} : vector<8x512xf32> to vector<8x128xf32>
    %445 = arith.negf %444 : vector<8x128xf32>
    %446 = math.exp %445 : vector<8x128xf32>
    %cst_165 = arith.constant 1.000000e+00 : f32
    %447 = vector.broadcast %cst_165 : f32 to vector<8x128xf32>
    %448 = arith.addf %447, %446 : vector<8x128xf32>
    %449 = arith.divf %447, %448 : vector<8x128xf32>
    %450 = vector.extract_strided_slice %443 {offsets = [0, 128], sizes = [8, 128], strides = [1, 1]} : vector<8x512xf32> to vector<8x128xf32>
    %451 = arith.negf %450 : vector<8x128xf32>
    %452 = math.exp %451 : vector<8x128xf32>
    %cst_166 = arith.constant 1.000000e+00 : f32
    %453 = vector.broadcast %cst_166 : f32 to vector<8x128xf32>
    %454 = arith.addf %453, %452 : vector<8x128xf32>
    %455 = arith.divf %453, %454 : vector<8x128xf32>
    %456 = vector.extract_strided_slice %443 {offsets = [0, 256], sizes = [8, 128], strides = [1, 1]} : vector<8x512xf32> to vector<8x128xf32>
    %457 = math.tanh %456 : vector<8x128xf32>
    %458 = vector.extract_strided_slice %443 {offsets = [0, 384], sizes = [8, 128], strides = [1, 1]} : vector<8x512xf32> to vector<8x128xf32>
    %459 = arith.negf %458 : vector<8x128xf32>
    %460 = math.exp %459 : vector<8x128xf32>
    %cst_167 = arith.constant 1.000000e+00 : f32
    %461 = vector.broadcast %cst_167 : f32 to vector<8x128xf32>
    %462 = arith.addf %461, %460 : vector<8x128xf32>
    %463 = arith.divf %461, %462 : vector<8x128xf32>
    %464 = arith.mulf %455, %434 : vector<8x128xf32>
    %465 = arith.mulf %449, %457 : vector<8x128xf32>
    %466 = arith.addf %464, %465 : vector<8x128xf32>
    %467 = math.tanh %466 : vector<8x128xf32>
    %468 = arith.mulf %463, %467 : vector<8x128xf32>
    %c40_168 = arith.constant 40 : index
    %c0_169 = arith.constant 0 : index
    %469 = vector.load %arg8[%c40_168, %c0_169] : memref<64x128xf32, #tpu.memory_space<vmem>>, vector<8x128xf32>
    tpu.vector_store %arg8[%c40_168, %c0_169], %468 {strides = array<i32>} : memref<64x128xf32, #tpu.memory_space<vmem>>, vector<8x128xf32>,
    %c48_170 = arith.constant 48 : index
    %c0_171 = arith.constant 0 : index
    %470 = vector.load %arg7[%c48_170, %c0_171] : memref<64x512xf32, #tpu.memory_space<vmem>>, vector<8x512xf32>
    %c1_172 = arith.constant 1 : index
    %c0_173 = arith.constant 0 : index
    %c0_174 = arith.constant 0 : index
    %471 = vector.load %arg2[%c1_172, %c0_173, %c0_174] : memref<3x128x512xf32, #tpu.memory_space<vmem>>, vector<1x128x512xf32>
    %472 = vector.shape_cast %471 : vector<1x128x512xf32> to vector<128x512xf32>
    %cst_175 = arith.constant dense<0.000000e+00> : vector<8x512xf32>
    %473 = tpu.matmul %468, %472, %cst_175 {dimension_numbers = #tpu.dot_dimension_numbers<[1], [0], [0], [1], [0, 0, 1, 1], [], []>} : vector<8x128xf32>, vector<128x512xf32>, vector<8x512xf32> -> vector<8x512xf32>
    %474 = arith.addf %470, %473 : vector<8x512xf32>
    %475 = arith.addf %474, %275 : vector<8x512xf32>
    %476 = vector.extract_strided_slice %475 {offsets = [0, 0], sizes = [8, 128], strides = [1, 1]} : vector<8x512xf32> to vector<8x128xf32>
    %477 = arith.negf %476 : vector<8x128xf32>
    %478 = math.exp %477 : vector<8x128xf32>
    %cst_176 = arith.constant 1.000000e+00 : f32
    %479 = vector.broadcast %cst_176 : f32 to vector<8x128xf32>
    %480 = arith.addf %479, %478 : vector<8x128xf32>
    %481 = arith.divf %479, %480 : vector<8x128xf32>
    %482 = vector.extract_strided_slice %475 {offsets = [0, 128], sizes = [8, 128], strides = [1, 1]} : vector<8x512xf32> to vector<8x128xf32>
    %483 = arith.negf %482 : vector<8x128xf32>
    %484 = math.exp %483 : vector<8x128xf32>
    %cst_177 = arith.constant 1.000000e+00 : f32
    %485 = vector.broadcast %cst_177 : f32 to vector<8x128xf32>
    %486 = arith.addf %485, %484 : vector<8x128xf32>
    %487 = arith.divf %485, %486 : vector<8x128xf32>
    %488 = vector.extract_strided_slice %475 {offsets = [0, 256], sizes = [8, 128], strides = [1, 1]} : vector<8x512xf32> to vector<8x128xf32>
    %489 = math.tanh %488 : vector<8x128xf32>
    %490 = vector.extract_strided_slice %475 {offsets = [0, 384], sizes = [8, 128], strides = [1, 1]} : vector<8x512xf32> to vector<8x128xf32>
    %491 = arith.negf %490 : vector<8x128xf32>
    %492 = math.exp %491 : vector<8x128xf32>
    %cst_178 = arith.constant 1.000000e+00 : f32
    %493 = vector.broadcast %cst_178 : f32 to vector<8x128xf32>
    %494 = arith.addf %493, %492 : vector<8x128xf32>
    %495 = arith.divf %493, %494 : vector<8x128xf32>
    %496 = arith.mulf %487, %466 : vector<8x128xf32>
    %497 = arith.mulf %481, %489 : vector<8x128xf32>
    %498 = arith.addf %496, %497 : vector<8x128xf32>
    %499 = math.tanh %498 : vector<8x128xf32>
    %500 = arith.mulf %495, %499 : vector<8x128xf32>
    %c48_179 = arith.constant 48 : index
    %c0_180 = arith.constant 0 : index
    %501 = vector.load %arg8[%c48_179, %c0_180] : memref<64x128xf32, #tpu.memory_space<vmem>>, vector<8x128xf32>
    tpu.vector_store %arg8[%c48_179, %c0_180], %500 {strides = array<i32>} : memref<64x128xf32, #tpu.memory_space<vmem>>, vector<8x128xf32>,
    %c56_181 = arith.constant 56 : index
    %c0_182 = arith.constant 0 : index
    %502 = vector.load %arg7[%c56_181, %c0_182] : memref<64x512xf32, #tpu.memory_space<vmem>>, vector<8x512xf32>
    %c1_183 = arith.constant 1 : index
    %c0_184 = arith.constant 0 : index
    %c0_185 = arith.constant 0 : index
    %503 = vector.load %arg2[%c1_183, %c0_184, %c0_185] : memref<3x128x512xf32, #tpu.memory_space<vmem>>, vector<1x128x512xf32>
    %504 = vector.shape_cast %503 : vector<1x128x512xf32> to vector<128x512xf32>
    %cst_186 = arith.constant dense<0.000000e+00> : vector<8x512xf32>
    %505 = tpu.matmul %500, %504, %cst_186 {dimension_numbers = #tpu.dot_dimension_numbers<[1], [0], [0], [1], [0, 0, 1, 1], [], []>} : vector<8x128xf32>, vector<128x512xf32>, vector<8x512xf32> -> vector<8x512xf32>
    %506 = arith.addf %502, %505 : vector<8x512xf32>
    %507 = arith.addf %506, %275 : vector<8x512xf32>
    %508 = vector.extract_strided_slice %507 {offsets = [0, 0], sizes = [8, 128], strides = [1, 1]} : vector<8x512xf32> to vector<8x128xf32>
    %509 = arith.negf %508 : vector<8x128xf32>
    %510 = math.exp %509 : vector<8x128xf32>
    %cst_187 = arith.constant 1.000000e+00 : f32
    %511 = vector.broadcast %cst_187 : f32 to vector<8x128xf32>
    %512 = arith.addf %511, %510 : vector<8x128xf32>
    %513 = arith.divf %511, %512 : vector<8x128xf32>
    %514 = vector.extract_strided_slice %507 {offsets = [0, 128], sizes = [8, 128], strides = [1, 1]} : vector<8x512xf32> to vector<8x128xf32>
    %515 = arith.negf %514 : vector<8x128xf32>
    %516 = math.exp %515 : vector<8x128xf32>
    %cst_188 = arith.constant 1.000000e+00 : f32
    %517 = vector.broadcast %cst_188 : f32 to vector<8x128xf32>
    %518 = arith.addf %517, %516 : vector<8x128xf32>
    %519 = arith.divf %517, %518 : vector<8x128xf32>
    %520 = vector.extract_strided_slice %507 {offsets = [0, 256], sizes = [8, 128], strides = [1, 1]} : vector<8x512xf32> to vector<8x128xf32>
    %521 = math.tanh %520 : vector<8x128xf32>
    %522 = vector.extract_strided_slice %507 {offsets = [0, 384], sizes = [8, 128], strides = [1, 1]} : vector<8x512xf32> to vector<8x128xf32>
    %523 = arith.negf %522 : vector<8x128xf32>
    %524 = math.exp %523 : vector<8x128xf32>
    %cst_189 = arith.constant 1.000000e+00 : f32
    %525 = vector.broadcast %cst_189 : f32 to vector<8x128xf32>
    %526 = arith.addf %525, %524 : vector<8x128xf32>
    %527 = arith.divf %525, %526 : vector<8x128xf32>
    %528 = arith.mulf %519, %498 : vector<8x128xf32>
    %529 = arith.mulf %513, %521 : vector<8x128xf32>
    %530 = arith.addf %528, %529 : vector<8x128xf32>
    %531 = math.tanh %530 : vector<8x128xf32>
    %532 = arith.mulf %527, %531 : vector<8x128xf32>
    %c56_190 = arith.constant 56 : index
    %c0_191 = arith.constant 0 : index
    %533 = vector.load %arg8[%c56_190, %c0_191] : memref<64x128xf32, #tpu.memory_space<vmem>>, vector<8x128xf32>
    tpu.vector_store %arg8[%c56_190, %c0_191], %532 {strides = array<i32>} : memref<64x128xf32, #tpu.memory_space<vmem>>, vector<8x128xf32>,
    %c0_192 = arith.constant 0 : index
    %c0_193 = arith.constant 0 : index
    %534 = vector.load %arg8[%c0_192, %c0_193] : memref<64x128xf32, #tpu.memory_space<vmem>>, vector<64x128xf32>
    %c2 = arith.constant 2 : index
    %c0_194 = arith.constant 0 : index
    %c0_195 = arith.constant 0 : index
    %535 = vector.load %arg1[%c2, %c0_194, %c0_195] : memref<3x128x512xf32, #tpu.memory_space<vmem>>, vector<1x128x512xf32>
    %536 = vector.shape_cast %535 : vector<1x128x512xf32> to vector<128x512xf32>
    %cst_196 = arith.constant dense<0.000000e+00> : vector<64x512xf32>
    %537 = tpu.matmul %534, %536, %cst_196 {dimension_numbers = #tpu.dot_dimension_numbers<[1], [0], [0], [1], [0, 0, 1, 1], [], []>} : vector<64x128xf32>, vector<128x512xf32>, vector<64x512xf32> -> vector<64x512xf32>
    %c0_197 = arith.constant 0 : index
    %c0_198 = arith.constant 0 : index
    %538 = vector.load %arg7[%c0_197, %c0_198] : memref<64x512xf32, #tpu.memory_space<vmem>>, vector<64x512xf32>
    tpu.vector_store %arg7[%c0_197, %c0_198], %537 {strides = array<i32>} : memref<64x512xf32, #tpu.memory_space<vmem>>, vector<64x512xf32>,
    %c2_199 = arith.constant 2 : index
    %c0_200 = arith.constant 0 : index
    %c0_201 = arith.constant 0 : index
    %539 = vector.load %arg3[%c2_199, %c0_200, %c0_201] : memref<3x1x512xf32, #tpu.memory_space<vmem>>, vector<1x1x512xf32>
    %540 = vector.shape_cast %539 : vector<1x1x512xf32> to vector<1x512xf32>
    %541 = vector.shape_cast %540 : vector<1x512xf32> to vector<1x512xf32>
    %542 = vector.broadcast %541 : vector<1x512xf32> to vector<8x512xf32>
    %cst_202 = arith.constant 0.000000e+00 : f32
    %543 = vector.broadcast %cst_202 : f32 to vector<8x128xf32>
    %cst_203 = arith.constant 0.000000e+00 : f32
    %544 = vector.broadcast %cst_203 : f32 to vector<8x128xf32>
    %c0_204 = arith.constant 0 : index
    %c0_205 = arith.constant 0 : index
    %545 = vector.load %arg7[%c0_204, %c0_205] : memref<64x512xf32, #tpu.memory_space<vmem>>, vector<8x512xf32>
    %c2_206 = arith.constant 2 : index
    %c0_207 = arith.constant 0 : index
    %c0_208 = arith.constant 0 : index
    %546 = vector.load %arg2[%c2_206, %c0_207, %c0_208] : memref<3x128x512xf32, #tpu.memory_space<vmem>>, vector<1x128x512xf32>
    %547 = vector.shape_cast %546 : vector<1x128x512xf32> to vector<128x512xf32>
    %cst_209 = arith.constant dense<0.000000e+00> : vector<8x512xf32>
    %548 = tpu.matmul %543, %547, %cst_209 {dimension_numbers = #tpu.dot_dimension_numbers<[1], [0], [0], [1], [0, 0, 1, 1], [], []>} : vector<8x128xf32>, vector<128x512xf32>, vector<8x512xf32> -> vector<8x512xf32>
    %549 = arith.addf %545, %548 : vector<8x512xf32>
    %550 = arith.addf %549, %542 : vector<8x512xf32>
    %551 = vector.extract_strided_slice %550 {offsets = [0, 0], sizes = [8, 128], strides = [1, 1]} : vector<8x512xf32> to vector<8x128xf32>
    %552 = arith.negf %551 : vector<8x128xf32>
    %553 = math.exp %552 : vector<8x128xf32>
    %cst_210 = arith.constant 1.000000e+00 : f32
    %554 = vector.broadcast %cst_210 : f32 to vector<8x128xf32>
    %555 = arith.addf %554, %553 : vector<8x128xf32>
    %556 = arith.divf %554, %555 : vector<8x128xf32>
    %557 = vector.extract_strided_slice %550 {offsets = [0, 128], sizes = [8, 128], strides = [1, 1]} : vector<8x512xf32> to vector<8x128xf32>
    %558 = arith.negf %557 : vector<8x128xf32>
    %559 = math.exp %558 : vector<8x128xf32>
    %cst_211 = arith.constant 1.000000e+00 : f32
    %560 = vector.broadcast %cst_211 : f32 to vector<8x128xf32>
    %561 = arith.addf %560, %559 : vector<8x128xf32>
    %562 = arith.divf %560, %561 : vector<8x128xf32>
    %563 = vector.extract_strided_slice %550 {offsets = [0, 256], sizes = [8, 128], strides = [1, 1]} : vector<8x512xf32> to vector<8x128xf32>
    %564 = math.tanh %563 : vector<8x128xf32>
    %565 = vector.extract_strided_slice %550 {offsets = [0, 384], sizes = [8, 128], strides = [1, 1]} : vector<8x512xf32> to vector<8x128xf32>
    %566 = arith.negf %565 : vector<8x128xf32>
    %567 = math.exp %566 : vector<8x128xf32>
    %cst_212 = arith.constant 1.000000e+00 : f32
    %568 = vector.broadcast %cst_212 : f32 to vector<8x128xf32>
    %569 = arith.addf %568, %567 : vector<8x128xf32>
    %570 = arith.divf %568, %569 : vector<8x128xf32>
    %571 = arith.mulf %562, %544 : vector<8x128xf32>
    %572 = arith.mulf %556, %564 : vector<8x128xf32>
    %573 = arith.addf %571, %572 : vector<8x128xf32>
    %574 = math.tanh %573 : vector<8x128xf32>
    %575 = arith.mulf %570, %574 : vector<8x128xf32>
    %c8_213 = arith.constant 8 : index
    %c0_214 = arith.constant 0 : index
    %576 = vector.load %arg7[%c8_213, %c0_214] : memref<64x512xf32, #tpu.memory_space<vmem>>, vector<8x512xf32>
    %c2_215 = arith.constant 2 : index
    %c0_216 = arith.constant 0 : index
    %c0_217 = arith.constant 0 : index
    %577 = vector.load %arg2[%c2_215, %c0_216, %c0_217] : memref<3x128x512xf32, #tpu.memory_space<vmem>>, vector<1x128x512xf32>
    %578 = vector.shape_cast %577 : vector<1x128x512xf32> to vector<128x512xf32>
    %cst_218 = arith.constant dense<0.000000e+00> : vector<8x512xf32>
    %579 = tpu.matmul %575, %578, %cst_218 {dimension_numbers = #tpu.dot_dimension_numbers<[1], [0], [0], [1], [0, 0, 1, 1], [], []>} : vector<8x128xf32>, vector<128x512xf32>, vector<8x512xf32> -> vector<8x512xf32>
    %580 = arith.addf %576, %579 : vector<8x512xf32>
    %581 = arith.addf %580, %542 : vector<8x512xf32>
    %582 = vector.extract_strided_slice %581 {offsets = [0, 0], sizes = [8, 128], strides = [1, 1]} : vector<8x512xf32> to vector<8x128xf32>
    %583 = arith.negf %582 : vector<8x128xf32>
    %584 = math.exp %583 : vector<8x128xf32>
    %cst_219 = arith.constant 1.000000e+00 : f32
    %585 = vector.broadcast %cst_219 : f32 to vector<8x128xf32>
    %586 = arith.addf %585, %584 : vector<8x128xf32>
    %587 = arith.divf %585, %586 : vector<8x128xf32>
    %588 = vector.extract_strided_slice %581 {offsets = [0, 128], sizes = [8, 128], strides = [1, 1]} : vector<8x512xf32> to vector<8x128xf32>
    %589 = arith.negf %588 : vector<8x128xf32>
    %590 = math.exp %589 : vector<8x128xf32>
    %cst_220 = arith.constant 1.000000e+00 : f32
    %591 = vector.broadcast %cst_220 : f32 to vector<8x128xf32>
    %592 = arith.addf %591, %590 : vector<8x128xf32>
    %593 = arith.divf %591, %592 : vector<8x128xf32>
    %594 = vector.extract_strided_slice %581 {offsets = [0, 256], sizes = [8, 128], strides = [1, 1]} : vector<8x512xf32> to vector<8x128xf32>
    %595 = math.tanh %594 : vector<8x128xf32>
    %596 = vector.extract_strided_slice %581 {offsets = [0, 384], sizes = [8, 128], strides = [1, 1]} : vector<8x512xf32> to vector<8x128xf32>
    %597 = arith.negf %596 : vector<8x128xf32>
    %598 = math.exp %597 : vector<8x128xf32>
    %cst_221 = arith.constant 1.000000e+00 : f32
    %599 = vector.broadcast %cst_221 : f32 to vector<8x128xf32>
    %600 = arith.addf %599, %598 : vector<8x128xf32>
    %601 = arith.divf %599, %600 : vector<8x128xf32>
    %602 = arith.mulf %593, %573 : vector<8x128xf32>
    %603 = arith.mulf %587, %595 : vector<8x128xf32>
    %604 = arith.addf %602, %603 : vector<8x128xf32>
    %605 = math.tanh %604 : vector<8x128xf32>
    %606 = arith.mulf %601, %605 : vector<8x128xf32>
    %c16_222 = arith.constant 16 : index
    %c0_223 = arith.constant 0 : index
    %607 = vector.load %arg7[%c16_222, %c0_223] : memref<64x512xf32, #tpu.memory_space<vmem>>, vector<8x512xf32>
    %c2_224 = arith.constant 2 : index
    %c0_225 = arith.constant 0 : index
    %c0_226 = arith.constant 0 : index
    %608 = vector.load %arg2[%c2_224, %c0_225, %c0_226] : memref<3x128x512xf32, #tpu.memory_space<vmem>>, vector<1x128x512xf32>
    %609 = vector.shape_cast %608 : vector<1x128x512xf32> to vector<128x512xf32>
    %cst_227 = arith.constant dense<0.000000e+00> : vector<8x512xf32>
    %610 = tpu.matmul %606, %609, %cst_227 {dimension_numbers = #tpu.dot_dimension_numbers<[1], [0], [0], [1], [0, 0, 1, 1], [], []>} : vector<8x128xf32>, vector<128x512xf32>, vector<8x512xf32> -> vector<8x512xf32>
    %611 = arith.addf %607, %610 : vector<8x512xf32>
    %612 = arith.addf %611, %542 : vector<8x512xf32>
    %613 = vector.extract_strided_slice %612 {offsets = [0, 0], sizes = [8, 128], strides = [1, 1]} : vector<8x512xf32> to vector<8x128xf32>
    %614 = arith.negf %613 : vector<8x128xf32>
    %615 = math.exp %614 : vector<8x128xf32>
    %cst_228 = arith.constant 1.000000e+00 : f32
    %616 = vector.broadcast %cst_228 : f32 to vector<8x128xf32>
    %617 = arith.addf %616, %615 : vector<8x128xf32>
    %618 = arith.divf %616, %617 : vector<8x128xf32>
    %619 = vector.extract_strided_slice %612 {offsets = [0, 128], sizes = [8, 128], strides = [1, 1]} : vector<8x512xf32> to vector<8x128xf32>
    %620 = arith.negf %619 : vector<8x128xf32>
    %621 = math.exp %620 : vector<8x128xf32>
    %cst_229 = arith.constant 1.000000e+00 : f32
    %622 = vector.broadcast %cst_229 : f32 to vector<8x128xf32>
    %623 = arith.addf %622, %621 : vector<8x128xf32>
    %624 = arith.divf %622, %623 : vector<8x128xf32>
    %625 = vector.extract_strided_slice %612 {offsets = [0, 256], sizes = [8, 128], strides = [1, 1]} : vector<8x512xf32> to vector<8x128xf32>
    %626 = math.tanh %625 : vector<8x128xf32>
    %627 = vector.extract_strided_slice %612 {offsets = [0, 384], sizes = [8, 128], strides = [1, 1]} : vector<8x512xf32> to vector<8x128xf32>
    %628 = arith.negf %627 : vector<8x128xf32>
    %629 = math.exp %628 : vector<8x128xf32>
    %cst_230 = arith.constant 1.000000e+00 : f32
    %630 = vector.broadcast %cst_230 : f32 to vector<8x128xf32>
    %631 = arith.addf %630, %629 : vector<8x128xf32>
    %632 = arith.divf %630, %631 : vector<8x128xf32>
    %633 = arith.mulf %624, %604 : vector<8x128xf32>
    %634 = arith.mulf %618, %626 : vector<8x128xf32>
    %635 = arith.addf %633, %634 : vector<8x128xf32>
    %636 = math.tanh %635 : vector<8x128xf32>
    %637 = arith.mulf %632, %636 : vector<8x128xf32>
    %c24_231 = arith.constant 24 : index
    %c0_232 = arith.constant 0 : index
    %638 = vector.load %arg7[%c24_231, %c0_232] : memref<64x512xf32, #tpu.memory_space<vmem>>, vector<8x512xf32>
    %c2_233 = arith.constant 2 : index
    %c0_234 = arith.constant 0 : index
    %c0_235 = arith.constant 0 : index
    %639 = vector.load %arg2[%c2_233, %c0_234, %c0_235] : memref<3x128x512xf32, #tpu.memory_space<vmem>>, vector<1x128x512xf32>
    %640 = vector.shape_cast %639 : vector<1x128x512xf32> to vector<128x512xf32>
    %cst_236 = arith.constant dense<0.000000e+00> : vector<8x512xf32>
    %641 = tpu.matmul %637, %640, %cst_236 {dimension_numbers = #tpu.dot_dimension_numbers<[1], [0], [0], [1], [0, 0, 1, 1], [], []>} : vector<8x128xf32>, vector<128x512xf32>, vector<8x512xf32> -> vector<8x512xf32>
    %642 = arith.addf %638, %641 : vector<8x512xf32>
    %643 = arith.addf %642, %542 : vector<8x512xf32>
    %644 = vector.extract_strided_slice %643 {offsets = [0, 0], sizes = [8, 128], strides = [1, 1]} : vector<8x512xf32> to vector<8x128xf32>
    %645 = arith.negf %644 : vector<8x128xf32>
    %646 = math.exp %645 : vector<8x128xf32>
    %cst_237 = arith.constant 1.000000e+00 : f32
    %647 = vector.broadcast %cst_237 : f32 to vector<8x128xf32>
    %648 = arith.addf %647, %646 : vector<8x128xf32>
    %649 = arith.divf %647, %648 : vector<8x128xf32>
    %650 = vector.extract_strided_slice %643 {offsets = [0, 128], sizes = [8, 128], strides = [1, 1]} : vector<8x512xf32> to vector<8x128xf32>
    %651 = arith.negf %650 : vector<8x128xf32>
    %652 = math.exp %651 : vector<8x128xf32>
    %cst_238 = arith.constant 1.000000e+00 : f32
    %653 = vector.broadcast %cst_238 : f32 to vector<8x128xf32>
    %654 = arith.addf %653, %652 : vector<8x128xf32>
    %655 = arith.divf %653, %654 : vector<8x128xf32>
    %656 = vector.extract_strided_slice %643 {offsets = [0, 256], sizes = [8, 128], strides = [1, 1]} : vector<8x512xf32> to vector<8x128xf32>
    %657 = math.tanh %656 : vector<8x128xf32>
    %658 = vector.extract_strided_slice %643 {offsets = [0, 384], sizes = [8, 128], strides = [1, 1]} : vector<8x512xf32> to vector<8x128xf32>
    %659 = arith.negf %658 : vector<8x128xf32>
    %660 = math.exp %659 : vector<8x128xf32>
    %cst_239 = arith.constant 1.000000e+00 : f32
    %661 = vector.broadcast %cst_239 : f32 to vector<8x128xf32>
    %662 = arith.addf %661, %660 : vector<8x128xf32>
    %663 = arith.divf %661, %662 : vector<8x128xf32>
    %664 = arith.mulf %655, %635 : vector<8x128xf32>
    %665 = arith.mulf %649, %657 : vector<8x128xf32>
    %666 = arith.addf %664, %665 : vector<8x128xf32>
    %667 = math.tanh %666 : vector<8x128xf32>
    %668 = arith.mulf %663, %667 : vector<8x128xf32>
    %c32_240 = arith.constant 32 : index
    %c0_241 = arith.constant 0 : index
    %669 = vector.load %arg7[%c32_240, %c0_241] : memref<64x512xf32, #tpu.memory_space<vmem>>, vector<8x512xf32>
    %c2_242 = arith.constant 2 : index
    %c0_243 = arith.constant 0 : index
    %c0_244 = arith.constant 0 : index
    %670 = vector.load %arg2[%c2_242, %c0_243, %c0_244] : memref<3x128x512xf32, #tpu.memory_space<vmem>>, vector<1x128x512xf32>
    %671 = vector.shape_cast %670 : vector<1x128x512xf32> to vector<128x512xf32>
    %cst_245 = arith.constant dense<0.000000e+00> : vector<8x512xf32>
    %672 = tpu.matmul %668, %671, %cst_245 {dimension_numbers = #tpu.dot_dimension_numbers<[1], [0], [0], [1], [0, 0, 1, 1], [], []>} : vector<8x128xf32>, vector<128x512xf32>, vector<8x512xf32> -> vector<8x512xf32>
    %673 = arith.addf %669, %672 : vector<8x512xf32>
    %674 = arith.addf %673, %542 : vector<8x512xf32>
    %675 = vector.extract_strided_slice %674 {offsets = [0, 0], sizes = [8, 128], strides = [1, 1]} : vector<8x512xf32> to vector<8x128xf32>
    %676 = arith.negf %675 : vector<8x128xf32>
    %677 = math.exp %676 : vector<8x128xf32>
    %cst_246 = arith.constant 1.000000e+00 : f32
    %678 = vector.broadcast %cst_246 : f32 to vector<8x128xf32>
    %679 = arith.addf %678, %677 : vector<8x128xf32>
    %680 = arith.divf %678, %679 : vector<8x128xf32>
    %681 = vector.extract_strided_slice %674 {offsets = [0, 128], sizes = [8, 128], strides = [1, 1]} : vector<8x512xf32> to vector<8x128xf32>
    %682 = arith.negf %681 : vector<8x128xf32>
    %683 = math.exp %682 : vector<8x128xf32>
    %cst_247 = arith.constant 1.000000e+00 : f32
    %684 = vector.broadcast %cst_247 : f32 to vector<8x128xf32>
    %685 = arith.addf %684, %683 : vector<8x128xf32>
    %686 = arith.divf %684, %685 : vector<8x128xf32>
    %687 = vector.extract_strided_slice %674 {offsets = [0, 256], sizes = [8, 128], strides = [1, 1]} : vector<8x512xf32> to vector<8x128xf32>
    %688 = math.tanh %687 : vector<8x128xf32>
    %689 = vector.extract_strided_slice %674 {offsets = [0, 384], sizes = [8, 128], strides = [1, 1]} : vector<8x512xf32> to vector<8x128xf32>
    %690 = arith.negf %689 : vector<8x128xf32>
    %691 = math.exp %690 : vector<8x128xf32>
    %cst_248 = arith.constant 1.000000e+00 : f32
    %692 = vector.broadcast %cst_248 : f32 to vector<8x128xf32>
    %693 = arith.addf %692, %691 : vector<8x128xf32>
    %694 = arith.divf %692, %693 : vector<8x128xf32>
    %695 = arith.mulf %686, %666 : vector<8x128xf32>
    %696 = arith.mulf %680, %688 : vector<8x128xf32>
    %697 = arith.addf %695, %696 : vector<8x128xf32>
    %698 = math.tanh %697 : vector<8x128xf32>
    %699 = arith.mulf %694, %698 : vector<8x128xf32>
    %c40_249 = arith.constant 40 : index
    %c0_250 = arith.constant 0 : index
    %700 = vector.load %arg7[%c40_249, %c0_250] : memref<64x512xf32, #tpu.memory_space<vmem>>, vector<8x512xf32>
    %c2_251 = arith.constant 2 : index
    %c0_252 = arith.constant 0 : index
    %c0_253 = arith.constant 0 : index
    %701 = vector.load %arg2[%c2_251, %c0_252, %c0_253] : memref<3x128x512xf32, #tpu.memory_space<vmem>>, vector<1x128x512xf32>
    %702 = vector.shape_cast %701 : vector<1x128x512xf32> to vector<128x512xf32>
    %cst_254 = arith.constant dense<0.000000e+00> : vector<8x512xf32>
    %703 = tpu.matmul %699, %702, %cst_254 {dimension_numbers = #tpu.dot_dimension_numbers<[1], [0], [0], [1], [0, 0, 1, 1], [], []>} : vector<8x128xf32>, vector<128x512xf32>, vector<8x512xf32> -> vector<8x512xf32>
    %704 = arith.addf %700, %703 : vector<8x512xf32>
    %705 = arith.addf %704, %542 : vector<8x512xf32>
    %706 = vector.extract_strided_slice %705 {offsets = [0, 0], sizes = [8, 128], strides = [1, 1]} : vector<8x512xf32> to vector<8x128xf32>
    %707 = arith.negf %706 : vector<8x128xf32>
    %708 = math.exp %707 : vector<8x128xf32>
    %cst_255 = arith.constant 1.000000e+00 : f32
    %709 = vector.broadcast %cst_255 : f32 to vector<8x128xf32>
    %710 = arith.addf %709, %708 : vector<8x128xf32>
    %711 = arith.divf %709, %710 : vector<8x128xf32>
    %712 = vector.extract_strided_slice %705 {offsets = [0, 128], sizes = [8, 128], strides = [1, 1]} : vector<8x512xf32> to vector<8x128xf32>
    %713 = arith.negf %712 : vector<8x128xf32>
    %714 = math.exp %713 : vector<8x128xf32>
    %cst_256 = arith.constant 1.000000e+00 : f32
    %715 = vector.broadcast %cst_256 : f32 to vector<8x128xf32>
    %716 = arith.addf %715, %714 : vector<8x128xf32>
    %717 = arith.divf %715, %716 : vector<8x128xf32>
    %718 = vector.extract_strided_slice %705 {offsets = [0, 256], sizes = [8, 128], strides = [1, 1]} : vector<8x512xf32> to vector<8x128xf32>
    %719 = math.tanh %718 : vector<8x128xf32>
    %720 = vector.extract_strided_slice %705 {offsets = [0, 384], sizes = [8, 128], strides = [1, 1]} : vector<8x512xf32> to vector<8x128xf32>
    %721 = arith.negf %720 : vector<8x128xf32>
    %722 = math.exp %721 : vector<8x128xf32>
    %cst_257 = arith.constant 1.000000e+00 : f32
    %723 = vector.broadcast %cst_257 : f32 to vector<8x128xf32>
    %724 = arith.addf %723, %722 : vector<8x128xf32>
    %725 = arith.divf %723, %724 : vector<8x128xf32>
    %726 = arith.mulf %717, %697 : vector<8x128xf32>
    %727 = arith.mulf %711, %719 : vector<8x128xf32>
    %728 = arith.addf %726, %727 : vector<8x128xf32>
    %729 = math.tanh %728 : vector<8x128xf32>
    %730 = arith.mulf %725, %729 : vector<8x128xf32>
    %c48_258 = arith.constant 48 : index
    %c0_259 = arith.constant 0 : index
    %731 = vector.load %arg7[%c48_258, %c0_259] : memref<64x512xf32, #tpu.memory_space<vmem>>, vector<8x512xf32>
    %c2_260 = arith.constant 2 : index
    %c0_261 = arith.constant 0 : index
    %c0_262 = arith.constant 0 : index
    %732 = vector.load %arg2[%c2_260, %c0_261, %c0_262] : memref<3x128x512xf32, #tpu.memory_space<vmem>>, vector<1x128x512xf32>
    %733 = vector.shape_cast %732 : vector<1x128x512xf32> to vector<128x512xf32>
    %cst_263 = arith.constant dense<0.000000e+00> : vector<8x512xf32>
    %734 = tpu.matmul %730, %733, %cst_263 {dimension_numbers = #tpu.dot_dimension_numbers<[1], [0], [0], [1], [0, 0, 1, 1], [], []>} : vector<8x128xf32>, vector<128x512xf32>, vector<8x512xf32> -> vector<8x512xf32>
    %735 = arith.addf %731, %734 : vector<8x512xf32>
    %736 = arith.addf %735, %542 : vector<8x512xf32>
    %737 = vector.extract_strided_slice %736 {offsets = [0, 0], sizes = [8, 128], strides = [1, 1]} : vector<8x512xf32> to vector<8x128xf32>
    %738 = arith.negf %737 : vector<8x128xf32>
    %739 = math.exp %738 : vector<8x128xf32>
    %cst_264 = arith.constant 1.000000e+00 : f32
    %740 = vector.broadcast %cst_264 : f32 to vector<8x128xf32>
    %741 = arith.addf %740, %739 : vector<8x128xf32>
    %742 = arith.divf %740, %741 : vector<8x128xf32>
    %743 = vector.extract_strided_slice %736 {offsets = [0, 128], sizes = [8, 128], strides = [1, 1]} : vector<8x512xf32> to vector<8x128xf32>
    %744 = arith.negf %743 : vector<8x128xf32>
    %745 = math.exp %744 : vector<8x128xf32>
    %cst_265 = arith.constant 1.000000e+00 : f32
    %746 = vector.broadcast %cst_265 : f32 to vector<8x128xf32>
    %747 = arith.addf %746, %745 : vector<8x128xf32>
    %748 = arith.divf %746, %747 : vector<8x128xf32>
    %749 = vector.extract_strided_slice %736 {offsets = [0, 256], sizes = [8, 128], strides = [1, 1]} : vector<8x512xf32> to vector<8x128xf32>
    %750 = math.tanh %749 : vector<8x128xf32>
    %751 = vector.extract_strided_slice %736 {offsets = [0, 384], sizes = [8, 128], strides = [1, 1]} : vector<8x512xf32> to vector<8x128xf32>
    %752 = arith.negf %751 : vector<8x128xf32>
    %753 = math.exp %752 : vector<8x128xf32>
    %cst_266 = arith.constant 1.000000e+00 : f32
    %754 = vector.broadcast %cst_266 : f32 to vector<8x128xf32>
    %755 = arith.addf %754, %753 : vector<8x128xf32>
    %756 = arith.divf %754, %755 : vector<8x128xf32>
    %757 = arith.mulf %748, %728 : vector<8x128xf32>
    %758 = arith.mulf %742, %750 : vector<8x128xf32>
    %759 = arith.addf %757, %758 : vector<8x128xf32>
    %760 = math.tanh %759 : vector<8x128xf32>
    %761 = arith.mulf %756, %760 : vector<8x128xf32>
    %c56_267 = arith.constant 56 : index
    %c0_268 = arith.constant 0 : index
    %762 = vector.load %arg7[%c56_267, %c0_268] : memref<64x512xf32, #tpu.memory_space<vmem>>, vector<8x512xf32>
    %c2_269 = arith.constant 2 : index
    %c0_270 = arith.constant 0 : index
    %c0_271 = arith.constant 0 : index
    %763 = vector.load %arg2[%c2_269, %c0_270, %c0_271] : memref<3x128x512xf32, #tpu.memory_space<vmem>>, vector<1x128x512xf32>
    %764 = vector.shape_cast %763 : vector<1x128x512xf32> to vector<128x512xf32>
    %cst_272 = arith.constant dense<0.000000e+00> : vector<8x512xf32>
    %765 = tpu.matmul %761, %764, %cst_272 {dimension_numbers = #tpu.dot_dimension_numbers<[1], [0], [0], [1], [0, 0, 1, 1], [], []>} : vector<8x128xf32>, vector<128x512xf32>, vector<8x512xf32> -> vector<8x512xf32>
    %766 = arith.addf %762, %765 : vector<8x512xf32>
    %767 = arith.addf %766, %542 : vector<8x512xf32>
    %768 = vector.extract_strided_slice %767 {offsets = [0, 0], sizes = [8, 128], strides = [1, 1]} : vector<8x512xf32> to vector<8x128xf32>
    %769 = arith.negf %768 : vector<8x128xf32>
    %770 = math.exp %769 : vector<8x128xf32>
    %cst_273 = arith.constant 1.000000e+00 : f32
    %771 = vector.broadcast %cst_273 : f32 to vector<8x128xf32>
    %772 = arith.addf %771, %770 : vector<8x128xf32>
    %773 = arith.divf %771, %772 : vector<8x128xf32>
    %774 = vector.extract_strided_slice %767 {offsets = [0, 128], sizes = [8, 128], strides = [1, 1]} : vector<8x512xf32> to vector<8x128xf32>
    %775 = arith.negf %774 : vector<8x128xf32>
    %776 = math.exp %775 : vector<8x128xf32>
    %cst_274 = arith.constant 1.000000e+00 : f32
    %777 = vector.broadcast %cst_274 : f32 to vector<8x128xf32>
    %778 = arith.addf %777, %776 : vector<8x128xf32>
    %779 = arith.divf %777, %778 : vector<8x128xf32>
    %780 = vector.extract_strided_slice %767 {offsets = [0, 256], sizes = [8, 128], strides = [1, 1]} : vector<8x512xf32> to vector<8x128xf32>
    %781 = math.tanh %780 : vector<8x128xf32>
    %782 = vector.extract_strided_slice %767 {offsets = [0, 384], sizes = [8, 128], strides = [1, 1]} : vector<8x512xf32> to vector<8x128xf32>
    %783 = arith.negf %782 : vector<8x128xf32>
    %784 = math.exp %783 : vector<8x128xf32>
    %cst_275 = arith.constant 1.000000e+00 : f32
    %785 = vector.broadcast %cst_275 : f32 to vector<8x128xf32>
    %786 = arith.addf %785, %784 : vector<8x128xf32>
    %787 = arith.divf %785, %786 : vector<8x128xf32>
    %788 = arith.mulf %779, %759 : vector<8x128xf32>
    %789 = arith.mulf %773, %781 : vector<8x128xf32>
    %790 = arith.addf %788, %789 : vector<8x128xf32>
    %791 = math.tanh %790 : vector<8x128xf32>
    %792 = arith.mulf %787, %791 : vector<8x128xf32>
    %c0_276 = arith.constant 0 : index
    %c0_277 = arith.constant 0 : index
    %793 = vector.load %arg4[%c0_276, %c0_277] : memref<128x1xf32, #tpu.memory_space<vmem>>, vector<128x1xf32>
    %cst_278 = arith.constant dense<0.000000e+00> : vector<8x1xf32>
    %794 = tpu.matmul %792, %793, %cst_278 {dimension_numbers = #tpu.dot_dimension_numbers<[1], [0], [0], [1], [0, 0, 1, 1], [], []>} : vector<8x128xf32>, vector<128x1xf32>, vector<8x1xf32> -> vector<8x1xf32>
    %c0_279 = arith.constant 0 : index
    %c0_280 = arith.constant 0 : index
    %795 = vector.load %arg5[%c0_279, %c0_280] : memref<1x1xf32, #tpu.memory_space<vmem>>, vector<1x1xf32>
    %796 = vector.broadcast %795 : vector<1x1xf32> to vector<8x1xf32>
    %797 = arith.addf %794, %796 : vector<8x1xf32>
    %c0_281 = arith.constant 0 : index
    %c0_282 = arith.constant 0 : index
    %798 = vector.load %arg6[%c0_281, %c0_282] : memref<8x1xf32, #tpu.memory_space<vmem>>, vector<8x1xf32>
    tpu.vector_store %arg6[%c0_281, %c0_282], %797 {strides = array<i32>} : memref<8x1xf32, #tpu.memory_space<vmem>>, vector<8x1xf32>,
    return
  }
}

</mosaic_0001>

<bundles_post_ra>
// kernel: lstm_forward.1
= control target key start
LH: loop header
LB: loop body
LE: loop exit
PB: predicated region body
PF: predicated region fallthrough
CT: control target
= control target key end

     0   :  { %s10650_s0 = inlined_call_operand.vmem [shape: f32[64,128], index: 0, kind: input, shape index: {}]   ;;  %s10651_s1 = inlined_call_operand.hbm [shape: f32[3,128,512], index: 1, kind: input, shape index: {}]   ;;  %s10652_s2 = inlined_call_operand.hbm [shape: f32[3,128,512], index: 2, kind: input, shape index: {}]   ;;  %s10653_s3 = inlined_call_operand.vmem [shape: f32[3,1,512], index: 3, kind: input, shape index: {}]   ;;  %s10654_s4 = inlined_call_operand.vmem [shape: f32[128,1], index: 4, kind: input, shape index: {}]   ;;  %s10655_s5 = inlined_call_operand.<no memory space> [shape: f32[1,1], index: 5, kind: input, shape index: {}]   ;;  %s10656_s6 = inlined_call_operand.vmem [shape: f32[8,1], index: 6, kind: output, shape index: {}]  }
   0x1   :  { %v11_v0 = vstv %s10655_s5 }
   0x2   :  { %12 = vst [vmem:[#allocation4] sm:$0x1] %v11_v0 }
   0x3   :  { %13 = vsyncpa [#allocation6], 0 }
   0x4   :  { %14 = vsyncpa [#allocation8], 0  ;;  %s9006_s23 = smov [#allocation5]   ;;  %s8958_s27 = scalar_lea.hbm %s10651_s1, 24576 }
   0x5   :  { %s22_s24 = sshll.u32 %s9006_s23, 4  ;;  %p8959_p0 = scmp.ne.s32.totalorder %s10651_s1, %s8958_s27  ;;  %s23_s24 = int_to_ptr.vmem [resolvable:$true] %s22_s24 }
   0x6   :  { %p8962_p1 = scmp.lt.u32.totalorder %s8958_s27, %s10651_s1 }
   0x8   :  { %p8964_p2 = pnand %p8962_p1, %p8959_p0 }
   0xa   :  { %8967 = shalt.err (!%p8964_p2)
}
   0xb   :  { %s8968_s5 = scalar_lea.vmem %s23_s24, 24576  ;;  %p8973_p4 = scmp.lt.s32.totalorder %s23_s24, %s23_s24 }
   0xc   :  { %p8969_p3 = scmp.ne.s32.totalorder %s23_s24, %s8968_s5  ;;  %p8974_p5 = scmp.lt.s32.totalorder %s8968_s5, %s8968_s5 }
   0xe   :  { %p8975_p6 = por %p8974_p5, %p8973_p4 }
  0x10   :  { %p8976_p7 = pnand %p8975_p6, %p8969_p3 }
  0x12   :  { %8979 = shalt.err (!%p8976_p7)
}
  0x13   :  { %s9007_s8 = smov 512   ;;  %s9008_s9 = smov 32  }
  0x14   :  { %28 = dma.hbm_to_vmem [thread:$0]  %s10651_s1, 24576, %s23_s24, [#allocation6], %s9007_s8, %s9007_s8, %s9008_s9  }
  0x15   :  { %s9009_s12 = smov [#allocation7]   ;;  %s8980_s16 = scalar_lea.hbm %s10652_s2, 24576 }
  0x16   :  { %s34_s13 = sshll.u32 %s9009_s12, 4  ;;  %p8981_p8 = scmp.ne.s32.totalorder %s10652_s2, %s8980_s16  ;;  %s35_s13 = int_to_ptr.vmem [resolvable:$true] %s34_s13 }
  0x17   :  { %p8984_p9 = scmp.lt.u32.totalorder %s8980_s16, %s10652_s2 }
  0x19   :  { %p8986_p10 = pnand %p8984_p9, %p8981_p8 }
  0x1b   :  { %8989 = shalt.err (!%p8986_p10)
}
  0x1c   :  { %s8990_s21 = scalar_lea.vmem %s35_s13, 24576  ;;  %p8995_p12 = scmp.lt.s32.totalorder %s35_s13, %s35_s13 }
  0x1d   :  { %p8991_p11 = scmp.ne.s32.totalorder %s35_s13, %s8990_s21  ;;  %p8996_p13 = scmp.lt.s32.totalorder %s8990_s21, %s8990_s21 }
  0x1f   :  { %p8997_p0 = por %p8996_p13, %p8995_p12 }
  0x21   :  { %p8998_p1 = pnand %p8997_p0, %p8991_p11 }
  0x23   :  { %9001 = shalt.err (!%p8998_p1)
}
  0x24   :  { %40 = dma.hbm_to_vmem [thread:$0]  %s10652_s2, 24576, %s35_s13, [#allocation8], %s9007_s8, %s9007_s8, %s9008_s9  }
  0x25   :  { %9002 = dma.done.wait [#allocation6], 24576  }
  0x26   :  { %9003 = vsyncadd [#allocation6], 4294942720 }
  0x27   :  { %9004 = dma.done.wait [#allocation8], 24576  }
  0x28   :  { %9005 = vsyncadd [#allocation8], 4294942720  ;;  %v9010_v1 = vmov 0.0   ;;  %v62_v2 = vld [vmem:[#allocation5 + $0x8] sm:$0xff]  ;;  %v64_v4 = vld [vmem:[#allocation5 + $0x18] sm:$0xff]  ;;  %vm9012_vm0 = vmmov 0  }
  0x29   :  { %189 = vmatprep.mubr.f32.mxu0 %v9010_v1  ;;  %302 = vmatprep.mubr.f32.mxu1 %v9010_v1  ;;  %v66_v3 = vld [vmem:[#allocation5 + $0x28] sm:$0xff]  ;;  %v68_v6 = vld [vmem:[#allocation5 + $0x38] sm:$0xff]  ;;  %v61_v7 = vld [vmem:[#allocation5] sm:$0xff]  ;;  %vm6584_vm1 = vcmask 7168  }
  0x2a   :  { %v6719_v5 = vpack.c.bf16 %v66_v3, %v62_v2  ;;  %v65_v8 = vld [vmem:[#allocation5 + $0x20] sm:$0xff]  ;;  %v6751_v9 = vpack.c.bf16 %v68_v6, %v64_v4  ;;  %v63_v11 = vld [vmem:[#allocation5 + $0x10] sm:$0xff]  ;;  %v70_v13 = vld [vmem:[#allocation5 + $0x48] sm:$0xff] }
  0x2b   :  { %v6721_v10 = vpack.c.bf16 %v65_v8, %v61_v7  ;;  %v67_v12 = vld [vmem:[#allocation5 + $0x30] sm:$0xff]  ;;  %v74_v15 = vld [vmem:[#allocation5 + $0x68] sm:$0xff]  ;;  %v72_v16 = vld [vmem:[#allocation5 + $0x58] sm:$0xff] }
  0x2c   :  { %6720 = vmatprep.subr.bf16.mxu0 %v6719_v5  ;;  %v6753_v14 = vpack.c.bf16 %v67_v12, %v63_v11  ;;  %v76_v17 = vld [vmem:[#allocation5 + $0x78] sm:$0xff]  ;;  %6752 = vmatprep.subr.bf16.mxu1 %v6751_v9  ;;  %v6723_v18 = vpack.c.bf16 %v74_v15, %v70_v13  ;;  %v69_v20 = vld [vmem:[#allocation5 + $0x40] sm:$0xff]  ;;  %v71_v22 = vld [vmem:[#allocation5 + $0x50] sm:$0xff] }
  0x2d   :  { %6722 = vmatpush1.bf16.msra.mxu0 %v6721_v10  ;;  %v6755_v19 = vpack.c.bf16 %v76_v17, %v72_v16  ;;  %v73_v21 = vld [vmem:[#allocation5 + $0x60] sm:$0xff]  ;;  %v75_v24 = vld [vmem:[#allocation5 + $0x70] sm:$0xff]  ;;  %v78_v25 = vld [vmem:[#allocation5 + $0x88] sm:$0xff] }
  0x2e   :  { %6754 = vmatpush1.bf16.msra.mxu1 %v6753_v14  ;;  %v6725_v23 = vpack.c.bf16 %v73_v21, %v69_v20  ;;  %v82_v26 = vld [vmem:[#allocation5 + $0xa8] sm:$0xff]  ;;  %6724 = vmatprep.subr.bf16.mxu0 %v6723_v18  ;;  %v6757_v27 = vpack.c.bf16 %v75_v24, %v71_v22  ;;  %v80_v29 = vld [vmem:[#allocation5 + $0x98] sm:$0xff]  ;;  %v77_v31 = vld [vmem:[#allocation5 + $0x80] sm:$0xff] }
  0x2f   :  { %6756 = vmatprep.subr.bf16.mxu1 %v6755_v19  ;;  %v6727_v28 = vpack.c.bf16 %v82_v26, %v78_v25  ;;  %v84_v30 = vld [vmem:[#allocation5 + $0xb8] sm:$0xff]  ;;  %v81_v33 = vld [vmem:[#allocation5 + $0xa0] sm:$0xff]  ;;  %v79_v34 = vld [vmem:[#allocation5 + $0x90] sm:$0xff] }
  0x30   :  { %v6759_v32 = vpack.c.bf16 %v84_v30, %v80_v29  ;;  %v83_v35 = vld [vmem:[#allocation5 + $0xb0] sm:$0xff]  ;;  %v6729_v36 = vpack.c.bf16 %v81_v33, %v77_v31  ;;  %v86_v37 = vld [vmem:[#allocation5 + $0xc8] sm:$0xff]  ;;  %v88_v39 = vld [vmem:[#allocation5 + $0xd8] sm:$0xff] }
  0x31   :  { %6726 = vmatpush1.bf16.msra.mxu0 %v6725_v23  ;;  %v90_v38 = vld [vmem:[#allocation5 + $0xe8] sm:$0xff]  ;;  %v6761_v40 = vpack.c.bf16 %v83_v35, %v79_v34  ;;  %v92_v42 = vld [vmem:[#allocation5 + $0xf8] sm:$0xff]  ;;  %v85_v43 = vld [vmem:[#allocation5 + $0xc0] sm:$0xff] }
  0x32   :  { %6758 = vmatpush1.bf16.msra.mxu1 %v6757_v27  ;;  %6728 = vmatprep.subr.bf16.mxu0 %v6727_v28  ;;  %v6731_v41 = vpack.c.bf16 %v90_v38, %v86_v37  ;;  %v89_v44 = vld [vmem:[#allocation5 + $0xe0] sm:$0xff]  ;;  %v6763_v45 = vpack.c.bf16 %v92_v42, %v88_v39  ;;  %v87_v46 = vld [vmem:[#allocation5 + $0xd0] sm:$0xff]  ;;  %v94_v48 = vld [vmem:[#allocation5 + $0x108] sm:$0xff] }
  0x33   :  { %6760 = vmatprep.subr.bf16.mxu1 %v6759_v32  ;;  %v91_v47 = vld [vmem:[#allocation5 + $0xf0] sm:$0xff]  ;;  %v98_v49 = vld [vmem:[#allocation5 + $0x128] sm:$0xff]  ;;  %v96_v50 = vld [vmem:[#allocation5 + $0x118] sm:$0xff]  ;;  %v6733_v52 = vpack.c.bf16 %v89_v44, %v85_v43 }
  0x34   :  { %v100_v51 = vld [vmem:[#allocation5 + $0x138] sm:$0xff]  ;;  %v6765_v53 = vpack.c.bf16 %v91_v47, %v87_v46  ;;  %v6735_v54 = vpack.c.bf16 %v98_v49, %v94_v48  ;;  %v93_v55 = vld [vmem:[#allocation5 + $0x100] sm:$0xff]  ;;  %v95_v57 = vld [vmem:[#allocation5 + $0x110] sm:$0xff] }
  0x35   :  { %6730 = vmatpush1.bf16.msra.mxu0 %v6729_v36  ;;  %v97_v56 = vld [vmem:[#allocation5 + $0x120] sm:$0xff]  ;;  %v6767_v58 = vpack.c.bf16 %v100_v51, %v96_v50  ;;  %v99_v59 = vld [vmem:[#allocation5 + $0x130] sm:$0xff]  ;;  %v102_v60 = vld [vmem:[#allocation5 + $0x148] sm:$0xff] }
  0x36   :  { %6762 = vmatpush1.bf16.msra.mxu1 %v6761_v40  ;;  %6732 = vmatprep.subr.bf16.mxu0 %v6731_v41  ;;  %v106_v61 = vld [vmem:[#allocation5 + $0x168] sm:$0xff]  ;;  %v104_v62 = vld [vmem:[#allocation5 + $0x158] sm:$0xff]  ;;  %v6737_v0 = vpack.c.bf16 %v97_v56, %v93_v55  ;;  %v6769_v2 = vpack.c.bf16 %v99_v59, %v95_v57  ;;  %v101_v4 = vld [vmem:[#allocation5 + $0x140] sm:$0xff] }
  0x37   :  { %6764 = vmatprep.subr.bf16.mxu1 %v6763_v45  ;;  %v108_v63 = vld [vmem:[#allocation5 + $0x178] sm:$0xff]  ;;  %v6739_v3 = vpack.c.bf16 %v106_v61, %v102_v60  ;;  %v105_v5 = vld [vmem:[#allocation5 + $0x160] sm:$0xff]  ;;  %v103_v6 = vld [vmem:[#allocation5 + $0x150] sm:$0xff] }
  0x38   :  { %v6771_v7 = vpack.c.bf16 %v108_v63, %v104_v62  ;;  %v107_v8 = vld [vmem:[#allocation5 + $0x170] sm:$0xff]  ;;  %v110_v9 = vld [vmem:[#allocation5 + $0x188] sm:$0xff]  ;;  %v112_v11 = vld [vmem:[#allocation5 + $0x198] sm:$0xff]  ;;  %v6741_v13 = vpack.c.bf16 %v105_v5, %v101_v4 }
  0x39   :  { %6734 = vmatpush1.bf16.msra.mxu0 %v6733_v52  ;;  %v114_v10 = vld [vmem:[#allocation5 + $0x1a8] sm:$0xff]  ;;  %v116_v12 = vld [vmem:[#allocation5 + $0x1b8] sm:$0xff]  ;;  %v6773_v14 = vpack.c.bf16 %v107_v8, %v103_v6  ;;  %v109_v16 = vld [vmem:[#allocation5 + $0x180] sm:$0xff] }
  0x3a   :  { %6766 = vmatpush1.bf16.msra.mxu1 %v6765_v53  ;;  %6736 = vmatprep.subr.bf16.mxu0 %v6735_v54  ;;  %v6743_v15 = vpack.c.bf16 %v114_v10, %v110_v9  ;;  %v113_v17 = vld [vmem:[#allocation5 + $0x1a0] sm:$0xff]  ;;  %v111_v18 = vld [vmem:[#allocation5 + $0x190] sm:$0xff]  ;;  %v6775_v19 = vpack.c.bf16 %v116_v12, %v112_v11  ;;  %v118_v21 = vld [vmem:[#allocation5 + $0x1c8] sm:$0xff] }
  0x3b   :  { %6768 = vmatprep.subr.bf16.mxu1 %v6767_v58  ;;  %v115_v20 = vld [vmem:[#allocation5 + $0x1b0] sm:$0xff]  ;;  %v122_v22 = vld [vmem:[#allocation5 + $0x1e8] sm:$0xff]  ;;  %v120_v23 = vld [vmem:[#allocation5 + $0x1d8] sm:$0xff]  ;;  %v6745_v25 = vpack.c.bf16 %v113_v17, %v109_v16 }
  0x3c   :  { %v124_v24 = vld [vmem:[#allocation5 + $0x1f8] sm:$0xff]  ;;  %v6777_v26 = vpack.c.bf16 %v115_v20, %v111_v18  ;;  %v6747_v27 = vpack.c.bf16 %v122_v22, %v118_v21  ;;  %v117_v28 = vld [vmem:[#allocation5 + $0x1c0] sm:$0xff]  ;;  %v119_v30 = vld [vmem:[#allocation5 + $0x1d0] sm:$0xff] }
  0x3d   :  { %6738 = vmatpush1.bf16.msra.mxu0 %v6737_v0  ;;  %v121_v29 = vld [vmem:[#allocation5 + $0x1e0] sm:$0xff]  ;;  %v6779_v31 = vpack.c.bf16 %v124_v24, %v120_v23  ;;  %v123_v32 = vld [vmem:[#allocation5 + $0x1f0] sm:$0xff]  ;;  %v410_v33 = vld [vmem:[#allocation7 + $0x8] sm:$0xff] }
  0x3e   :  { %6770 = vmatpush1.bf16.msra.mxu1 %v6769_v2  ;;  %6740 = vmatprep.subr.bf16.mxu0 %v6739_v3  ;;  %v414_v34 = vld [vmem:[#allocation7 + $0x28] sm:$0xff]  ;;  %v412_v35 = vld [vmem:[#allocation7 + $0x18] sm:$0xff]  ;;  %v6749_v37 = vpack.c.bf16 %v121_v29, %v117_v28  ;;  %v6781_v38 = vpack.c.bf16 %v123_v32, %v119_v30  ;;  %v409_v40 = vld [vmem:[#allocation7] sm:$0xff] }
  0x3f   :  { %6772 = vmatprep.subr.bf16.mxu1 %v6771_v7  ;;  %v416_v36 = vld [vmem:[#allocation7 + $0x38] sm:$0xff]  ;;  %v9077_v39 = vpack.c.bf16 %v414_v34, %v410_v33  ;;  %v413_v41 = vld [vmem:[#allocation7 + $0x20] sm:$0xff]  ;;  %v411_v43 = vld [vmem:[#allocation7 + $0x10] sm:$0xff] }
  0x40   :  { %v9079_v42 = vpack.c.bf16 %v416_v36, %v412_v35  ;;  %v415_v44 = vld [vmem:[#allocation7 + $0x30] sm:$0xff]  ;;  %v418_v45 = vld [vmem:[#allocation7 + $0x48] sm:$0xff]  ;;  %v53_v47 = vld [vmem:[%s10650_s0] sm:$0xff]  ;;  %v9084_v48 = vpack.c.bf16 %v413_v41, %v409_v40 }
  0x41   :  { %6742 = vmatpush1.bf16.msra.mxu0 %v6741_v13  ;;  %v422_v46 = vld [vmem:[#allocation7 + $0x68] sm:$0xff]  ;;  %v420_v49 = vld [vmem:[#allocation7 + $0x58] sm:$0xff]  ;;  %v9087_v51 = vpack.c.bf16 %v415_v44, %v411_v43  ;;  %v417_v52 = vld [vmem:[#allocation7 + $0x40] sm:$0xff] }
  0x42   :  { %6774 = vmatpush1.bf16.msra.mxu1 %v6773_v14  ;;  %6744 = vmatprep.subr.bf16.mxu0 %v6743_v15  ;;  %v424_v50 = vld [vmem:[#allocation7 + $0x78] sm:$0xff]  ;;  %v421_v53 = vld [vmem:[#allocation7 + $0x60] sm:$0xff]  ;;  %v9090_v54 = vpack.c.bf16 %v422_v46, %v418_v45  ;;  %v419_v55 = vld [vmem:[#allocation7 + $0x50] sm:$0xff] }
  0x43   :  { %6776 = vmatprep.subr.bf16.mxu1 %v6775_v19  ;;  %v423_v56 = vld [vmem:[#allocation7 + $0x70] sm:$0xff]  ;;  %v9092_v57 = vpack.c.bf16 %v424_v50, %v420_v49  ;;  %v426_v58 = vld [vmem:[#allocation7 + $0x88] sm:$0xff]  ;;  %v9098_v61 = vpack.c.bf16 %v421_v53, %v417_v52  ;;  %v428_v62 = vld [vmem:[#allocation7 + $0x98] sm:$0xff] }
  0x44   :  { %v430_v59 = vld [vmem:[#allocation7 + $0xa8] sm:$0xff]  ;;  %v432_v63 = vld [vmem:[#allocation7 + $0xb8] sm:$0xff]  ;;  %v9102_v0 = vpack.c.bf16 %v423_v56, %v419_v55  ;;  %v425_v2 = vld [vmem:[#allocation7 + $0x80] sm:$0xff] }
  0x45   :  { %6746 = vmatpush1.bf16.msra.mxu0 %v6745_v25  ;;  %v54_v60 = vld [vmem:[%s10650_s0 + $0x8] sm:$0xff]  ;;  %v9106_v4 = vpack.c.bf16 %v430_v59, %v426_v58  ;;  %v427_v5 = vld [vmem:[#allocation7 + $0x90] sm:$0xff]  ;;  %v9109_v7 = vpack.c.bf16 %v432_v63, %v428_v62  ;;  %v436_v12 = vld [vmem:[#allocation7 + $0xd8] sm:$0xff] }
  0x46   :  { %6778 = vmatpush1.bf16.msra.mxu1 %v6777_v26  ;;  %6748 = vmatprep.subr.bf16.mxu0 %v6747_v27  ;;  %v429_v3 = vld [vmem:[#allocation7 + $0xa0] sm:$0xff]  ;;  %v431_v6 = vld [vmem:[#allocation7 + $0xb0] sm:$0xff]  ;;  %v434_v8 = vld [vmem:[#allocation7 + $0xc8] sm:$0xff] }
  0x47   :  { %6780 = vmatprep.subr.bf16.mxu1 %v6779_v31  ;;  %v438_v9 = vld [vmem:[#allocation7 + $0xe8] sm:$0xff]  ;;  %v9115_v11 = vpack.c.bf16 %v429_v3, %v425_v2  ;;  %v440_v13 = vld [vmem:[#allocation7 + $0xf8] sm:$0xff]  ;;  %v9119_v14 = vpack.c.bf16 %v431_v6, %v427_v5  ;;  %v433_v15 = vld [vmem:[#allocation7 + $0xc0] sm:$0xff] }
  0x48   :  { %v55_v10 = vld [vmem:[%s10650_s0 + $0x10] sm:$0xff]  ;;  %v437_v16 = vld [vmem:[#allocation7 + $0xe0] sm:$0xff]  ;;  %v9123_v17 = vpack.c.bf16 %v438_v9, %v434_v8  ;;  %v9126_v20 = vpack.c.bf16 %v440_v13, %v436_v12  ;;  %v56_v23 = vld [vmem:[%s10650_s0 + $0x18] sm:$0xff] }
  0x49   :  { %6750 = vmatpush1.bf16.msra.mxu0 %v6749_v37  ;;  %v435_v18 = vld [vmem:[#allocation7 + $0xd0] sm:$0xff]  ;;  %v442_v21 = vld [vmem:[#allocation7 + $0x108] sm:$0xff]  ;;  %v9132_v24 = vpack.c.bf16 %v437_v16, %v433_v15  ;;  %v444_v25 = vld [vmem:[#allocation7 + $0x118] sm:$0xff] }
  0x4a   :  { %6782 = vmatpush1.bf16.msra.mxu1 %v6781_v38  ;;  %6784 = vmatprep.subr.bf16.mxu0 %v9077_v39  ;;  %v439_v19 = vld [vmem:[#allocation7 + $0xf0] sm:$0xff]  ;;  %v446_v22 = vld [vmem:[#allocation7 + $0x128] sm:$0xff]  ;;  %v448_v26 = vld [vmem:[#allocation7 + $0x138] sm:$0xff] }
  0x4b   :  { %6816 = vmatprep.subr.bf16.mxu1 %v9079_v42  ;;  %v9136_v27 = vpack.c.bf16 %v439_v19, %v435_v18  ;;  %v441_v28 = vld [vmem:[#allocation7 + $0x100] sm:$0xff]  ;;  %v9140_v30 = vpack.c.bf16 %v446_v22, %v442_v21  ;;  %v443_v31 = vld [vmem:[#allocation7 + $0x110] sm:$0xff]  ;;  %v9143_v33 = vpack.c.bf16 %v448_v26, %v444_v25  ;;  %v450_v34 = vld [vmem:[#allocation7 + $0x148] sm:$0xff] }
  0x4c   :  { %190 = vmatmul.mubr.f32.vlgmr.msra.gmra.mrb[0].mxu0 %v53_v47  ;;  %v445_v29 = vld [vmem:[#allocation7 + $0x120] sm:$0xff]  ;;  %v447_v32 = vld [vmem:[#allocation7 + $0x130] sm:$0xff]  ;;  %v454_v35 = vld [vmem:[#allocation7 + $0x168] sm:$0xff] }
  0x4d   :  { %303 = vmatmul.mubr.f32.vlgmr.msra.gmra.mrb[0].mxu1 %v53_v47  ;;  %6786 = vmatpush1.bf16.msra.mxu0 %v9084_v48  ;;  %v57_v36 = vld [vmem:[%s10650_s0 + $0x20] sm:$0xff]  ;;  %v9149_v37 = vpack.c.bf16 %v445_v29, %v441_v28  ;;  %v9153_v41 = vpack.c.bf16 %v447_v32, %v443_v31  ;;  %v9157_v45 = vpack.c.bf16 %v454_v35, %v450_v34  ;;  %v451_v46 = vld [vmem:[#allocation7 + $0x150] sm:$0xff]  ;;  %v458_v50 = vld [vmem:[#allocation7 + $0x188] sm:$0xff]  ;;  %v385_v29 = vlaneseq }
  0x4e   :  { %6818 = vmatpush1.bf16.msra.mxu1 %v9087_v51  ;;  %195 = vmatprep.mubr.f32.mxu0 %v9010_v1  ;;  %v452_v38 = vld [vmem:[#allocation7 + $0x158] sm:$0xff]  ;;  %v449_v43 = vld [vmem:[#allocation7 + $0x140] sm:$0xff]  ;;  %v455_v47 = vld [vmem:[#allocation7 + $0x170] sm:$0xff] }
  0x4f   :  { %308 = vmatprep.mubr.f32.mxu1 %v9010_v1  ;;  %6788 = vmatprep.subr.bf16.mxu0 %v9090_v54  ;;  %v456_v40 = vld [vmem:[#allocation7 + $0x178] sm:$0xff]  ;;  %v453_v44 = vld [vmem:[#allocation7 + $0x160] sm:$0xff]  ;;  %v462_v52 = vld [vmem:[#allocation7 + $0x1a8] sm:$0xff]  ;;  %v9170_v59 = vpack.c.bf16 %v455_v47, %v451_v46  ;;  %v386_v31 = vshrl.u32 %v385_v29, 7 }
  0x50   :  { %196 = vmatmul.mubr.f32.gmra.mrb[2].mxu0 %v54_v60  ;;  %6820 = vmatprep.subr.bf16.mxu1 %v9092_v57  ;;  %v9160_v49 = vpack.c.bf16 %v456_v40, %v452_v38  ;;  %v58_v53 = vld [vmem:[%s10650_s0 + $0x28] sm:$0xff]  ;;  %v9166_v55 = vpack.c.bf16 %v453_v44, %v449_v43  ;;  %v460_v56 = vld [vmem:[#allocation7 + $0x198] sm:$0xff]  ;;  %v9174_v63 = vpack.c.bf16 %v462_v52, %v458_v50  ;;  %v459_v2 = vld [vmem:[#allocation7 + $0x190] sm:$0xff] }
  0x51   :  { %309 = vmatmul.mubr.f32.gmra.mrb[2].mxu1 %v54_v60  ;;  %6790 = vmatpush1.bf16.msra.mxu0 %v9098_v61  ;;  %v464_v58 = vld [vmem:[#allocation7 + $0x1b8] sm:$0xff]  ;;  %v457_v60 = vld [vmem:[#allocation7 + $0x180] sm:$0xff]  ;;  %v463_v3 = vld [vmem:[#allocation7 + $0x1b0] sm:$0xff]  ;;  %v9251_v32 = vsub.s32 0, %v386_v31  ;;  %v9256_v35 = vsub.s32 1, %v386_v31 }
  0x52   :  { %6822 = vmatpush1.bf16.msra.mxu1 %v9102_v0  ;;  %201 = vmatprep.mubr.f32.mxu0 %v9010_v1  ;;  %v461_v62 = vld [vmem:[#allocation7 + $0x1a0] sm:$0xff]  ;;  %v9177_v5 = vpack.c.bf16 %v464_v58, %v460_v56  ;;  %v466_v6 = vld [vmem:[#allocation7 + $0x1c8] sm:$0xff]  ;;  %v468_v12 = vld [vmem:[#allocation7 + $0x1d8] sm:$0xff]  ;;  %v9187_v15 = vpack.c.bf16 %v463_v3, %v459_v2  ;;  %v9271_v56 = vsub.s32 2, %v386_v31 }
  0x53   :  { %314 = vmatprep.mubr.f32.mxu1 %v9010_v1  ;;  %6792 = vmatprep.subr.bf16.mxu0 %v9106_v4  ;;  %v470_v8 = vld [vmem:[#allocation7 + $0x1e8] sm:$0xff]  ;;  %v472_v13 = vld [vmem:[#allocation7 + $0x1f8] sm:$0xff]  ;;  %v465_v16 = vld [vmem:[#allocation7 + $0x1c0] sm:$0xff] }
  0x54   :  { %202 = vmatmul.mubr.f32.gmra.mrb[4].mxu0 %v55_v10  ;;  %6824 = vmatprep.subr.bf16.mxu1 %v9109_v7  ;;  %v59_v9 = vld [vmem:[%s10650_s0 + $0x30] sm:$0xff]  ;;  %v469_v18 = vld [vmem:[#allocation7 + $0x1e0] sm:$0xff]  ;;  %v9191_v19 = vpack.c.bf16 %v470_v8, %v466_v6  ;;  %v60_v25 = vld [vmem:[%s10650_s0 + $0x38] sm:$0xff] }
  0x55   :  { %315 = vmatmul.mubr.f32.gmra.mrb[4].mxu1 %v55_v10  ;;  %6794 = vmatpush1.bf16.msra.mxu0 %v9115_v11  ;;  %v9183_v10 = vpack.c.bf16 %v461_v62, %v457_v60  ;;  %v467_v21 = vld [vmem:[#allocation7 + $0x1d0] sm:$0xff]  ;;  %v9200_v26 = vpack.c.bf16 %v469_v18, %v465_v16  ;;  %v383_v34 = vld [vmem:[%s10653_s3] sm:$0xf] }
  0x56   :  { %6826 = vmatpush1.bf16.msra.mxu1 %v9119_v14  ;;  %207 = vmatprep.mubr.f32.mxu0 %v9010_v1  ;;  %v471_v22 = vld [vmem:[#allocation7 + $0x1f0] sm:$0xff]  ;;  %v9262_v38 = vrot.slane %v383_v34, %v9256_v35  ;;  %v9275_v60 = vrot.slane %v383_v34, %v9271_v56 }
  0x57   :  { %320 = vmatprep.mubr.f32.mxu1 %v9010_v1  ;;  %6796 = vmatprep.subr.bf16.mxu0 %v9123_v17  ;;  %v9204_v28 = vpack.c.bf16 %v471_v22, %v467_v21 }
  0x58   :  { %208 = vmatmul.mubr.f32.gmra.mrb[6].mxu0 %v56_v23  ;;  %6828 = vmatprep.subr.bf16.mxu1 %v9126_v20 }
  0x59   :  { %321 = vmatmul.mubr.f32.gmra.mrb[6].mxu1 %v56_v23  ;;  %6798 = vmatpush1.bf16.msra.mxu0 %v9132_v24  ;;  %v9194_v23 = vpack.c.bf16 %v472_v13, %v468_v12 }
  0x5a   :  { %6830 = vmatpush1.bf16.msra.mxu1 %v9136_v27  ;;  %213 = vmatprep.mubr.f32.mxu0 %v9010_v1 }
  0x5b   :  { %326 = vmatprep.mubr.f32.mxu1 %v9010_v1  ;;  %6800 = vmatprep.subr.bf16.mxu0 %v9140_v30 }
  0x5c   :  { %214 = vmatmul.mubr.f32.gmra.mrb[8].mxu0 %v57_v36  ;;  %6832 = vmatprep.subr.bf16.mxu1 %v9143_v33 }
  0x5d   :  { %327 = vmatmul.mubr.f32.gmra.mrb[8].mxu1 %v57_v36  ;;  %6802 = vmatpush1.bf16.msra.mxu0 %v9149_v37  ;;  %v9259_v36 = vrot.slane %v383_v34, %v9251_v32 }
  0x5e   :  { %6834 = vmatpush1.bf16.msra.mxu1 %v9153_v41  ;;  %219 = vmatprep.mubr.f32.mxu0 %v9010_v1 }
  0x5f   :  { %332 = vmatprep.mubr.f32.mxu1 %v9010_v1  ;;  %6804 = vmatprep.subr.bf16.mxu0 %v9157_v45 }
  0x60   :  { %220 = vmatmul.mubr.f32.gmra.mrb[10].mxu0 %v58_v53  ;;  %6836 = vmatprep.subr.bf16.mxu1 %v9160_v49 }
  0x61   :  { %333 = vmatmul.mubr.f32.gmra.mrb[10].mxu1 %v58_v53  ;;  %6806 = vmatpush1.bf16.msra.mxu0 %v9166_v55 }
  0x62   :  { %6838 = vmatpush1.bf16.msra.mxu1 %v9170_v59  ;;  %225 = vmatprep.mubr.f32.mxu0 %v9010_v1 }
  0x63   :  { %338 = vmatprep.mubr.f32.mxu1 %v9010_v1  ;;  %6808 = vmatprep.subr.bf16.mxu0 %v9174_v63 }
  0x64   :  { %226 = vmatmul.mubr.f32.gmra.mrb[12].mxu0 %v59_v9  ;;  %6840 = vmatprep.subr.bf16.mxu1 %v9177_v5 }
  0x65   :  { %339 = vmatmul.mubr.f32.gmra.mrb[12].mxu1 %v59_v9  ;;  %6810 = vmatpush1.bf16.msra.mxu0 %v9183_v10 }
  0x66   :  { %6842 = vmatpush1.bf16.msra.mxu1 %v9187_v15  ;;  %231 = vmatprep.mubr.f32.mxu0 %v9010_v1 }
  0x67   :  { %344 = vmatprep.mubr.f32.mxu1 %v9010_v1  ;;  %6812 = vmatprep.subr.bf16.mxu0 %v9191_v19 }
  0x68   :  { %232 = vmatmul.mubr.f32.gmra.mrb[14].mxu0 %v60_v25  ;;  %6844 = vmatprep.subr.bf16.mxu1 %v9194_v23 }
  0x69   :  { %345 = vmatmul.mubr.f32.gmra.mrb[14].mxu1 %v60_v25  ;;  %6814 = vmatpush1.bf16.msra.mxu0 %v9200_v26 }
  0x6a   :  { %6846 = vmatpush1.bf16.msra.mxu1 %v9204_v28  ;;  %537 = vmatprep.mubr.f32.mxu0 %v9010_v1 }
  0x6b   :  { %608 = vmatprep.mubr.f32.mxu1 %v9010_v1  ;;  %6848 = vmatprep.subr.bf16.mxu0 %v9077_v39 }
  0x6c   :  { %538 = vmatmul.mubr.f32.vlgmr.msra.gmra.mrb[0].mxu0 %v9010_v1  ;;  %6880 = vmatprep.subr.bf16.mxu1 %v9079_v42 }
  0x6d   :  { %609 = vmatmul.mubr.f32.vlgmr.msra.gmra.mrb[0].mxu1 %v9010_v1  ;;  %6850 = vmatpush1.bf16.msra.mxu0 %v9084_v48 }
  0x6e   :  { %6882 = vmatpush1.bf16.msra.mxu1 %v9087_v51  ;;  %6852 = vmatprep.subr.bf16.mxu0 %v9090_v54 }
  0x6f   :  { %6884 = vmatprep.subr.bf16.mxu1 %v9092_v57  ;;  %780 = vmatprep.mubr.f32.mxu0 %v9010_v1 }
  0x70   :  { %851 = vmatprep.mubr.f32.mxu1 %v9010_v1 }
  0x71   :  { %6854 = vmatpush1.bf16.msra.mxu0 %v9098_v61 }
  0x72   :  { %6886 = vmatpush1.bf16.msra.mxu1 %v9102_v0  ;;  %6856 = vmatprep.subr.bf16.mxu0 %v9106_v4 }
  0x73   :  { %6888 = vmatprep.subr.bf16.mxu1 %v9109_v7 }
  0x75   :  { %6858 = vmatpush1.bf16.msra.mxu0 %v9115_v11 }
  0x76   :  { %6890 = vmatpush1.bf16.msra.mxu1 %v9119_v14  ;;  %6860 = vmatprep.subr.bf16.mxu0 %v9123_v17 }
  0x77   :  { %6892 = vmatprep.subr.bf16.mxu1 %v9126_v20 }
  0x79   :  { %6862 = vmatpush1.bf16.msra.mxu0 %v9132_v24 }
  0x7a   :  { %6894 = vmatpush1.bf16.msra.mxu1 %v9136_v27  ;;  %6864 = vmatprep.subr.bf16.mxu0 %v9140_v30 }
  0x7b   :  { %6896 = vmatprep.subr.bf16.mxu1 %v9143_v33 }
  0x7d   :  { %6866 = vmatpush1.bf16.msra.mxu0 %v9149_v37 }
  0x7e   :  { %6898 = vmatpush1.bf16.msra.mxu1 %v9153_v41  ;;  %6868 = vmatprep.subr.bf16.mxu0 %v9157_v45 }
  0x7f   :  { %6900 = vmatprep.subr.bf16.mxu1 %v9160_v49 }
  0x81   :  { %6870 = vmatpush1.bf16.msra.mxu0 %v9166_v55 }
  0x82   :  { %6902 = vmatpush1.bf16.msra.mxu1 %v9170_v59  ;;  %6872 = vmatprep.subr.bf16.mxu0 %v9174_v63 }
  0x83   :  { %6904 = vmatprep.subr.bf16.mxu1 %v9177_v5 }
  0x85   :  { %6874 = vmatpush1.bf16.msra.mxu0 %v9183_v10 }
  0x86   :  { %6906 = vmatpush1.bf16.msra.mxu1 %v9187_v15  ;;  %6876 = vmatprep.subr.bf16.mxu0 %v9191_v19 }
  0x87   :  { %6908 = vmatprep.subr.bf16.mxu1 %v9194_v23 }
  0x89   :  { %6878 = vmatpush1.bf16.msra.mxu0 %v9200_v26 }
  0x8a   :  { %6910 = vmatpush1.bf16.msra.mxu1 %v9204_v28  ;;  %6912 = vmatprep.subr.bf16.mxu0 %v9077_v39  ;;  %v9264_v39 = vsub.s32 3, %v386_v31 }
  0x8b   :  { %6944 = vmatprep.subr.bf16.mxu1 %v9079_v42 }
  0x8c   :  { %v9269_v53 = vrot.slane %v383_v34, %v9264_v39 }
 0x13f   :  { %v539_v40 = vpop.f32.mrb[0].mxu0 }
 0x140   :  { %v619_v42 = vadd.f32 %v539_v40, %v9259_v36  ;;  %v610_v43 = vpop.f32.mrb[0].mxu1  ;;  %v541_v44 = vpop.f32.mrb[1].mxu0 }
 0x141   :  { %v620_v46 = vadd.f32 %v541_v44, %v9262_v38  ;;  %v612_v47 = vpop.f32.mrb[1].mxu1  ;;  %v621_v2 = vadd.f32 %v610_v43, %v9275_v60 }
 0x142   :  { %v6592_v50 = vmul.f32 -1.442695, %v619_v42  ;;  %v622_v58 = vadd.f32 %v612_v47, %v9269_v53 }
 0x143   :  { %v6593_v52 = vmul.f32 -1.442695, %v620_v46 }
 0x144   :  { %8574 = vpow2.f32 %v6592_v50  ;;  %v6594_v62 = vmul.f32 -1.442695, %v622_v58 }
 0x145   :  { %8576 = vpow2.f32 %v6593_v52 }
 0x146   :  { %8578 = vpow2.f32 %v6594_v62 }
 0x147   :  { %8580 = vtanh.f32 %v621_v2 }
 0x14e   :  { %v8575_v3 = vpop.eup %8574 }
 0x14f   :  { %v8577_v6 = vpop.eup %8576  ;;  %v626_v8 = vadd.f32 1.0, %v8575_v3 }
 0x150   :  { %v632_v9 = vadd.f32 1.0, %v8577_v6  ;;  %v8579_v12 = vpop.eup %8578 }
 0x151   :  { %8582 = vrcp.f32 %v626_v8  ;;  %v8581_v13 = vpop.eup %8580  ;;  %v639_v22 = vadd.f32 1.0, %v8579_v12 }
 0x152   :  { %8584 = vrcp.f32 %v632_v9 }
 0x153   :  { %8586 = vrcp.f32 %v639_v22 }
 0x15b   :  { %v8583_v16 = vpop.eup %8582 }
 0x15c   :  { %v8585_v18 = vpop.eup %8584  ;;  %v643_v21 = vmul.f32 %v8583_v16, %v8581_v13 }
 0x15d   :  { %v642_v25 = vmul.f32 0.0, %v8585_v18  ;;  %v8587_v31 = vpop.eup %8586 }
 0x15f   :  { %v9278_v29 = vadd.f32 %v643_v21, %v642_v25  ;;  %v1139_v25 = vld [vmem:[#allocation7 + $0x8] sm:$0xff] }
 0x161   :  { %8588 = vtanh.f32 %v9278_v29 }
 0x16b   :  { %v8589_v34 = vpop.eup %8588 }
 0x16c   :  { %v9281_v40 = vmul.f32 %v8589_v34, %v8587_v31  ;;  %v1143_v31 = vld [vmem:[#allocation7 + $0x28] sm:$0xff] }
 0x16d   :  { %v9331_v34 = vpack.c.bf16 %v1143_v31, %v1139_v25  ;;  %v1404_v31 = vld [vmem:[#allocation7 + $0xb8] sm:$0xff] }
 0x16e   :  { %781 = vmatmul.mubr.f32.vlgmr.msra.gmra.mrb[2].mxu0 %v9281_v40  ;;  %852 = vmatmul.mubr.f32.vlgmr.msra.gmra.mrb[2].mxu1 %v9281_v40 }
 0x16f   :  { %6914 = vmatpush1.bf16.msra.mxu0 %v9084_v48  ;;  %6946 = vmatpush1.bf16.msra.mxu1 %v9087_v51 }
 0x170   :  { %6916 = vmatprep.subr.bf16.mxu0 %v9090_v54  ;;  %6948 = vmatprep.subr.bf16.mxu1 %v9092_v57 }
 0x171   :  { %1023 = vmatprep.mubr.f32.mxu0 %v9010_v1  ;;  %1094 = vmatprep.mubr.f32.mxu1 %v9010_v1 }
 0x173   :  { %6918 = vmatpush1.bf16.msra.mxu0 %v9098_v61  ;;  %6950 = vmatpush1.bf16.msra.mxu1 %v9102_v0 }
 0x174   :  { %6920 = vmatprep.subr.bf16.mxu0 %v9106_v4  ;;  %6952 = vmatprep.subr.bf16.mxu1 %v9109_v7 }
 0x177   :  { %6922 = vmatpush1.bf16.msra.mxu0 %v9115_v11  ;;  %6954 = vmatpush1.bf16.msra.mxu1 %v9119_v14 }
 0x178   :  { %6924 = vmatprep.subr.bf16.mxu0 %v9123_v17  ;;  %6956 = vmatprep.subr.bf16.mxu1 %v9126_v20 }
 0x17b   :  { %6926 = vmatpush1.bf16.msra.mxu0 %v9132_v24  ;;  %6958 = vmatpush1.bf16.msra.mxu1 %v9136_v27 }
 0x17c   :  { %6928 = vmatprep.subr.bf16.mxu0 %v9140_v30  ;;  %6960 = vmatprep.subr.bf16.mxu1 %v9143_v33 }
 0x17f   :  { %6930 = vmatpush1.bf16.msra.mxu0 %v9149_v37  ;;  %6962 = vmatpush1.bf16.msra.mxu1 %v9153_v41 }
 0x180   :  { %6932 = vmatprep.subr.bf16.mxu0 %v9157_v45  ;;  %6964 = vmatprep.subr.bf16.mxu1 %v9160_v49 }
 0x183   :  { %6934 = vmatpush1.bf16.msra.mxu0 %v9166_v55  ;;  %6966 = vmatpush1.bf16.msra.mxu1 %v9170_v59 }
 0x184   :  { %6936 = vmatprep.subr.bf16.mxu0 %v9174_v63  ;;  %6968 = vmatprep.subr.bf16.mxu1 %v9177_v5 }
 0x187   :  { %6938 = vmatpush1.bf16.msra.mxu0 %v9183_v10  ;;  %6970 = vmatpush1.bf16.msra.mxu1 %v9187_v15 }
 0x188   :  { %6940 = vmatprep.subr.bf16.mxu0 %v9191_v19  ;;  %6972 = vmatprep.subr.bf16.mxu1 %v9194_v23 }
 0x18b   :  { %6942 = vmatpush1.bf16.msra.mxu0 %v9200_v26  ;;  %6974 = vmatpush1.bf16.msra.mxu1 %v9204_v28 }
 0x18c   :  { %6976 = vmatprep.subr.bf16.mxu0 %v9331_v34 }
 0x241   :  { %v782_v48 = vpop.f32.mrb[2].mxu0  ;;  %v853_v51 = vpop.f32.mrb[2].mxu1 }
 0x242   :  { %v862_v54 = vadd.f32 %v782_v48, %v9259_v36  ;;  %v784_v57 = vpop.f32.mrb[3].mxu0  ;;  %v855_v61 = vpop.f32.mrb[3].mxu1  ;;  %v864_v47 = vadd.f32 %v853_v51, %v9275_v60  ;;  %v1145_v48 = vld [vmem:[#allocation7 + $0x38] sm:$0xff]  ;;  %v1138_v51 = vld [vmem:[#allocation7] sm:$0xff] }
 0x243   :  { %v863_v0 = vadd.f32 %v784_v57, %v9262_v38  ;;  %v865_v44 = vadd.f32 %v855_v61, %v9269_v53 }
 0x244   :  { %v6595_v42 = vmul.f32 -1.442695, %v862_v54  ;;  %v1142_v54 = vld [vmem:[#allocation7 + $0x20] sm:$0xff] }
 0x245   :  { %v6596_v43 = vmul.f32 -1.442695, %v863_v0  ;;  %v6597_v46 = vmul.f32 -1.442695, %v865_v44  ;;  %v9335_v61 = vpack.c.bf16 %v1142_v54, %v1138_v51  ;;  %v1140_v0 = vld [vmem:[#allocation7 + $0x10] sm:$0xff]  ;;  %v1147_v44 = vld [vmem:[#allocation7 + $0x48] sm:$0xff] }
 0x246   :  { %8590 = vpow2.f32 %v6595_v42  ;;  %v1144_v42 = vld [vmem:[#allocation7 + $0x30] sm:$0xff] }
 0x247   :  { %8592 = vpow2.f32 %v6596_v43  ;;  %v9338_v43 = vpack.c.bf16 %v1144_v42, %v1140_v0  ;;  %v1399_v0 = vld [vmem:[#allocation7 + $0x90] sm:$0xff] }
 0x248   :  { %8594 = vpow2.f32 %v6597_v46  ;;  %v1151_v46 = vld [vmem:[#allocation7 + $0x68] sm:$0xff]  ;;  %v1403_v42 = vld [vmem:[#allocation7 + $0xb0] sm:$0xff] }
 0x249   :  { %8596 = vtanh.f32 %v864_v47  ;;  %v1149_v47 = vld [vmem:[#allocation7 + $0x58] sm:$0xff] }
 0x250   :  { %v8591_v50 = vpop.eup %8590 }
 0x251   :  { %v8593_v52 = vpop.eup %8592  ;;  %v869_v58 = vadd.f32 1.0, %v8591_v50  ;;  %v9343_v50 = vpack.c.bf16 %v1151_v46, %v1147_v44  ;;  %v9408_v44 = vpack.c.bf16 %v1403_v42, %v1399_v0  ;;  %v1406_v46 = vld [vmem:[#allocation7 + $0xc8] sm:$0xff]  ;;  %v1432_v42 = vld [vmem:[#allocation7 + $0x198] sm:$0xff] }
 0x252   :  { %v875_v62 = vadd.f32 1.0, %v8593_v52  ;;  %v8595_v2 = vpop.eup %8594  ;;  %v1153_v52 = vld [vmem:[#allocation7 + $0x78] sm:$0xff]  ;;  %v1434_v0 = vld [vmem:[#allocation7 + $0x1a8] sm:$0xff] }
 0x253   :  { %8598 = vrcp.f32 %v869_v58  ;;  %v8597_v3 = vpop.eup %8596  ;;  %v882_v12 = vadd.f32 1.0, %v8595_v2  ;;  %v1146_v58 = vld [vmem:[#allocation7 + $0x40] sm:$0xff]  ;;  %v9345_v2 = vpack.c.bf16 %v1153_v52, %v1149_v47  ;;  %v1410_v47 = vld [vmem:[#allocation7 + $0xe8] sm:$0xff]  ;;  %v1408_v52 = vld [vmem:[#allocation7 + $0xd8] sm:$0xff] }
 0x254   :  { %8600 = vrcp.f32 %v875_v62  ;;  %v1150_v62 = vld [vmem:[#allocation7 + $0x60] sm:$0xff] }
 0x255   :  { %8602 = vrcp.f32 %v882_v12 }
 0x25d   :  { %v8599_v6 = vpop.eup %8598 }
 0x25e   :  { %v8601_v8 = vpop.eup %8600  ;;  %v886_v9 = vmul.f32 %v8599_v6, %v8597_v3  ;;  %v9347_v3 = vpack.c.bf16 %v1150_v62, %v1146_v58  ;;  %v1148_v6 = vld [vmem:[#allocation7 + $0x50] sm:$0xff]  ;;  %v9413_v58 = vpack.c.bf16 %v1410_v47, %v1406_v46  ;;  %v1412_v62 = vld [vmem:[#allocation7 + $0xf8] sm:$0xff] }
 0x25f   :  { %v885_v13 = vmul.f32 %v8601_v8, %v9278_v29  ;;  %v8603_v18 = vpop.eup %8602  ;;  %v1141_v29 = vld [vmem:[#allocation7 + $0x18] sm:$0xff]  ;;  %v1152_v8 = vld [vmem:[#allocation7 + $0x70] sm:$0xff] }
 0x260   :  { %v9333_v57 = vpack.c.bf16 %v1145_v48, %v1141_v29  ;;  %v1397_v29 = vld [vmem:[#allocation7 + $0x80] sm:$0xff]  ;;  %v1436_v46 = vld [vmem:[#allocation7 + $0x1b8] sm:$0xff] }
 0x261   :  { %v9322_v16 = vadd.f32 %v886_v9, %v885_v13  ;;  %v9350_v9 = vpack.c.bf16 %v1152_v8, %v1148_v6  ;;  %v1401_v48 = vld [vmem:[#allocation7 + $0xa0] sm:$0xff] }
 0x262   :  { %7008 = vmatprep.subr.bf16.mxu1 %v9333_v57  ;;  %v9405_v54 = vpack.c.bf16 %v1401_v48, %v1397_v29  ;;  %v1405_v6 = vld [vmem:[#allocation7 + $0xc0] sm:$0xff]  ;;  %v1430_v29 = vld [vmem:[#allocation7 + $0x188] sm:$0xff] }
 0x263   :  { %8604 = vtanh.f32 %v9322_v16  ;;  %v1409_v8 = vld [vmem:[#allocation7 + $0xe0] sm:$0xff]  ;;  %v9447_v47 = vpack.c.bf16 %v1434_v0, %v1430_v29 }
 0x26d   :  { %v8605_v21 = vpop.eup %8604 }
 0x26e   :  { %v9325_v22 = vmul.f32 %v8605_v21, %v8603_v18  ;;  %v1402_v18 = vld [vmem:[#allocation7 + $0xa8] sm:$0xff]  ;;  %v1400_v21 = vld [vmem:[#allocation7 + $0x98] sm:$0xff] }
 0x26f   :  { %v9403_v51 = vpack.c.bf16 %v1404_v31, %v1400_v21  ;;  %v1423_v21 = vld [vmem:[#allocation7 + $0x150] sm:$0xff] }
 0x270   :  { %1024 = vmatmul.mubr.f32.vlgmr.msra.gmra.mrb[4].mxu0 %v9325_v22  ;;  %1095 = vmatmul.mubr.f32.vlgmr.msra.gmra.mrb[4].mxu1 %v9325_v22  ;;  %v1427_v31 = vld [vmem:[#allocation7 + $0x170] sm:$0xff] }
 0x271   :  { %1266 = vmatprep.mubr.f32.mxu0 %v9010_v1  ;;  %1337 = vmatprep.mubr.f32.mxu1 %v9010_v1  ;;  %v9444_v48 = vpack.c.bf16 %v1427_v31, %v1423_v21 }
 0x272   :  { %6978 = vmatpush1.bf16.msra.mxu0 %v9335_v61  ;;  %7010 = vmatpush1.bf16.msra.mxu1 %v9338_v43 }
 0x273   :  { %6980 = vmatprep.subr.bf16.mxu0 %v9343_v50  ;;  %7012 = vmatprep.subr.bf16.mxu1 %v9345_v2 }
 0x276   :  { %6982 = vmatpush1.bf16.msra.mxu0 %v9347_v3  ;;  %7014 = vmatpush1.bf16.msra.mxu1 %v9350_v9 }
 0x277   :  { %6984 = vmatprep.subr.bf16.mxu0 %v9106_v4  ;;  %7016 = vmatprep.subr.bf16.mxu1 %v9109_v7 }
 0x27a   :  { %6986 = vmatpush1.bf16.msra.mxu0 %v9115_v11  ;;  %7018 = vmatpush1.bf16.msra.mxu1 %v9119_v14 }
 0x27b   :  { %6988 = vmatprep.subr.bf16.mxu0 %v9123_v17  ;;  %7020 = vmatprep.subr.bf16.mxu1 %v9126_v20 }
 0x27e   :  { %6990 = vmatpush1.bf16.msra.mxu0 %v9132_v24  ;;  %7022 = vmatpush1.bf16.msra.mxu1 %v9136_v27 }
 0x27f   :  { %6992 = vmatprep.subr.bf16.mxu0 %v9140_v30  ;;  %7024 = vmatprep.subr.bf16.mxu1 %v9143_v33 }
 0x282   :  { %6994 = vmatpush1.bf16.msra.mxu0 %v9149_v37  ;;  %7026 = vmatpush1.bf16.msra.mxu1 %v9153_v41 }
 0x283   :  { %6996 = vmatprep.subr.bf16.mxu0 %v9157_v45  ;;  %7028 = vmatprep.subr.bf16.mxu1 %v9160_v49 }
 0x286   :  { %6998 = vmatpush1.bf16.msra.mxu0 %v9166_v55  ;;  %7030 = vmatpush1.bf16.msra.mxu1 %v9170_v59 }
 0x287   :  { %7000 = vmatprep.subr.bf16.mxu0 %v9174_v63  ;;  %7032 = vmatprep.subr.bf16.mxu1 %v9177_v5 }
 0x28a   :  { %7002 = vmatpush1.bf16.msra.mxu0 %v9183_v10  ;;  %7034 = vmatpush1.bf16.msra.mxu1 %v9187_v15 }
 0x28b   :  { %7004 = vmatprep.subr.bf16.mxu0 %v9191_v19  ;;  %7036 = vmatprep.subr.bf16.mxu1 %v9194_v23 }
 0x28e   :  { %7006 = vmatpush1.bf16.msra.mxu0 %v9200_v26  ;;  %7038 = vmatpush1.bf16.msra.mxu1 %v9204_v28 }
 0x28f   :  { %7040 = vmatprep.subr.bf16.mxu0 %v9331_v34  ;;  %7072 = vmatprep.subr.bf16.mxu1 %v9333_v57 }
 0x343   :  { %v1025_v4 = vpop.f32.mrb[4].mxu0  ;;  %v1096_v7 = vpop.f32.mrb[4].mxu1 }
 0x344   :  { %v1105_v11 = vadd.f32 %v1025_v4, %v9259_v36  ;;  %v1027_v14 = vpop.f32.mrb[5].mxu0  ;;  %v1098_v17 = vpop.f32.mrb[5].mxu1  ;;  %v1107_v37 = vadd.f32 %v1096_v7, %v9275_v60  ;;  %v9415_v4 = vpack.c.bf16 %v1412_v62, %v1408_v52  ;;  %v9417_v7 = vpack.c.bf16 %v1409_v8, %v1405_v6  ;;  %v1429_v62 = vld [vmem:[#allocation7 + $0x180] sm:$0xff]  ;;  %v1431_v8 = vld [vmem:[#allocation7 + $0x190] sm:$0xff] }
 0x345   :  { %v1106_v20 = vadd.f32 %v1027_v14, %v9262_v38  ;;  %v1108_v30 = vadd.f32 %v1098_v17, %v9269_v53  ;;  %v1411_v14 = vld [vmem:[#allocation7 + $0xf0] sm:$0xff]  ;;  %v9449_v52 = vpack.c.bf16 %v1436_v46, %v1432_v42  ;;  %v1433_v6 = vld [vmem:[#allocation7 + $0x1a0] sm:$0xff] }
 0x346   :  { %v6598_v24 = vmul.f32 -1.442695, %v1105_v11  ;;  %v1407_v11 = vld [vmem:[#allocation7 + $0xd0] sm:$0xff] }
 0x347   :  { %v6599_v27 = vmul.f32 -1.442695, %v1106_v20  ;;  %v6600_v33 = vmul.f32 -1.442695, %v1108_v30  ;;  %v9420_v17 = vpack.c.bf16 %v1411_v14, %v1407_v11  ;;  %v1414_v20 = vld [vmem:[#allocation7 + $0x108] sm:$0xff]  ;;  %v9452_v11 = vpack.c.bf16 %v1433_v6, %v1429_v62  ;;  %v1435_v14 = vld [vmem:[#allocation7 + $0x1b0] sm:$0xff] }
 0x348   :  { %8606 = vpow2.f32 %v6598_v24  ;;  %v1418_v24 = vld [vmem:[#allocation7 + $0x128] sm:$0xff] }
 0x349   :  { %8608 = vpow2.f32 %v6599_v27  ;;  %v1416_v27 = vld [vmem:[#allocation7 + $0x118] sm:$0xff]  ;;  %v9425_v30 = vpack.c.bf16 %v1418_v24, %v1414_v20  ;;  %v1438_v20 = vld [vmem:[#allocation7 + $0x1c8] sm:$0xff] }
 0x34a   :  { %8610 = vpow2.f32 %v6600_v33  ;;  %v1420_v33 = vld [vmem:[#allocation7 + $0x138] sm:$0xff]  ;;  %v1442_v24 = vld [vmem:[#allocation7 + $0x1e8] sm:$0xff] }
 0x34b   :  { %8612 = vtanh.f32 %v1107_v37  ;;  %v1413_v37 = vld [vmem:[#allocation7 + $0x100] sm:$0xff] }
 0x352   :  { %v8607_v41 = vpop.eup %8606 }
 0x353   :  { %v8609_v45 = vpop.eup %8608  ;;  %v1112_v49 = vadd.f32 1.0, %v8607_v41  ;;  %v1417_v41 = vld [vmem:[#allocation7 + $0x120] sm:$0xff] }
 0x354   :  { %v1118_v55 = vadd.f32 1.0, %v8609_v45  ;;  %v8611_v59 = vpop.eup %8610  ;;  %v9427_v45 = vpack.c.bf16 %v1420_v33, %v1416_v27  ;;  %v9456_v27 = vpack.c.bf16 %v1435_v14, %v1431_v8  ;;  %v9458_v33 = vpack.c.bf16 %v1442_v24, %v1438_v20 }
 0x355   :  { %8614 = vrcp.f32 %v1112_v49  ;;  %v8613_v63 = vpop.eup %8612  ;;  %v1125_v19 = vadd.f32 1.0, %v8611_v59  ;;  %v9429_v49 = vpack.c.bf16 %v1417_v41, %v1413_v37  ;;  %v1419_v59 = vld [vmem:[#allocation7 + $0x130] sm:$0xff]  ;;  %v1440_v37 = vld [vmem:[#allocation7 + $0x1d8] sm:$0xff] }
 0x356   :  { %8616 = vrcp.f32 %v1118_v55  ;;  %v1415_v55 = vld [vmem:[#allocation7 + $0x110] sm:$0xff]  ;;  %v1444_v41 = vld [vmem:[#allocation7 + $0x1f8] sm:$0xff] }
 0x357   :  { %8618 = vrcp.f32 %v1125_v19 }
 0x35f   :  { %v8615_v5 = vpop.eup %8614 }
 0x360   :  { %v8617_v10 = vpop.eup %8616  ;;  %v1129_v15 = vmul.f32 %v8615_v5, %v8613_v63  ;;  %v9432_v63 = vpack.c.bf16 %v1419_v59, %v1415_v55  ;;  %v1422_v5 = vld [vmem:[#allocation7 + $0x148] sm:$0xff]  ;;  %v1437_v55 = vld [vmem:[#allocation7 + $0x1c0] sm:$0xff]  ;;  %v9461_v59 = vpack.c.bf16 %v1444_v41, %v1440_v37 }
 0x361   :  { %v1128_v23 = vmul.f32 %v8617_v10, %v9322_v16  ;;  %v8619_v28 = vpop.eup %8618  ;;  %v1398_v16 = vld [vmem:[#allocation7 + $0x88] sm:$0xff] }
 0x362   :  { %v9401_v25 = vpack.c.bf16 %v1402_v18, %v1398_v16  ;;  %v1426_v10 = vld [vmem:[#allocation7 + $0x168] sm:$0xff] }
 0x363   :  { %v9386_v26 = vadd.f32 %v1129_v15, %v1128_v23  ;;  %v1424_v15 = vld [vmem:[#allocation7 + $0x158] sm:$0xff]  ;;  %v9436_v19 = vpack.c.bf16 %v1426_v10, %v1422_v5  ;;  %v1441_v5 = vld [vmem:[#allocation7 + $0x1e0] sm:$0xff]  ;;  %v1439_v10 = vld [vmem:[#allocation7 + $0x1d0] sm:$0xff] }
 0x364   :  { %v1428_v23 = vld [vmem:[#allocation7 + $0x178] sm:$0xff] }
 0x365   :  { %8620 = vtanh.f32 %v9386_v26  ;;  %v9439_v16 = vpack.c.bf16 %v1428_v23, %v1424_v15  ;;  %v1443_v15 = vld [vmem:[#allocation7 + $0x1f0] sm:$0xff]  ;;  %v9464_v23 = vpack.c.bf16 %v1441_v5, %v1437_v55 }
 0x36f   :  { %v8621_v12 = vpop.eup %8620 }
 0x370   :  { %v9389_v13 = vmul.f32 %v8621_v12, %v8619_v28  ;;  %v1421_v28 = vld [vmem:[#allocation7 + $0x140] sm:$0xff] }
 0x371   :  { %v1425_v12 = vld [vmem:[#allocation7 + $0x160] sm:$0xff] }
 0x372   :  { %1267 = vmatmul.mubr.f32.vlgmr.msra.gmra.mrb[6].mxu0 %v9389_v13  ;;  %1338 = vmatmul.mubr.f32.vlgmr.msra.gmra.mrb[6].mxu1 %v9389_v13  ;;  %v9441_v18 = vpack.c.bf16 %v1425_v12, %v1421_v28  ;;  %v9468_v28 = vpack.c.bf16 %v1443_v15, %v1439_v10 }
 0x373   :  { %7042 = vmatpush1.bf16.msra.mxu0 %v9335_v61  ;;  %7074 = vmatpush1.bf16.msra.mxu1 %v9338_v43 }
 0x374   :  { %7044 = vmatprep.subr.bf16.mxu0 %v9343_v50  ;;  %7076 = vmatprep.subr.bf16.mxu1 %v9345_v2 }
 0x375   :  { %1509 = vmatprep.mubr.f32.mxu0 %v9010_v1  ;;  %1580 = vmatprep.mubr.f32.mxu1 %v9010_v1 }
 0x377   :  { %7046 = vmatpush1.bf16.msra.mxu0 %v9347_v3  ;;  %7078 = vmatpush1.bf16.msra.mxu1 %v9350_v9 }
 0x378   :  { %7048 = vmatprep.subr.bf16.mxu0 %v9401_v25  ;;  %7080 = vmatprep.subr.bf16.mxu1 %v9403_v51 }
 0x37b   :  { %7050 = vmatpush1.bf16.msra.mxu0 %v9405_v54  ;;  %7082 = vmatpush1.bf16.msra.mxu1 %v9408_v44 }
 0x37c   :  { %7052 = vmatprep.subr.bf16.mxu0 %v9413_v58  ;;  %7084 = vmatprep.subr.bf16.mxu1 %v9415_v4 }
 0x37f   :  { %7054 = vmatpush1.bf16.msra.mxu0 %v9417_v7  ;;  %7086 = vmatpush1.bf16.msra.mxu1 %v9420_v17 }
 0x380   :  { %7056 = vmatprep.subr.bf16.mxu0 %v9425_v30  ;;  %7088 = vmatprep.subr.bf16.mxu1 %v9427_v45 }
 0x383   :  { %7058 = vmatpush1.bf16.msra.mxu0 %v9429_v49  ;;  %7090 = vmatpush1.bf16.msra.mxu1 %v9432_v63 }
 0x384   :  { %7060 = vmatprep.subr.bf16.mxu0 %v9436_v19  ;;  %7092 = vmatprep.subr.bf16.mxu1 %v9439_v16 }
 0x387   :  { %7062 = vmatpush1.bf16.msra.mxu0 %v9441_v18  ;;  %7094 = vmatpush1.bf16.msra.mxu1 %v9444_v48 }
 0x388   :  { %7064 = vmatprep.subr.bf16.mxu0 %v9447_v47  ;;  %7096 = vmatprep.subr.bf16.mxu1 %v9449_v52 }
 0x38b   :  { %7066 = vmatpush1.bf16.msra.mxu0 %v9452_v11  ;;  %7098 = vmatpush1.bf16.msra.mxu1 %v9456_v27 }
 0x38c   :  { %7068 = vmatprep.subr.bf16.mxu0 %v9458_v33  ;;  %7100 = vmatprep.subr.bf16.mxu1 %v9461_v59 }
 0x38f   :  { %7070 = vmatpush1.bf16.msra.mxu0 %v9464_v23  ;;  %7102 = vmatpush1.bf16.msra.mxu1 %v9468_v28 }
 0x390   :  { %7104 = vmatprep.subr.bf16.mxu0 %v9331_v34  ;;  %7136 = vmatprep.subr.bf16.mxu1 %v9333_v57 }
 0x445   :  { %v1268_v12 = vpop.f32.mrb[6].mxu0  ;;  %v1339_v21 = vpop.f32.mrb[6].mxu1 }
 0x446   :  { %v1348_v31 = vadd.f32 %v1268_v12, %v9259_v36  ;;  %v1270_v29 = vpop.f32.mrb[7].mxu0  ;;  %v1341_v0 = vpop.f32.mrb[7].mxu1  ;;  %v1350_v14 = vadd.f32 %v1339_v21, %v9275_v60 }
 0x447   :  { %v1349_v42 = vadd.f32 %v1270_v29, %v9262_v38  ;;  %v1351_v6 = vadd.f32 %v1341_v0, %v9269_v53 }
 0x448   :  { %v6601_v46 = vmul.f32 -1.442695, %v1348_v31 }
 0x449   :  { %v6602_v62 = vmul.f32 -1.442695, %v1349_v42  ;;  %v6603_v8 = vmul.f32 -1.442695, %v1351_v6 }
 0x44a   :  { %8622 = vpow2.f32 %v6601_v46 }
 0x44b   :  { %8624 = vpow2.f32 %v6602_v62 }
 0x44c   :  { %8626 = vpow2.f32 %v6603_v8 }
 0x44d   :  { %8628 = vtanh.f32 %v1350_v14 }
 0x454   :  { %v8623_v20 = vpop.eup %8622 }
 0x455   :  { %v8625_v24 = vpop.eup %8624  ;;  %v1355_v37 = vadd.f32 1.0, %v8623_v20 }
 0x456   :  { %v1361_v41 = vadd.f32 1.0, %v8625_v24  ;;  %v8627_v55 = vpop.eup %8626 }
 0x457   :  { %8630 = vrcp.f32 %v1355_v37  ;;  %v8629_v5 = vpop.eup %8628  ;;  %v1368_v31 = vadd.f32 1.0, %v8627_v55 }
 0x458   :  { %8632 = vrcp.f32 %v1361_v41 }
 0x459   :  { %8634 = vrcp.f32 %v1368_v31 }
 0x461   :  { %v8631_v10 = vpop.eup %8630 }
 0x462   :  { %v8633_v15 = vpop.eup %8632  ;;  %v1372_v12 = vmul.f32 %v8631_v10, %v8629_v5 }
 0x463   :  { %v1371_v29 = vmul.f32 %v8633_v15, %v9386_v26  ;;  %v8635_v21 = vpop.eup %8634 }
 0x465   :  { %v9480_v0 = vadd.f32 %v1372_v12, %v1371_v29 }
 0x467   :  { %8636 = vtanh.f32 %v9480_v0 }
 0x471   :  { %v8637_v42 = vpop.eup %8636 }
 0x472   :  { %v9483_v46 = vmul.f32 %v8637_v42, %v8635_v21 }
 0x474   :  { %1510 = vmatmul.mubr.f32.vlgmr.msra.gmra.mrb[8].mxu0 %v9483_v46  ;;  %1581 = vmatmul.mubr.f32.vlgmr.msra.gmra.mrb[8].mxu1 %v9483_v46 }
 0x475   :  { %7106 = vmatpush1.bf16.msra.mxu0 %v9335_v61  ;;  %7138 = vmatpush1.bf16.msra.mxu1 %v9338_v43 }
 0x476   :  { %7108 = vmatprep.subr.bf16.mxu0 %v9343_v50  ;;  %7140 = vmatprep.subr.bf16.mxu1 %v9345_v2 }
 0x477   :  { %1752 = vmatprep.mubr.f32.mxu0 %v9010_v1  ;;  %1823 = vmatprep.mubr.f32.mxu1 %v9010_v1 }
 0x479   :  { %7110 = vmatpush1.bf16.msra.mxu0 %v9347_v3  ;;  %7142 = vmatpush1.bf16.msra.mxu1 %v9350_v9 }
 0x47a   :  { %7112 = vmatprep.subr.bf16.mxu0 %v9401_v25  ;;  %7144 = vmatprep.subr.bf16.mxu1 %v9403_v51 }
 0x47d   :  { %7114 = vmatpush1.bf16.msra.mxu0 %v9405_v54  ;;  %7146 = vmatpush1.bf16.msra.mxu1 %v9408_v44 }
 0x47e   :  { %7116 = vmatprep.subr.bf16.mxu0 %v9413_v58  ;;  %7148 = vmatprep.subr.bf16.mxu1 %v9415_v4 }
 0x481   :  { %7118 = vmatpush1.bf16.msra.mxu0 %v9417_v7  ;;  %7150 = vmatpush1.bf16.msra.mxu1 %v9420_v17 }
 0x482   :  { %7120 = vmatprep.subr.bf16.mxu0 %v9425_v30  ;;  %7152 = vmatprep.subr.bf16.mxu1 %v9427_v45 }
 0x485   :  { %7122 = vmatpush1.bf16.msra.mxu0 %v9429_v49  ;;  %7154 = vmatpush1.bf16.msra.mxu1 %v9432_v63 }
 0x486   :  { %7124 = vmatprep.subr.bf16.mxu0 %v9436_v19  ;;  %7156 = vmatprep.subr.bf16.mxu1 %v9439_v16 }
 0x489   :  { %7126 = vmatpush1.bf16.msra.mxu0 %v9441_v18  ;;  %7158 = vmatpush1.bf16.msra.mxu1 %v9444_v48 }
 0x48a   :  { %7128 = vmatprep.subr.bf16.mxu0 %v9447_v47  ;;  %7160 = vmatprep.subr.bf16.mxu1 %v9449_v52 }
 0x48d   :  { %7130 = vmatpush1.bf16.msra.mxu0 %v9452_v11  ;;  %7162 = vmatpush1.bf16.msra.mxu1 %v9456_v27 }
 0x48e   :  { %7132 = vmatprep.subr.bf16.mxu0 %v9458_v33  ;;  %7164 = vmatprep.subr.bf16.mxu1 %v9461_v59 }
 0x491   :  { %7134 = vmatpush1.bf16.msra.mxu0 %v9464_v23  ;;  %7166 = vmatpush1.bf16.msra.mxu1 %v9468_v28 }
 0x492   :  { %7168 = vmatprep.subr.bf16.mxu0 %v9331_v34  ;;  %7200 = vmatprep.subr.bf16.mxu1 %v9333_v57 }
 0x547   :  { %v1511_v26 = vpop.f32.mrb[8].mxu0  ;;  %v1582_v62 = vpop.f32.mrb[8].mxu1 }
 0x548   :  { %v1591_v6 = vadd.f32 %v1511_v26, %v9259_v36  ;;  %v1513_v8 = vpop.f32.mrb[9].mxu0  ;;  %v1584_v14 = vpop.f32.mrb[9].mxu1  ;;  %v1593_v5 = vadd.f32 %v1582_v62, %v9275_v60 }
 0x549   :  { %v1592_v20 = vadd.f32 %v1513_v8, %v9262_v38  ;;  %v1594_v41 = vadd.f32 %v1584_v14, %v9269_v53 }
 0x54a   :  { %v6604_v24 = vmul.f32 -1.442695, %v1591_v6 }
 0x54b   :  { %v6605_v37 = vmul.f32 -1.442695, %v1592_v20  ;;  %v6606_v55 = vmul.f32 -1.442695, %v1594_v41 }
 0x54c   :  { %8638 = vpow2.f32 %v6604_v24 }
 0x54d   :  { %8640 = vpow2.f32 %v6605_v37 }
 0x54e   :  { %8642 = vpow2.f32 %v6606_v55 }
 0x54f   :  { %8644 = vtanh.f32 %v1593_v5 }
 0x556   :  { %v8639_v34 = vpop.eup %8638 }
 0x557   :  { %v8641_v10 = vpop.eup %8640  ;;  %v1598_v57 = vadd.f32 1.0, %v8639_v34 }
 0x558   :  { %v1604_v15 = vadd.f32 1.0, %v8641_v10  ;;  %v8643_v12 = vpop.eup %8642 }
 0x559   :  { %8646 = vrcp.f32 %v1598_v57  ;;  %v8645_v31 = vpop.eup %8644  ;;  %v1611_v26 = vadd.f32 1.0, %v8643_v12 }
 0x55a   :  { %8648 = vrcp.f32 %v1604_v15 }
 0x55b   :  { %8650 = vrcp.f32 %v1611_v26 }
 0x563   :  { %v8647_v29 = vpop.eup %8646 }
 0x564   :  { %v8649_v21 = vpop.eup %8648  ;;  %v1615_v42 = vmul.f32 %v8647_v29, %v8645_v31 }
 0x565   :  { %v1614_v6 = vmul.f32 %v8649_v21, %v9480_v0  ;;  %v8651_v62 = vpop.eup %8650 }
 0x567   :  { %v9526_v8 = vadd.f32 %v1615_v42, %v1614_v6 }
 0x569   :  { %8652 = vtanh.f32 %v9526_v8 }
 0x573   :  { %v8653_v14 = vpop.eup %8652 }
 0x574   :  { %v9529_v20 = vmul.f32 %v8653_v14, %v8651_v62 }
 0x576   :  { %1753 = vmatmul.mubr.f32.vlgmr.msra.gmra.mrb[10].mxu0 %v9529_v20  ;;  %1824 = vmatmul.mubr.f32.vlgmr.msra.gmra.mrb[10].mxu1 %v9529_v20 }
 0x577   :  { %7170 = vmatpush1.bf16.msra.mxu0 %v9335_v61  ;;  %7202 = vmatpush1.bf16.msra.mxu1 %v9338_v43 }
 0x578   :  { %7172 = vmatprep.subr.bf16.mxu0 %v9343_v50  ;;  %7204 = vmatprep.subr.bf16.mxu1 %v9345_v2 }
 0x579   :  { %1995 = vmatprep.mubr.f32.mxu0 %v9010_v1  ;;  %2066 = vmatprep.mubr.f32.mxu1 %v9010_v1 }
 0x57b   :  { %7174 = vmatpush1.bf16.msra.mxu0 %v9347_v3  ;;  %7206 = vmatpush1.bf16.msra.mxu1 %v9350_v9 }
 0x57c   :  { %7176 = vmatprep.subr.bf16.mxu0 %v9401_v25  ;;  %7208 = vmatprep.subr.bf16.mxu1 %v9403_v51 }
 0x57f   :  { %7178 = vmatpush1.bf16.msra.mxu0 %v9405_v54  ;;  %7210 = vmatpush1.bf16.msra.mxu1 %v9408_v44 }
 0x580   :  { %7180 = vmatprep.subr.bf16.mxu0 %v9413_v58  ;;  %7212 = vmatprep.subr.bf16.mxu1 %v9415_v4 }
 0x583   :  { %7182 = vmatpush1.bf16.msra.mxu0 %v9417_v7  ;;  %7214 = vmatpush1.bf16.msra.mxu1 %v9420_v17 }
 0x584   :  { %7184 = vmatprep.subr.bf16.mxu0 %v9425_v30  ;;  %7216 = vmatprep.subr.bf16.mxu1 %v9427_v45 }
 0x587   :  { %7186 = vmatpush1.bf16.msra.mxu0 %v9429_v49  ;;  %7218 = vmatpush1.bf16.msra.mxu1 %v9432_v63 }
 0x588   :  { %7188 = vmatprep.subr.bf16.mxu0 %v9436_v19  ;;  %7220 = vmatprep.subr.bf16.mxu1 %v9439_v16 }
 0x58b   :  { %7190 = vmatpush1.bf16.msra.mxu0 %v9441_v18  ;;  %7222 = vmatpush1.bf16.msra.mxu1 %v9444_v48 }
 0x58c   :  { %7192 = vmatprep.subr.bf16.mxu0 %v9447_v47  ;;  %7224 = vmatprep.subr.bf16.mxu1 %v9449_v52 }
 0x58f   :  { %7194 = vmatpush1.bf16.msra.mxu0 %v9452_v11  ;;  %7226 = vmatpush1.bf16.msra.mxu1 %v9456_v27 }
 0x590   :  { %7196 = vmatprep.subr.bf16.mxu0 %v9458_v33  ;;  %7228 = vmatprep.subr.bf16.mxu1 %v9461_v59 }
 0x593   :  { %7198 = vmatpush1.bf16.msra.mxu0 %v9464_v23  ;;  %7230 = vmatpush1.bf16.msra.mxu1 %v9468_v28 }
 0x649   :  { %v1754_v61 = vpop.f32.mrb[10].mxu0  ;;  %v1825_v43 = vpop.f32.mrb[10].mxu1 }
 0x64a   :  { %v1834_v50 = vadd.f32 %v1754_v61, %v9259_v36  ;;  %v1756_v2 = vpop.f32.mrb[11].mxu0  ;;  %v1827_v3 = vpop.f32.mrb[11].mxu1  ;;  %v1836_v55 = vadd.f32 %v1825_v43, %v9275_v60  ;;  %v2111_v43 = vld [vmem:[#allocation7 + $0x8] sm:$0xff] }
 0x64b   :  { %v1835_v9 = vadd.f32 %v1756_v2, %v9262_v38  ;;  %v1837_v37 = vadd.f32 %v1827_v3, %v9269_v53  ;;  %v2117_v3 = vld [vmem:[#allocation7 + $0x38] sm:$0xff] }
 0x64c   :  { %v6607_v0 = vmul.f32 -1.442695, %v1834_v50  ;;  %v2115_v50 = vld [vmem:[#allocation7 + $0x28] sm:$0xff] }
 0x64d   :  { %v6608_v24 = vmul.f32 -1.442695, %v1835_v9  ;;  %v6609_v41 = vmul.f32 -1.442695, %v1837_v37  ;;  %v7231_v2 = vpack.c.bf16 %v2115_v50, %v2111_v43  ;;  %v2110_v9 = vld [vmem:[#allocation7] sm:$0xff] }
 0x64e   :  { %8654 = vpow2.f32 %v6607_v0  ;;  %v2114_v0 = vld [vmem:[#allocation7 + $0x20] sm:$0xff] }
 0x64f   :  { %8656 = vpow2.f32 %v6608_v24  ;;  %v7233_v37 = vpack.c.bf16 %v2114_v0, %v2110_v9  ;;  %7232 = vmatprep.subr.bf16.mxu0 %v7231_v2  ;;  %v2358_v9 = vld [vmem:[#allocation5 + $0x200] sm:$0xff] }
 0x650   :  { %8658 = vpow2.f32 %v6609_v41  ;;  %v2112_v41 = vld [vmem:[#allocation7 + $0x10] sm:$0xff]  ;;  %v2362_v0 = vld [vmem:[#allocation5 + $0x220] sm:$0xff] }
 0x651   :  { %8660 = vtanh.f32 %v1836_v55  ;;  %v2116_v55 = vld [vmem:[#allocation7 + $0x30] sm:$0xff] }
 0x658   :  { %v8655_v5 = vpop.eup %8654 }
 0x659   :  { %v8657_v34 = vpop.eup %8656  ;;  %v1841_v10 = vadd.f32 1.0, %v8655_v5  ;;  %v7265_v5 = vpack.c.bf16 %v2116_v55, %v2112_v41  ;;  %v2367_v41 = vld [vmem:[#allocation5 + $0x248] sm:$0xff] }
 0x65a   :  { %v1847_v57 = vadd.f32 1.0, %v8657_v34  ;;  %v8659_v15 = vpop.eup %8658  ;;  %v2119_v34 = vld [vmem:[#allocation7 + $0x48] sm:$0xff] }
 0x65b   :  { %8662 = vrcp.f32 %v1841_v10  ;;  %v8661_v12 = vpop.eup %8660  ;;  %v1854_v42 = vadd.f32 1.0, %v8659_v15  ;;  %v2123_v10 = vld [vmem:[#allocation7 + $0x68] sm:$0xff] }
 0x65c   :  { %8664 = vrcp.f32 %v1847_v57  ;;  %v2121_v57 = vld [vmem:[#allocation7 + $0x58] sm:$0xff]  ;;  %v7235_v15 = vpack.c.bf16 %v2123_v10, %v2119_v34  ;;  %v2371_v55 = vld [vmem:[#allocation5 + $0x268] sm:$0xff] }
 0x65d   :  { %8666 = vrcp.f32 %v1854_v42  ;;  %v2373_v34 = vld [vmem:[#allocation5 + $0x278] sm:$0xff] }
 0x665   :  { %v8663_v31 = vpop.eup %8662 }
 0x666   :  { %v8665_v29 = vpop.eup %8664  ;;  %v1858_v21 = vmul.f32 %v8663_v31, %v8661_v12  ;;  %v2125_v12 = vld [vmem:[#allocation7 + $0x78] sm:$0xff]  ;;  %v2118_v31 = vld [vmem:[#allocation7 + $0x40] sm:$0xff] }
 0x667   :  { %v1857_v26 = vmul.f32 %v8665_v29, %v9526_v8  ;;  %v8667_v62 = vpop.eup %8666  ;;  %v2113_v8 = vld [vmem:[#allocation7 + $0x18] sm:$0xff]  ;;  %v2122_v29 = vld [vmem:[#allocation7 + $0x60] sm:$0xff] }
 0x668   :  { %v7263_v24 = vpack.c.bf16 %v2117_v3, %v2113_v8  ;;  %v7237_v42 = vpack.c.bf16 %v2122_v29, %v2118_v31  ;;  %v2366_v31 = vld [vmem:[#allocation5 + $0x240] sm:$0xff] }
 0x669   :  { %v9570_v6 = vadd.f32 %v1858_v21, %v1857_v26  ;;  %v7267_v21 = vpack.c.bf16 %v2125_v12, %v2121_v57  ;;  %v2120_v26 = vld [vmem:[#allocation7 + $0x50] sm:$0xff]  ;;  %v2370_v29 = vld [vmem:[#allocation5 + $0x260] sm:$0xff] }
 0x66a   :  { %7264 = vmatprep.subr.bf16.mxu1 %v7263_v24  ;;  %v2360_v24 = vld [vmem:[#allocation5 + $0x210] sm:$0xff] }
 0x66b   :  { %8668 = vtanh.f32 %v9570_v6 }
 0x675   :  { %v8669_v14 = vpop.eup %8668 }
 0x676   :  { %v9573_v61 = vmul.f32 %v8669_v14, %v8667_v62  ;;  %v2124_v62 = vld [vmem:[#allocation7 + $0x70] sm:$0xff] }
 0x677   :  { %v7269_v14 = vpack.c.bf16 %v2124_v62, %v2120_v26  ;;  %v2368_v26 = vld [vmem:[#allocation5 + $0x250] sm:$0xff] }
 0x678   :  { %1996 = vmatmul.mubr.f32.vlgmr.msra.gmra.mrb[12].mxu0 %v9573_v61  ;;  %2067 = vmatmul.mubr.f32.vlgmr.msra.gmra.mrb[12].mxu1 %v9573_v61  ;;  %v2372_v62 = vld [vmem:[#allocation5 + $0x270] sm:$0xff] }
 0x679   :  { %2238 = vmatprep.mubr.f32.mxu0 %v9010_v1  ;;  %2309 = vmatprep.mubr.f32.mxu1 %v9010_v1 }
 0x67a   :  { %7234 = vmatpush1.bf16.msra.mxu0 %v7233_v37  ;;  %7266 = vmatpush1.bf16.msra.mxu1 %v7265_v5  ;;  %v2364_v37 = vld [vmem:[#allocation5 + $0x230] sm:$0xff]  ;;  %v2369_v5 = vld [vmem:[#allocation5 + $0x258] sm:$0xff] }
 0x67b   :  { %7236 = vmatprep.subr.bf16.mxu0 %v7235_v15  ;;  %7268 = vmatprep.subr.bf16.mxu1 %v7267_v21  ;;  %v7297_v15 = vpack.c.bf16 %v2362_v0, %v2358_v9  ;;  %v7329_v12 = vpack.c.bf16 %v2364_v37, %v2360_v24  ;;  %v7299_v21 = vpack.c.bf16 %v2371_v55, %v2367_v41  ;;  %v2390_v0 = vld [vmem:[#allocation5 + $0x300] sm:$0xff]  ;;  %v2392_v55 = vld [vmem:[#allocation5 + $0x310] sm:$0xff] }
 0x67c   :  { %v2394_v24 = vld [vmem:[#allocation5 + $0x320] sm:$0xff] }
 0x67e   :  { %7238 = vmatpush1.bf16.msra.mxu0 %v7237_v42  ;;  %7270 = vmatpush1.bf16.msra.mxu1 %v7269_v14  ;;  %v7331_v42 = vpack.c.bf16 %v2373_v34, %v2369_v5  ;;  %v2375_v14 = vld [vmem:[#allocation5 + $0x288] sm:$0xff]  ;;  %v2396_v5 = vld [vmem:[#allocation5 + $0x330] sm:$0xff] }
 0x67f   :  { %7240 = vmatprep.subr.bf16.mxu0 %v9401_v25  ;;  %7272 = vmatprep.subr.bf16.mxu1 %v9403_v51  ;;  %v2359_v25 = vld [vmem:[#allocation5 + $0x208] sm:$0xff] }
 0x680   :  { %v2363_v51 = vld [vmem:[#allocation5 + $0x228] sm:$0xff] }
 0x681   :  { %v2399_v34 = vld [vmem:[#allocation5 + $0x348] sm:$0xff] }
 0x682   :  { %7242 = vmatpush1.bf16.msra.mxu0 %v9405_v54  ;;  %7274 = vmatpush1.bf16.msra.mxu1 %v9408_v44  ;;  %v2361_v54 = vld [vmem:[#allocation5 + $0x218] sm:$0xff] }
 0x683   :  { %7244 = vmatprep.subr.bf16.mxu0 %v9413_v58  ;;  %7276 = vmatprep.subr.bf16.mxu1 %v9415_v4  ;;  %v2365_v44 = vld [vmem:[#allocation5 + $0x238] sm:$0xff]  ;;  %v7295_v58 = vpack.c.bf16 %v2363_v51, %v2359_v25  ;;  %v2379_v25 = vld [vmem:[#allocation5 + $0x2a8] sm:$0xff] }
 0x684   :  { %v7327_v4 = vpack.c.bf16 %v2365_v44, %v2361_v54  ;;  %v2377_v51 = vld [vmem:[#allocation5 + $0x298] sm:$0xff]  ;;  %v7301_v44 = vpack.c.bf16 %v2370_v29, %v2366_v31  ;;  %v7345_v31 = vpack.c.bf16 %v2396_v5, %v2392_v55  ;;  %v2398_v29 = vld [vmem:[#allocation5 + $0x340] sm:$0xff] }
 0x685   :  { %v2381_v54 = vld [vmem:[#allocation5 + $0x2b8] sm:$0xff] }
 0x686   :  { %7246 = vmatpush1.bf16.msra.mxu0 %v9417_v7  ;;  %7278 = vmatpush1.bf16.msra.mxu1 %v9420_v17  ;;  %v2719_v55 = vld [vmem:[#allocation7 + $0x258] sm:$0xff] }
 0x687   :  { %7248 = vmatprep.subr.bf16.mxu0 %v9425_v30  ;;  %7280 = vmatprep.subr.bf16.mxu1 %v9427_v45 }
 0x68a   :  { %7250 = vmatpush1.bf16.msra.mxu0 %v9429_v49  ;;  %7282 = vmatpush1.bf16.msra.mxu1 %v9432_v63 }
 0x68b   :  { %7252 = vmatprep.subr.bf16.mxu0 %v9436_v19  ;;  %7284 = vmatprep.subr.bf16.mxu1 %v9439_v16 }
 0x68e   :  { %7254 = vmatpush1.bf16.msra.mxu0 %v9441_v18  ;;  %7286 = vmatpush1.bf16.msra.mxu1 %v9444_v48 }
 0x68f   :  { %7256 = vmatprep.subr.bf16.mxu0 %v9447_v47  ;;  %7288 = vmatprep.subr.bf16.mxu1 %v9449_v52 }
 0x692   :  { %7258 = vmatpush1.bf16.msra.mxu0 %v9452_v11  ;;  %7290 = vmatpush1.bf16.msra.mxu1 %v9456_v27 }
 0x693   :  { %7260 = vmatprep.subr.bf16.mxu0 %v9458_v33  ;;  %7292 = vmatprep.subr.bf16.mxu1 %v9461_v59 }
 0x696   :  { %7262 = vmatpush1.bf16.msra.mxu0 %v9464_v23  ;;  %7294 = vmatpush1.bf16.msra.mxu1 %v9468_v28 }
 0x697   :  { %7296 = vmatprep.subr.bf16.mxu0 %v7295_v58  ;;  %7328 = vmatprep.subr.bf16.mxu1 %v7327_v4  ;;  %v7333_v58 = vpack.c.bf16 %v2372_v62, %v2368_v26  ;;  %v2374_v4 = vld [vmem:[#allocation5 + $0x280] sm:$0xff]  ;;  %v2400_v62 = vld [vmem:[#allocation5 + $0x350] sm:$0xff] }
 0x74b   :  { %v1997_v7 = vpop.f32.mrb[12].mxu0  ;;  %v2068_v17 = vpop.f32.mrb[12].mxu1 }
 0x74c   :  { %v2077_v30 = vadd.f32 %v1997_v7, %v9259_v36  ;;  %v1999_v45 = vpop.f32.mrb[13].mxu0  ;;  %v2070_v49 = vpop.f32.mrb[13].mxu1  ;;  %v2079_v47 = vadd.f32 %v2068_v17, %v9275_v60  ;;  %v2378_v7 = vld [vmem:[#allocation5 + $0x2a0] sm:$0xff]  ;;  %v7303_v17 = vpack.c.bf16 %v2379_v25, %v2375_v14  ;;  %v2404_v14 = vld [vmem:[#allocation5 + $0x370] sm:$0xff]  ;;  %v2407_v25 = vld [vmem:[#allocation5 + $0x388] sm:$0xff] }
 0x74d   :  { %v2078_v63 = vadd.f32 %v1999_v45, %v9262_v38  ;;  %v2080_v18 = vadd.f32 %v2070_v49, %v9269_v53  ;;  %v2376_v45 = vld [vmem:[#allocation5 + $0x290] sm:$0xff] }
 0x74e   :  { %v6610_v19 = vmul.f32 -1.442695, %v2077_v30  ;;  %v7335_v30 = vpack.c.bf16 %v2381_v54, %v2377_v51  ;;  %v2380_v49 = vld [vmem:[#allocation5 + $0x2b0] sm:$0xff]  ;;  %v2411_v51 = vld [vmem:[#allocation5 + $0x3a8] sm:$0xff]  ;;  %v2409_v54 = vld [vmem:[#allocation5 + $0x398] sm:$0xff] }
 0x74f   :  { %v6611_v16 = vmul.f32 -1.442695, %v2078_v63  ;;  %v6612_v48 = vmul.f32 -1.442695, %v2080_v18  ;;  %v2383_v63 = vld [vmem:[#allocation5 + $0x2c8] sm:$0xff]  ;;  %v2389_v18 = vld [vmem:[#allocation5 + $0x2f8] sm:$0xff] }
 0x750   :  { %8670 = vpow2.f32 %v6610_v19  ;;  %v2387_v19 = vld [vmem:[#allocation5 + $0x2e8] sm:$0xff] }
 0x751   :  { %8672 = vpow2.f32 %v6611_v16  ;;  %v2385_v16 = vld [vmem:[#allocation5 + $0x2d8] sm:$0xff] }
 0x752   :  { %8674 = vpow2.f32 %v6612_v48  ;;  %v7305_v48 = vpack.c.bf16 %v2378_v7, %v2374_v4  ;;  %v7349_v4 = vpack.c.bf16 %v2404_v14, %v2400_v62  ;;  %v2406_v7 = vld [vmem:[#allocation5 + $0x380] sm:$0xff]  ;;  %v2727_v62 = vld [vmem:[#allocation7 + $0x298] sm:$0xff] }
 0x753   :  { %8676 = vtanh.f32 %v2079_v47  ;;  %v7337_v47 = vpack.c.bf16 %v2380_v49, %v2376_v45  ;;  %v2408_v49 = vld [vmem:[#allocation5 + $0x390] sm:$0xff] }
 0x75a   :  { %v8671_v52 = vpop.eup %8670 }
 0x75b   :  { %v8673_v11 = vpop.eup %8672  ;;  %v2084_v27 = vadd.f32 1.0, %v8671_v52  ;;  %v2382_v52 = vld [vmem:[#allocation5 + $0x2c0] sm:$0xff] }
 0x75c   :  { %v2090_v33 = vadd.f32 1.0, %v8673_v11  ;;  %v8675_v59 = vpop.eup %8674  ;;  %v2386_v11 = vld [vmem:[#allocation5 + $0x2e0] sm:$0xff] }
 0x75d   :  { %8678 = vrcp.f32 %v2084_v27  ;;  %v8677_v23 = vpop.eup %8676  ;;  %v2097_v8 = vadd.f32 1.0, %v8675_v59  ;;  %v7307_v27 = vpack.c.bf16 %v2387_v19, %v2383_v63  ;;  %v2384_v59 = vld [vmem:[#allocation5 + $0x2d0] sm:$0xff]  ;;  %v2415_v19 = vld [vmem:[#allocation5 + $0x3c8] sm:$0xff] }
 0x75e   :  { %8680 = vrcp.f32 %v2090_v33  ;;  %v7339_v33 = vpack.c.bf16 %v2389_v18, %v2385_v16  ;;  %v2412_v63 = vld [vmem:[#allocation5 + $0x3b0] sm:$0xff]  ;;  %v2419_v16 = vld [vmem:[#allocation5 + $0x3e8] sm:$0xff]  ;;  %v2417_v18 = vld [vmem:[#allocation5 + $0x3d8] sm:$0xff] }
 0x75f   :  { %8682 = vrcp.f32 %v2097_v8  ;;  %v2397_v8 = vld [vmem:[#allocation5 + $0x338] sm:$0xff] }
 0x767   :  { %v8679_v28 = vpop.eup %8678 }
 0x768   :  { %v8681_v43 = vpop.eup %8680  ;;  %v2101_v50 = vmul.f32 %v8679_v28, %v8677_v23  ;;  %v2388_v23 = vld [vmem:[#allocation5 + $0x2f0] sm:$0xff]  ;;  %v2391_v28 = vld [vmem:[#allocation5 + $0x308] sm:$0xff] }
 0x769   :  { %v2100_v2 = vmul.f32 %v8681_v43, %v9570_v6  ;;  %v8683_v10 = vpop.eup %8682  ;;  %v2395_v43 = vld [vmem:[#allocation5 + $0x328] sm:$0xff]  ;;  %v7341_v9 = vpack.c.bf16 %v2388_v23, %v2384_v59  ;;  %v2418_v59 = vld [vmem:[#allocation5 + $0x3e0] sm:$0xff]  ;;  %v2416_v23 = vld [vmem:[#allocation5 + $0x3d0] sm:$0xff] }
 0x76a   :  { %v7311_v37 = vpack.c.bf16 %v2395_v43, %v2391_v28  ;;  %v2420_v28 = vld [vmem:[#allocation5 + $0x3f0] sm:$0xff] }
 0x76b   :  { %v9608_v3 = vadd.f32 %v2101_v50, %v2100_v2  ;;  %v2393_v50 = vld [vmem:[#allocation5 + $0x318] sm:$0xff]  ;;  %v7309_v2 = vpack.c.bf16 %v2386_v11, %v2382_v52  ;;  %v7353_v52 = vpack.c.bf16 %v2412_v63, %v2408_v49  ;;  %v2414_v11 = vld [vmem:[#allocation5 + $0x3c0] sm:$0xff] }
 0x76c   :  { %v7343_v41 = vpack.c.bf16 %v2397_v8, %v2393_v50  ;;  %v7325_v43 = vpack.c.bf16 %v2418_v59, %v2414_v11  ;;  %v7357_v50 = vpack.c.bf16 %v2420_v28, %v2416_v23  ;;  %v2708_v8 = vld [vmem:[#allocation7 + $0x200] sm:$0xff]  ;;  %v2735_v49 = vld [vmem:[#allocation7 + $0x2d8] sm:$0xff]  ;;  %v2738_v11 = vld [vmem:[#allocation7 + $0x2f0] sm:$0xff] }
 0x76d   :  { %8684 = vtanh.f32 %v9608_v3  ;;  %v2745_v59 = vld [vmem:[#allocation7 + $0x328] sm:$0xff]  ;;  %v2743_v23 = vld [vmem:[#allocation7 + $0x318] sm:$0xff] }
 0x76e   :  { %v2747_v28 = vld [vmem:[#allocation7 + $0x338] sm:$0xff] }
 0x777   :  { %v8685_v57 = vpop.eup %8684 }
 0x778   :  { %v9611_v6 = vmul.f32 %v8685_v57, %v8683_v10  ;;  %v2403_v10 = vld [vmem:[#allocation5 + $0x368] sm:$0xff]  ;;  %v2401_v57 = vld [vmem:[#allocation5 + $0x358] sm:$0xff] }
 0x77a   :  { %2239 = vmatmul.mubr.f32.vlgmr.msra.gmra.mrb[14].mxu0 %v9611_v6  ;;  %2310 = vmatmul.mubr.f32.vlgmr.msra.gmra.mrb[14].mxu1 %v9611_v6 }
 0x77b   :  { %7298 = vmatpush1.bf16.msra.mxu0 %v7297_v15  ;;  %7330 = vmatpush1.bf16.msra.mxu1 %v7329_v12  ;;  %v2405_v15 = vld [vmem:[#allocation5 + $0x378] sm:$0xff]  ;;  %v7313_v12 = vpack.c.bf16 %v2394_v24, %v2390_v0  ;;  %v2710_v0 = vld [vmem:[#allocation7 + $0x210] sm:$0xff] }
 0x77c   :  { %7300 = vmatprep.subr.bf16.mxu0 %v7299_v21  ;;  %7332 = vmatprep.subr.bf16.mxu1 %v7331_v42  ;;  %v2402_v21 = vld [vmem:[#allocation5 + $0x360] sm:$0xff]  ;;  %v7315_v42 = vpack.c.bf16 %v2403_v10, %v2399_v34  ;;  %v7347_v26 = vpack.c.bf16 %v2405_v15, %v2401_v57  ;;  %v2714_v24 = vld [vmem:[#allocation7 + $0x230] sm:$0xff]  ;;  %v2723_v34 = vld [vmem:[#allocation7 + $0x278] sm:$0xff] }
 0x77d   :  { %2486 = vmatprep.mubr.f32.mxu0 %v9010_v1  ;;  %2599 = vmatprep.mubr.f32.mxu1 %v9010_v1  ;;  %v2716_v10 = vld [vmem:[#allocation7 + $0x240] sm:$0xff]  ;;  %v9659_v15 = vpack.c.bf16 %v2723_v34, %v2719_v55  ;;  %v2755_v55 = vld [vmem:[#allocation7 + $0x378] sm:$0xff] }
 0x77e   :  { %v2720_v57 = vld [vmem:[#allocation7 + $0x260] sm:$0xff] }
 0x77f   :  { %7302 = vmatpush1.bf16.msra.mxu0 %v7301_v44  ;;  %7334 = vmatpush1.bf16.msra.mxu1 %v7333_v58  ;;  %v2413_v44 = vld [vmem:[#allocation5 + $0x3b8] sm:$0xff]  ;;  %v7317_v58 = vpack.c.bf16 %v2402_v21, %v2398_v29  ;;  %v2722_v29 = vld [vmem:[#allocation7 + $0x270] sm:$0xff]  ;;  %v2748_v34 = vld [vmem:[#allocation7 + $0x340] sm:$0xff] }
 0x780   :  { %7304 = vmatprep.subr.bf16.mxu0 %v7303_v17  ;;  %7336 = vmatprep.subr.bf16.mxu1 %v7335_v30  ;;  %v2410_v17 = vld [vmem:[#allocation5 + $0x3a0] sm:$0xff]  ;;  %v7319_v30 = vpack.c.bf16 %v2411_v51, %v2407_v25  ;;  %v7351_v45 = vpack.c.bf16 %v2413_v44, %v2409_v54  ;;  %v2731_v25 = vld [vmem:[#allocation7 + $0x2b8] sm:$0xff] }
 0x781   :  { %v2724_v51 = vld [vmem:[#allocation7 + $0x280] sm:$0xff]  ;;  %v9671_v44 = vpack.c.bf16 %v2731_v25, %v2727_v62  ;;  %v2761_v62 = vld [vmem:[#allocation7 + $0x3a8] sm:$0xff]  ;;  %v2759_v25 = vld [vmem:[#allocation7 + $0x398] sm:$0xff] }
 0x782   :  { %v2728_v54 = vld [vmem:[#allocation7 + $0x2a0] sm:$0xff] }
 0x783   :  { %7306 = vmatpush1.bf16.msra.mxu0 %v7305_v48  ;;  %7338 = vmatpush1.bf16.msra.mxu1 %v7337_v47  ;;  %v2421_v48 = vld [vmem:[#allocation5 + $0x3f8] sm:$0xff]  ;;  %v7321_v47 = vpack.c.bf16 %v2410_v17, %v2406_v7  ;;  %v2730_v7 = vld [vmem:[#allocation7 + $0x2b0] sm:$0xff] }
 0x784   :  { %7308 = vmatprep.subr.bf16.mxu0 %v7307_v27  ;;  %7340 = vmatprep.subr.bf16.mxu1 %v7339_v33  ;;  %v7323_v27 = vpack.c.bf16 %v2419_v16, %v2415_v19  ;;  %v7355_v33 = vpack.c.bf16 %v2421_v48, %v2417_v18  ;;  %v2739_v19 = vld [vmem:[#allocation7 + $0x2f8] sm:$0xff]  ;;  %v2732_v16 = vld [vmem:[#allocation7 + $0x2c0] sm:$0xff] }
 0x785   :  { %v2736_v18 = vld [vmem:[#allocation7 + $0x2e0] sm:$0xff]  ;;  %v9683_v48 = vpack.c.bf16 %v2739_v19, %v2735_v49  ;;  %v2758_v49 = vld [vmem:[#allocation7 + $0x390] sm:$0xff] }
 0x786   :  { %v2762_v19 = vld [vmem:[#allocation7 + $0x3b0] sm:$0xff] }
 0x787   :  { %7310 = vmatpush1.bf16.msra.mxu0 %v7309_v2  ;;  %7342 = vmatpush1.bf16.msra.mxu1 %v7341_v9 }
 0x788   :  { %7312 = vmatprep.subr.bf16.mxu0 %v7311_v37  ;;  %7344 = vmatprep.subr.bf16.mxu1 %v7343_v41  ;;  %v2717_v37 = vld [vmem:[#allocation7 + $0x248] sm:$0xff] }
 0x789   :  { %v2721_v41 = vld [vmem:[#allocation7 + $0x268] sm:$0xff] }
 0x78a   :  { %v9657_v5 = vpack.c.bf16 %v2721_v41, %v2717_v37  ;;  %v2751_v41 = vld [vmem:[#allocation7 + $0x358] sm:$0xff] }
 0x78b   :  { %7314 = vmatpush1.bf16.msra.mxu0 %v7313_v12  ;;  %7346 = vmatpush1.bf16.msra.mxu1 %v7345_v31  ;;  %v9661_v12 = vpack.c.bf16 %v2720_v57, %v2716_v10  ;;  %v2718_v31 = vld [vmem:[#allocation7 + $0x250] sm:$0xff]  ;;  %v9705_v10 = vpack.c.bf16 %v2755_v55, %v2751_v41  ;;  %v2752_v57 = vld [vmem:[#allocation7 + $0x360] sm:$0xff] }
 0x78c   :  { %7316 = vmatprep.subr.bf16.mxu0 %v7315_v42  ;;  %7348 = vmatprep.subr.bf16.mxu1 %v7347_v26  ;;  %v9664_v21 = vpack.c.bf16 %v2722_v29, %v2718_v31  ;;  %v2725_v42 = vld [vmem:[#allocation7 + $0x288] sm:$0xff]  ;;  %v2750_v31 = vld [vmem:[#allocation7 + $0x350] sm:$0xff] }
 0x78d   :  { %v2729_v26 = vld [vmem:[#allocation7 + $0x2a8] sm:$0xff]  ;;  %v2754_v29 = vld [vmem:[#allocation7 + $0x370] sm:$0xff] }
 0x78e   :  { %v9669_v14 = vpack.c.bf16 %v2729_v26, %v2725_v42  ;;  %v9708_v42 = vpack.c.bf16 %v2752_v57, %v2748_v34  ;;  %v2757_v26 = vld [vmem:[#allocation7 + $0x388] sm:$0xff] }
 0x78f   :  { %7318 = vmatpush1.bf16.msra.mxu0 %v7317_v58  ;;  %7350 = vmatpush1.bf16.msra.mxu1 %v7349_v4  ;;  %v9673_v58 = vpack.c.bf16 %v2728_v54, %v2724_v51  ;;  %v2726_v4 = vld [vmem:[#allocation7 + $0x290] sm:$0xff]  ;;  %v9712_v51 = vpack.c.bf16 %v2754_v29, %v2750_v31  ;;  %v9714_v54 = vpack.c.bf16 %v2761_v62, %v2757_v26 }
 0x790   :  { %7320 = vmatprep.subr.bf16.mxu0 %v7319_v30  ;;  %7352 = vmatprep.subr.bf16.mxu1 %v7351_v45  ;;  %v9676_v17 = vpack.c.bf16 %v2730_v7, %v2726_v4  ;;  %v2733_v30 = vld [vmem:[#allocation7 + $0x2c8] sm:$0xff]  ;;  %v2763_v4 = vld [vmem:[#allocation7 + $0x3b8] sm:$0xff]  ;;  %v2756_v7 = vld [vmem:[#allocation7 + $0x380] sm:$0xff] }
 0x791   :  { %v2737_v45 = vld [vmem:[#allocation7 + $0x2e8] sm:$0xff] }
 0x792   :  { %v9681_v63 = vpack.c.bf16 %v2737_v45, %v2733_v30  ;;  %v2760_v30 = vld [vmem:[#allocation7 + $0x3a0] sm:$0xff]  ;;  %v9717_v45 = vpack.c.bf16 %v2763_v4, %v2759_v25 }
 0x793   :  { %7322 = vmatpush1.bf16.msra.mxu0 %v7321_v47  ;;  %7354 = vmatpush1.bf16.msra.mxu1 %v7353_v52  ;;  %v9685_v47 = vpack.c.bf16 %v2736_v18, %v2732_v16  ;;  %v2734_v52 = vld [vmem:[#allocation7 + $0x2d0] sm:$0xff]  ;;  %v9720_v16 = vpack.c.bf16 %v2760_v30, %v2756_v7  ;;  %v9724_v18 = vpack.c.bf16 %v2762_v19, %v2758_v49 }
 0x794   :  { %7324 = vmatprep.subr.bf16.mxu0 %v7323_v27  ;;  %7356 = vmatprep.subr.bf16.mxu1 %v7355_v33  ;;  %v2741_v27 = vld [vmem:[#allocation7 + $0x308] sm:$0xff]  ;;  %v9688_v33 = vpack.c.bf16 %v2738_v11, %v2734_v52 }
 0x795   :  { %v2765_v52 = vld [vmem:[#allocation7 + $0x3c8] sm:$0xff] }
 0x796   :  { %v2769_v11 = vld [vmem:[#allocation7 + $0x3e8] sm:$0xff] }
 0x797   :  { %7326 = vmatpush1.bf16.msra.mxu0 %v7325_v43  ;;  %7358 = vmatpush1.bf16.msra.mxu1 %v7357_v50  ;;  %v9692_v43 = vpack.c.bf16 %v2745_v59, %v2741_v27  ;;  %v9694_v50 = vpack.c.bf16 %v2747_v28, %v2743_v23  ;;  %v2767_v27 = vld [vmem:[#allocation7 + $0x3d8] sm:$0xff]  ;;  %v9729_v59 = vpack.c.bf16 %v2769_v11, %v2765_v52  ;;  %v2764_v28 = vld [vmem:[#allocation7 + $0x3c0] sm:$0xff] }
 0x798   :  { %v2771_v23 = vld [vmem:[#allocation7 + $0x3f8] sm:$0xff] }
 0x79a   :  { %2487 = vmatmul.mubr.f32.vlgmr.msra.gmra.mrb[16].mxu0 %v9281_v40  ;;  %2600 = vmatmul.mubr.f32.vlgmr.msra.gmra.mrb[16].mxu1 %v9281_v40  ;;  %v2709_v40 = vld [vmem:[#allocation7 + $0x208] sm:$0xff] }
 0x79b   :  { %2492 = vmatprep.mubr.f32.mxu0 %v9010_v1  ;;  %2605 = vmatprep.mubr.f32.mxu1 %v9010_v1 }
 0x79e   :  { %2493 = vmatmul.mubr.f32.gmra.mrb[18].mxu0 %v9325_v22  ;;  %2606 = vmatmul.mubr.f32.gmra.mrb[18].mxu1 %v9325_v22  ;;  %v2713_v22 = vld [vmem:[#allocation7 + $0x228] sm:$0xff] }
 0x79f   :  { %2498 = vmatprep.mubr.f32.mxu0 %v9010_v1  ;;  %2611 = vmatprep.mubr.f32.mxu1 %v9010_v1 }
 0x7a2   :  { %2499 = vmatmul.mubr.f32.gmra.mrb[20].mxu0 %v9389_v13  ;;  %2612 = vmatmul.mubr.f32.gmra.mrb[20].mxu1 %v9389_v13  ;;  %v2711_v13 = vld [vmem:[#allocation7 + $0x218] sm:$0xff] }
 0x7a3   :  { %2504 = vmatprep.mubr.f32.mxu0 %v9010_v1  ;;  %2617 = vmatprep.mubr.f32.mxu1 %v9010_v1 }
 0x7a6   :  { %2505 = vmatmul.mubr.f32.gmra.mrb[22].mxu0 %v9483_v46  ;;  %2618 = vmatmul.mubr.f32.gmra.mrb[22].mxu1 %v9483_v46  ;;  %v9645_v46 = vpack.c.bf16 %v2713_v22, %v2709_v40  ;;  %v2740_v40 = vld [vmem:[#allocation7 + $0x300] sm:$0xff] }
 0x7a7   :  { %2510 = vmatprep.mubr.f32.mxu0 %v9010_v1  ;;  %2623 = vmatprep.mubr.f32.mxu1 %v9010_v1  ;;  %v2744_v22 = vld [vmem:[#allocation7 + $0x320] sm:$0xff] }
 0x7a8   :  { %7360 = vmatprep.subr.bf16.mxu0 %v9645_v46 }
 0x7aa   :  { %2511 = vmatmul.mubr.f32.gmra.mrb[24].mxu0 %v9529_v20  ;;  %2624 = vmatmul.mubr.f32.gmra.mrb[24].mxu1 %v9529_v20  ;;  %v2715_v20 = vld [vmem:[#allocation7 + $0x238] sm:$0xff] }
 0x7ab   :  { %2516 = vmatprep.mubr.f32.mxu0 %v9010_v1  ;;  %2629 = vmatprep.mubr.f32.mxu1 %v9010_v1  ;;  %v9647_v2 = vpack.c.bf16 %v2715_v20, %v2711_v13  ;;  %v2742_v13 = vld [vmem:[#allocation7 + $0x310] sm:$0xff]  ;;  %v9697_v20 = vpack.c.bf16 %v2744_v22, %v2740_v40  ;;  %v2768_v40 = vld [vmem:[#allocation7 + $0x3e0] sm:$0xff]  ;;  %v9731_v22 = vpack.c.bf16 %v2771_v23, %v2767_v27 }
 0x7ad   :  { %7392 = vmatprep.subr.bf16.mxu1 %v9647_v2 }
 0x7ae   :  { %2517 = vmatmul.mubr.f32.gmra.mrb[26].mxu0 %v9573_v61  ;;  %2630 = vmatmul.mubr.f32.gmra.mrb[26].mxu1 %v9573_v61  ;;  %v2712_v61 = vld [vmem:[#allocation7 + $0x220] sm:$0xff] }
 0x7af   :  { %2522 = vmatprep.mubr.f32.mxu0 %v9010_v1  ;;  %2635 = vmatprep.mubr.f32.mxu1 %v9010_v1  ;;  %v9649_v9 = vpack.c.bf16 %v2712_v61, %v2708_v8  ;;  %v2746_v8 = vld [vmem:[#allocation7 + $0x330] sm:$0xff]  ;;  %v2749_v61 = vld [vmem:[#allocation7 + $0x348] sm:$0xff] }
 0x7b1   :  { %7362 = vmatpush1.bf16.msra.mxu0 %v9649_v9 }
 0x7b2   :  { %2523 = vmatmul.mubr.f32.gmra.mrb[28].mxu0 %v9611_v6  ;;  %2636 = vmatmul.mubr.f32.gmra.mrb[28].mxu1 %v9611_v6  ;;  %v9652_v6 = vpack.c.bf16 %v2714_v24, %v2710_v0  ;;  %v2753_v0 = vld [vmem:[#allocation7 + $0x368] sm:$0xff]  ;;  %v9701_v24 = vpack.c.bf16 %v2746_v8, %v2742_v13  ;;  %v9733_v13 = vpack.c.bf16 %v2768_v40, %v2764_v28  ;;  %v2766_v8 = vld [vmem:[#allocation7 + $0x3d0] sm:$0xff] }
 0x7b3   :  { %2528 = vmatprep.mubr.f32.mxu0 %v9010_v1  ;;  %2641 = vmatprep.mubr.f32.mxu1 %v9010_v1  ;;  %v9703_v37 = vpack.c.bf16 %v2753_v0, %v2749_v61  ;;  %v2770_v61 = vld [vmem:[#allocation7 + $0x3f0] sm:$0xff] }
 0x7b4   :  { %7394 = vmatpush1.bf16.msra.mxu1 %v9652_v6  ;;  %7364 = vmatprep.subr.bf16.mxu0 %v9657_v5  ;;  %v9736_v0 = vpack.c.bf16 %v2770_v61, %v2766_v8 }
 0x7b5   :  { %7396 = vmatprep.subr.bf16.mxu1 %v9659_v15  ;;  %7366 = vmatpush1.bf16.msra.mxu0 %v9661_v12 }
 0x7b6   :  { %7368 = vmatprep.subr.bf16.mxu0 %v9669_v14 }
 0x7b8   :  { %7398 = vmatpush1.bf16.msra.mxu1 %v9664_v21 }
 0x7b9   :  { %7400 = vmatprep.subr.bf16.mxu1 %v9671_v44  ;;  %7370 = vmatpush1.bf16.msra.mxu0 %v9673_v58 }
 0x7ba   :  { %7372 = vmatprep.subr.bf16.mxu0 %v9681_v63 }
 0x7bc   :  { %7402 = vmatpush1.bf16.msra.mxu1 %v9676_v17 }
 0x7bd   :  { %7404 = vmatprep.subr.bf16.mxu1 %v9683_v48  ;;  %7374 = vmatpush1.bf16.msra.mxu0 %v9685_v47 }
 0x7be   :  { %7376 = vmatprep.subr.bf16.mxu0 %v9692_v43 }
 0x7c0   :  { %7406 = vmatpush1.bf16.msra.mxu1 %v9688_v33 }
 0x7c1   :  { %7408 = vmatprep.subr.bf16.mxu1 %v9694_v50  ;;  %7378 = vmatpush1.bf16.msra.mxu0 %v9697_v20 }
 0x7c2   :  { %7380 = vmatprep.subr.bf16.mxu0 %v9703_v37 }
 0x7c4   :  { %7410 = vmatpush1.bf16.msra.mxu1 %v9701_v24 }
 0x7c5   :  { %7412 = vmatprep.subr.bf16.mxu1 %v9705_v10  ;;  %7382 = vmatpush1.bf16.msra.mxu0 %v9708_v42 }
 0x7c6   :  { %7384 = vmatprep.subr.bf16.mxu0 %v9714_v54 }
 0x7c8   :  { %7414 = vmatpush1.bf16.msra.mxu1 %v9712_v51 }
 0x7c9   :  { %7416 = vmatprep.subr.bf16.mxu1 %v9717_v45  ;;  %7386 = vmatpush1.bf16.msra.mxu0 %v9720_v16 }
 0x7ca   :  { %7388 = vmatprep.subr.bf16.mxu0 %v9729_v59 }
 0x7cc   :  { %7418 = vmatpush1.bf16.msra.mxu1 %v9724_v18 }
 0x7cd   :  { %7420 = vmatprep.subr.bf16.mxu1 %v9731_v22  ;;  %7390 = vmatpush1.bf16.msra.mxu0 %v9733_v13 }
 0x7ce   :  { %7424 = vmatprep.subr.bf16.mxu0 %v9645_v46 }
 0x7d0   :  { %7422 = vmatpush1.bf16.msra.mxu1 %v9736_v0 }
 0x7d1   :  { %7456 = vmatprep.subr.bf16.mxu1 %v9647_v2 }
 0x84d   :  { %v2240_v41 = vpop.f32.mrb[14].mxu0  ;;  %v2311_v55 = vpop.f32.mrb[14].mxu1 }
 0x84e   :  { %v2320_v34 = vadd.f32 %v2240_v41, %v9259_v36  ;;  %v2242_v57 = vpop.f32.mrb[15].mxu0  ;;  %v2313_v31 = vpop.f32.mrb[15].mxu1  ;;  %v2322_v7 = vadd.f32 %v2311_v55, %v9275_v60 }
 0x84f   :  { %v2321_v29 = vadd.f32 %v2242_v57, %v9262_v38  ;;  %v2323_v25 = vadd.f32 %v2313_v31, %v9269_v53 }
 0x850   :  { %v6613_v26 = vmul.f32 -1.442695, %v2320_v34 }
 0x851   :  { %v6614_v62 = vmul.f32 -1.442695, %v2321_v29  ;;  %v6615_v4 = vmul.f32 -1.442695, %v2323_v25 }
 0x852   :  { %8686 = vpow2.f32 %v6613_v26 }
 0x853   :  { %8688 = vpow2.f32 %v6614_v62 }
 0x854   :  { %8690 = vpow2.f32 %v6615_v4 }
 0x855   :  { %8692 = vtanh.f32 %v2322_v7 }
 0x85c   :  { %v8687_v30 = vpop.eup %8686 }
 0x85d   :  { %v8689_v49 = vpop.eup %8688  ;;  %v2327_v19 = vadd.f32 1.0, %v8687_v30 }
 0x85e   :  { %v2333_v52 = vadd.f32 1.0, %v8689_v49  ;;  %v8691_v36 = vpop.eup %8690 }
 0x85f   :  { %8694 = vrcp.f32 %v2327_v19  ;;  %v8693_v11 = vpop.eup %8692  ;;  %v2340_v28 = vadd.f32 1.0, %v8691_v36 }
 0x860   :  { %8696 = vrcp.f32 %v2333_v52 }
 0x861   :  { %8698 = vrcp.f32 %v2340_v28 }
 0x869   :  { %v8695_v38 = vpop.eup %8694 }
 0x86a   :  { %v8697_v27 = vpop.eup %8696  ;;  %v2344_v23 = vmul.f32 %v8695_v38, %v8693_v11 }
 0x86b   :  { %v2343_v40 = vmul.f32 %v8697_v27, %v9608_v3  ;;  %v8699_v60 = vpop.eup %8698  ;;  %v6616_v3 = vld [vmem:[%s10653_s3 + $0x4] sm:$0xf] }
 0x86c   :  { %v9790_v41 = vrot.slane %v6616_v3, %v9251_v32  ;;  %v9793_v55 = vrot.slane %v6616_v3, %v9256_v35  ;;  %v9798_v7 = vrot.slane %v6616_v3, %v9264_v39  ;;  %v9802_v49 = vrot.slane %v6616_v3, %v9271_v56 }
 0x86d   :  { %v2345_v53 = vadd.f32 %v2344_v23, %v2343_v40 }
 0x86f   :  { %8700 = vtanh.f32 %v2345_v53 }
 0x879   :  { %v8701_v8 = vpop.eup %8700 }
 0x87a   :  { %v2347_v61 = vmul.f32 %v8701_v8, %v8699_v60 }
 0x87c   :  { %2529 = vmatmul.mubr.f32.gmra.mrb[30].mxu0 %v2347_v61  ;;  %2642 = vmatmul.mubr.f32.gmra.mrb[30].mxu1 %v2347_v61 }
 0x87d   :  { %2836 = vmatprep.mubr.f32.mxu0 %v9010_v1  ;;  %2907 = vmatprep.mubr.f32.mxu1 %v9010_v1 }
 0x880   :  { %2837 = vmatmul.mubr.f32.vlgmr.msra.gmra.mrb[16].mxu0 %v9010_v1  ;;  %2908 = vmatmul.mubr.f32.vlgmr.msra.gmra.mrb[16].mxu1 %v9010_v1 }
 0x881   :  { %7426 = vmatpush1.bf16.msra.mxu0 %v9649_v9  ;;  %7458 = vmatpush1.bf16.msra.mxu1 %v9652_v6 }
 0x882   :  { %7428 = vmatprep.subr.bf16.mxu0 %v9657_v5  ;;  %7460 = vmatprep.subr.bf16.mxu1 %v9659_v15 }
 0x883   :  { %3079 = vmatprep.mubr.f32.mxu0 %v9010_v1  ;;  %3150 = vmatprep.mubr.f32.mxu1 %v9010_v1 }
 0x885   :  { %7430 = vmatpush1.bf16.msra.mxu0 %v9661_v12  ;;  %7462 = vmatpush1.bf16.msra.mxu1 %v9664_v21 }
 0x886   :  { %7432 = vmatprep.subr.bf16.mxu0 %v9669_v14  ;;  %7464 = vmatprep.subr.bf16.mxu1 %v9671_v44 }
 0x889   :  { %7434 = vmatpush1.bf16.msra.mxu0 %v9673_v58  ;;  %7466 = vmatpush1.bf16.msra.mxu1 %v9676_v17 }
 0x88a   :  { %7436 = vmatprep.subr.bf16.mxu0 %v9681_v63  ;;  %7468 = vmatprep.subr.bf16.mxu1 %v9683_v48 }
 0x88d   :  { %7438 = vmatpush1.bf16.msra.mxu0 %v9685_v47  ;;  %7470 = vmatpush1.bf16.msra.mxu1 %v9688_v33 }
 0x88e   :  { %7440 = vmatprep.subr.bf16.mxu0 %v9692_v43  ;;  %7472 = vmatprep.subr.bf16.mxu1 %v9694_v50 }
 0x891   :  { %7442 = vmatpush1.bf16.msra.mxu0 %v9697_v20  ;;  %7474 = vmatpush1.bf16.msra.mxu1 %v9701_v24 }
 0x892   :  { %7444 = vmatprep.subr.bf16.mxu0 %v9703_v37  ;;  %7476 = vmatprep.subr.bf16.mxu1 %v9705_v10 }
 0x895   :  { %7446 = vmatpush1.bf16.msra.mxu0 %v9708_v42  ;;  %7478 = vmatpush1.bf16.msra.mxu1 %v9712_v51 }
 0x896   :  { %7448 = vmatprep.subr.bf16.mxu0 %v9714_v54  ;;  %7480 = vmatprep.subr.bf16.mxu1 %v9717_v45 }
 0x899   :  { %7450 = vmatpush1.bf16.msra.mxu0 %v9720_v16  ;;  %7482 = vmatpush1.bf16.msra.mxu1 %v9724_v18 }
 0x89a   :  { %7452 = vmatprep.subr.bf16.mxu0 %v9729_v59  ;;  %7484 = vmatprep.subr.bf16.mxu1 %v9731_v22 }
 0x89d   :  { %7454 = vmatpush1.bf16.msra.mxu0 %v9733_v13  ;;  %7486 = vmatpush1.bf16.msra.mxu1 %v9736_v0 }
 0x89e   :  { %7488 = vmatprep.subr.bf16.mxu0 %v9645_v46  ;;  %7520 = vmatprep.subr.bf16.mxu1 %v9647_v2 }
 0x953   :  { %v2838_v34 = vpop.f32.mrb[16].mxu0  ;;  %v2909_v57 = vpop.f32.mrb[16].mxu1 }
 0x954   :  { %v2918_v31 = vadd.f32 %v2838_v34, %v9790_v41  ;;  %v2840_v29 = vpop.f32.mrb[17].mxu0  ;;  %v2911_v26 = vpop.f32.mrb[17].mxu1  ;;  %v2920_v52 = vadd.f32 %v2909_v57, %v9802_v49 }
 0x955   :  { %v2919_v62 = vadd.f32 %v2840_v29, %v9793_v55  ;;  %v2921_v30 = vadd.f32 %v2911_v26, %v9798_v7 }
 0x956   :  { %v6617_v25 = vmul.f32 -1.442695, %v2918_v31 }
 0x957   :  { %v6618_v4 = vmul.f32 -1.442695, %v2919_v62  ;;  %v6619_v19 = vmul.f32 -1.442695, %v2921_v30 }
 0x958   :  { %8702 = vpow2.f32 %v6617_v25 }
 0x959   :  { %8704 = vpow2.f32 %v6618_v4 }
 0x95a   :  { %8706 = vpow2.f32 %v6619_v19 }
 0x95b   :  { %8708 = vtanh.f32 %v2920_v52 }
 0x962   :  { %v8703_v36 = vpop.eup %8702 }
 0x963   :  { %v8705_v11 = vpop.eup %8704  ;;  %v2925_v38 = vadd.f32 1.0, %v8703_v36 }
 0x964   :  { %v2931_v27 = vadd.f32 1.0, %v8705_v11  ;;  %v8707_v23 = vpop.eup %8706 }
 0x965   :  { %8710 = vrcp.f32 %v2925_v38  ;;  %v8709_v28 = vpop.eup %8708  ;;  %v2938_v8 = vadd.f32 1.0, %v8707_v23 }
 0x966   :  { %8712 = vrcp.f32 %v2931_v27 }
 0x967   :  { %8714 = vrcp.f32 %v2938_v8 }
 0x96f   :  { %v8711_v40 = vpop.eup %8710 }
 0x970   :  { %v8713_v53 = vpop.eup %8712  ;;  %v2942_v60 = vmul.f32 %v8711_v40, %v8709_v28 }
 0x971   :  { %v2941_v61 = vmul.f32 0.0, %v8713_v53  ;;  %v8715_v34 = vpop.eup %8714 }
 0x973   :  { %v9805_v3 = vadd.f32 %v2942_v60, %v2941_v61 }
 0x975   :  { %8716 = vtanh.f32 %v9805_v3 }
 0x97f   :  { %v8717_v57 = vpop.eup %8716 }
 0x980   :  { %v9808_v31 = vmul.f32 %v8717_v57, %v8715_v34 }
 0x982   :  { %3080 = vmatmul.mubr.f32.vlgmr.msra.gmra.mrb[18].mxu0 %v9808_v31  ;;  %3151 = vmatmul.mubr.f32.vlgmr.msra.gmra.mrb[18].mxu1 %v9808_v31 }
 0x983   :  { %7490 = vmatpush1.bf16.msra.mxu0 %v9649_v9  ;;  %7522 = vmatpush1.bf16.msra.mxu1 %v9652_v6 }
 0x984   :  { %7492 = vmatprep.subr.bf16.mxu0 %v9657_v5  ;;  %7524 = vmatprep.subr.bf16.mxu1 %v9659_v15 }
 0x985   :  { %3322 = vmatprep.mubr.f32.mxu0 %v9010_v1  ;;  %3393 = vmatprep.mubr.f32.mxu1 %v9010_v1 }
 0x987   :  { %7494 = vmatpush1.bf16.msra.mxu0 %v9661_v12  ;;  %7526 = vmatpush1.bf16.msra.mxu1 %v9664_v21 }
 0x988   :  { %7496 = vmatprep.subr.bf16.mxu0 %v9669_v14  ;;  %7528 = vmatprep.subr.bf16.mxu1 %v9671_v44 }
 0x98b   :  { %7498 = vmatpush1.bf16.msra.mxu0 %v9673_v58  ;;  %7530 = vmatpush1.bf16.msra.mxu1 %v9676_v17 }
 0x98c   :  { %7500 = vmatprep.subr.bf16.mxu0 %v9681_v63  ;;  %7532 = vmatprep.subr.bf16.mxu1 %v9683_v48 }
 0x98f   :  { %7502 = vmatpush1.bf16.msra.mxu0 %v9685_v47  ;;  %7534 = vmatpush1.bf16.msra.mxu1 %v9688_v33 }
 0x990   :  { %7504 = vmatprep.subr.bf16.mxu0 %v9692_v43  ;;  %7536 = vmatprep.subr.bf16.mxu1 %v9694_v50 }
 0x993   :  { %7506 = vmatpush1.bf16.msra.mxu0 %v9697_v20  ;;  %7538 = vmatpush1.bf16.msra.mxu1 %v9701_v24 }
 0x994   :  { %7508 = vmatprep.subr.bf16.mxu0 %v9703_v37  ;;  %7540 = vmatprep.subr.bf16.mxu1 %v9705_v10 }
 0x997   :  { %7510 = vmatpush1.bf16.msra.mxu0 %v9708_v42  ;;  %7542 = vmatpush1.bf16.msra.mxu1 %v9712_v51 }
 0x998   :  { %7512 = vmatprep.subr.bf16.mxu0 %v9714_v54  ;;  %7544 = vmatprep.subr.bf16.mxu1 %v9717_v45 }
 0x99b   :  { %7514 = vmatpush1.bf16.msra.mxu0 %v9720_v16  ;;  %7546 = vmatpush1.bf16.msra.mxu1 %v9724_v18 }
 0x99c   :  { %7516 = vmatprep.subr.bf16.mxu0 %v9729_v59  ;;  %7548 = vmatprep.subr.bf16.mxu1 %v9731_v22 }
 0x99f   :  { %7518 = vmatpush1.bf16.msra.mxu0 %v9733_v13  ;;  %7550 = vmatpush1.bf16.msra.mxu1 %v9736_v0 }
 0x9a0   :  { %7552 = vmatprep.subr.bf16.mxu0 %v9645_v46  ;;  %7584 = vmatprep.subr.bf16.mxu1 %v9647_v2 }
 0xa55   :  { %v3081_v29 = vpop.f32.mrb[18].mxu0  ;;  %v3152_v26 = vpop.f32.mrb[18].mxu1 }
 0xa56   :  { %v3161_v62 = vadd.f32 %v3081_v29, %v9790_v41  ;;  %v3083_v25 = vpop.f32.mrb[19].mxu0  ;;  %v3154_v4 = vpop.f32.mrb[19].mxu1  ;;  %v3163_v38 = vadd.f32 %v3152_v26, %v9802_v49 }
 0xa57   :  { %v3162_v30 = vadd.f32 %v3083_v25, %v9793_v55  ;;  %v3164_v36 = vadd.f32 %v3154_v4, %v9798_v7  ;;  %v3680_v25 = vld [vmem:[#allocation7 + $0x200] sm:$0xff] }
 0xa58   :  { %v6620_v19 = vmul.f32 -1.442695, %v3161_v62  ;;  %v3684_v4 = vld [vmem:[#allocation7 + $0x220] sm:$0xff] }
 0xa59   :  { %v6621_v52 = vmul.f32 -1.442695, %v3162_v30  ;;  %v6622_v11 = vmul.f32 -1.442695, %v3164_v36  ;;  %v3686_v36 = vld [vmem:[#allocation7 + $0x230] sm:$0xff] }
 0xa5a   :  { %8718 = vpow2.f32 %v6620_v19  ;;  %v9908_v19 = vpack.c.bf16 %v3684_v4, %v3680_v25 }
 0xa5b   :  { %8720 = vpow2.f32 %v6621_v52  ;;  %v3682_v52 = vld [vmem:[#allocation7 + $0x210] sm:$0xff] }
 0xa5c   :  { %8722 = vpow2.f32 %v6622_v11  ;;  %v9911_v11 = vpack.c.bf16 %v3686_v36, %v3682_v52  ;;  %v3714_v52 = vld [vmem:[#allocation7 + $0x310] sm:$0xff] }
 0xa5d   :  { %8724 = vtanh.f32 %v3163_v38  ;;  %v3689_v38 = vld [vmem:[#allocation7 + $0x248] sm:$0xff]  ;;  %v3718_v36 = vld [vmem:[#allocation7 + $0x330] sm:$0xff] }
 0xa64   :  { %v8719_v46 = vpop.eup %8718 }
 0xa65   :  { %v8721_v27 = vpop.eup %8720  ;;  %v3168_v2 = vadd.f32 1.0, %v8719_v46  ;;  %v3693_v46 = vld [vmem:[#allocation7 + $0x268] sm:$0xff] }
 0xa66   :  { %v3174_v23 = vadd.f32 1.0, %v8721_v27  ;;  %v8723_v28 = vpop.eup %8722  ;;  %v3691_v27 = vld [vmem:[#allocation7 + $0x258] sm:$0xff] }
 0xa67   :  { %8726 = vrcp.f32 %v3168_v2  ;;  %v8725_v40 = vpop.eup %8724  ;;  %v3181_v61 = vadd.f32 1.0, %v8723_v28  ;;  %v9916_v2 = vpack.c.bf16 %v3693_v46, %v3689_v38  ;;  %v3688_v28 = vld [vmem:[#allocation7 + $0x240] sm:$0xff]  ;;  %v9959_v38 = vpack.c.bf16 %v3718_v36, %v3714_v52  ;;  %v3721_v46 = vld [vmem:[#allocation7 + $0x348] sm:$0xff] }
 0xa68   :  { %8728 = vrcp.f32 %v3174_v23  ;;  %v3695_v23 = vld [vmem:[#allocation7 + $0x278] sm:$0xff]  ;;  %v3736_v52 = vld [vmem:[#allocation7 + $0x3c0] sm:$0xff] }
 0xa69   :  { %8730 = vrcp.f32 %v3181_v61  ;;  %v3694_v61 = vld [vmem:[#allocation7 + $0x270] sm:$0xff] }
 0xa71   :  { %v8727_v53 = vpop.eup %8726 }
 0xa72   :  { %v8729_v60 = vpop.eup %8728  ;;  %v3185_v8 = vmul.f32 %v8727_v53, %v8725_v40  ;;  %v3692_v40 = vld [vmem:[#allocation7 + $0x260] sm:$0xff]  ;;  %v9918_v53 = vpack.c.bf16 %v3695_v23, %v3691_v27  ;;  %v3725_v27 = vld [vmem:[#allocation7 + $0x368] sm:$0xff]  ;;  %v3723_v23 = vld [vmem:[#allocation7 + $0x358] sm:$0xff] }
 0xa73   :  { %v3184_v34 = vmul.f32 %v8729_v60, %v9805_v3  ;;  %v8731_v29 = vpop.eup %8730  ;;  %v3687_v3 = vld [vmem:[#allocation7 + $0x238] sm:$0xff]  ;;  %v9920_v60 = vpack.c.bf16 %v3692_v40, %v3688_v28  ;;  %v9963_v28 = vpack.c.bf16 %v3725_v27, %v3721_v46  ;;  %v3740_v46 = vld [vmem:[#allocation7 + $0x3e0] sm:$0xff]  ;;  %v3738_v27 = vld [vmem:[#allocation7 + $0x3d0] sm:$0xff] }
 0xa74   :  { %v3727_v40 = vld [vmem:[#allocation7 + $0x378] sm:$0xff] }
 0xa75   :  { %v9851_v57 = vadd.f32 %v3185_v8, %v3184_v34  ;;  %v3690_v8 = vld [vmem:[#allocation7 + $0x250] sm:$0xff] }
 0xa76   :  { %v9923_v34 = vpack.c.bf16 %v3694_v61, %v3690_v8  ;;  %v3720_v8 = vld [vmem:[#allocation7 + $0x340] sm:$0xff] }
 0xa77   :  { %8732 = vtanh.f32 %v9851_v57  ;;  %v3724_v61 = vld [vmem:[#allocation7 + $0x360] sm:$0xff] }
 0xa81   :  { %v8733_v26 = vpop.eup %8732 }
 0xa82   :  { %v9854_v62 = vmul.f32 %v8733_v26, %v8731_v29  ;;  %v3701_v29 = vld [vmem:[#allocation7 + $0x2a8] sm:$0xff]  ;;  %v3699_v26 = vld [vmem:[#allocation7 + $0x298] sm:$0xff] }
 0xa84   :  { %3323 = vmatmul.mubr.f32.vlgmr.msra.gmra.mrb[20].mxu0 %v9854_v62  ;;  %3394 = vmatmul.mubr.f32.vlgmr.msra.gmra.mrb[20].mxu1 %v9854_v62 }
 0xa85   :  { %7554 = vmatpush1.bf16.msra.mxu0 %v9649_v9  ;;  %7586 = vmatpush1.bf16.msra.mxu1 %v9652_v6 }
 0xa86   :  { %7556 = vmatprep.subr.bf16.mxu0 %v9657_v5  ;;  %7588 = vmatprep.subr.bf16.mxu1 %v9659_v15 }
 0xa87   :  { %3565 = vmatprep.mubr.f32.mxu0 %v9010_v1  ;;  %3636 = vmatprep.mubr.f32.mxu1 %v9010_v1 }
 0xa89   :  { %7558 = vmatpush1.bf16.msra.mxu0 %v9661_v12  ;;  %7590 = vmatpush1.bf16.msra.mxu1 %v9664_v21 }
 0xa8a   :  { %7560 = vmatprep.subr.bf16.mxu0 %v9669_v14  ;;  %7592 = vmatprep.subr.bf16.mxu1 %v9671_v44 }
 0xa8d   :  { %7562 = vmatpush1.bf16.msra.mxu0 %v9673_v58  ;;  %7594 = vmatpush1.bf16.msra.mxu1 %v9676_v17 }
 0xa8e   :  { %7564 = vmatprep.subr.bf16.mxu0 %v9681_v63  ;;  %7596 = vmatprep.subr.bf16.mxu1 %v9683_v48 }
 0xa91   :  { %7566 = vmatpush1.bf16.msra.mxu0 %v9685_v47  ;;  %7598 = vmatpush1.bf16.msra.mxu1 %v9688_v33 }
 0xa92   :  { %7568 = vmatprep.subr.bf16.mxu0 %v9692_v43  ;;  %7600 = vmatprep.subr.bf16.mxu1 %v9694_v50 }
 0xa95   :  { %7570 = vmatpush1.bf16.msra.mxu0 %v9697_v20  ;;  %7602 = vmatpush1.bf16.msra.mxu1 %v9701_v24 }
 0xa96   :  { %7572 = vmatprep.subr.bf16.mxu0 %v9703_v37  ;;  %7604 = vmatprep.subr.bf16.mxu1 %v9705_v10 }
 0xa99   :  { %7574 = vmatpush1.bf16.msra.mxu0 %v9708_v42  ;;  %7606 = vmatpush1.bf16.msra.mxu1 %v9712_v51 }
 0xa9a   :  { %7576 = vmatprep.subr.bf16.mxu0 %v9714_v54  ;;  %7608 = vmatprep.subr.bf16.mxu1 %v9717_v45 }
 0xa9d   :  { %7578 = vmatpush1.bf16.msra.mxu0 %v9720_v16  ;;  %7610 = vmatpush1.bf16.msra.mxu1 %v9724_v18 }
 0xa9e   :  { %7580 = vmatprep.subr.bf16.mxu0 %v9729_v59  ;;  %7612 = vmatprep.subr.bf16.mxu1 %v9731_v22  ;;  %v3681_v59 = vld [vmem:[#allocation7 + $0x208] sm:$0xff] }
 0xa9f   :  { %v3685_v22 = vld [vmem:[#allocation7 + $0x228] sm:$0xff] }
 0xaa1   :  { %7582 = vmatpush1.bf16.msra.mxu0 %v9733_v13  ;;  %7614 = vmatpush1.bf16.msra.mxu1 %v9736_v0  ;;  %v3683_v13 = vld [vmem:[#allocation7 + $0x218] sm:$0xff]  ;;  %v9904_v0 = vpack.c.bf16 %v3685_v22, %v3681_v59 }
 0xaa2   :  { %v9906_v30 = vpack.c.bf16 %v3687_v3, %v3683_v13  ;;  %v3719_v22 = vld [vmem:[#allocation7 + $0x338] sm:$0xff]  ;;  %v3712_v13 = vld [vmem:[#allocation7 + $0x300] sm:$0xff] }
 0xaa3   :  { %7616 = vmatprep.subr.bf16.mxu0 %v9904_v0  ;;  %v3716_v3 = vld [vmem:[#allocation7 + $0x320] sm:$0xff] }
 0xaa4   :  { %7648 = vmatprep.subr.bf16.mxu1 %v9906_v30  ;;  %v9956_v4 = vpack.c.bf16 %v3716_v3, %v3712_v13  ;;  %v3739_v13 = vld [vmem:[#allocation7 + $0x3d8] sm:$0xff] }
 0xaa5   :  { %v3743_v3 = vld [vmem:[#allocation7 + $0x3f8] sm:$0xff] }
 0xaa6   :  { %v9988_v36 = vpack.c.bf16 %v3743_v3, %v3739_v13 }
 0xb57   :  { %v3324_v9 = vpop.f32.mrb[20].mxu0  ;;  %v3395_v6 = vpop.f32.mrb[20].mxu1 }
 0xb58   :  { %v3404_v5 = vadd.f32 %v3324_v9, %v9790_v41  ;;  %v3326_v15 = vpop.f32.mrb[21].mxu0  ;;  %v3397_v12 = vpop.f32.mrb[21].mxu1  ;;  %v3406_v63 = vadd.f32 %v3395_v6, %v9802_v49  ;;  %v3703_v6 = vld [vmem:[#allocation7 + $0x2b8] sm:$0xff] }
 0xb59   :  { %v3405_v21 = vadd.f32 %v3326_v15, %v9793_v55  ;;  %v3407_v58 = vadd.f32 %v3397_v12, %v9798_v7  ;;  %v3700_v15 = vld [vmem:[#allocation7 + $0x2a0] sm:$0xff]  ;;  %v9930_v12 = vpack.c.bf16 %v3703_v6, %v3699_v26  ;;  %v3722_v26 = vld [vmem:[#allocation7 + $0x350] sm:$0xff] }
 0xb5a   :  { %v6623_v14 = vmul.f32 -1.442695, %v3404_v5  ;;  %v3696_v5 = vld [vmem:[#allocation7 + $0x280] sm:$0xff]  ;;  %v3726_v6 = vld [vmem:[#allocation7 + $0x370] sm:$0xff] }
 0xb5b   :  { %v6624_v44 = vmul.f32 -1.442695, %v3405_v21  ;;  %v6625_v17 = vmul.f32 -1.442695, %v3407_v58  ;;  %v9932_v21 = vpack.c.bf16 %v3700_v15, %v3696_v5  ;;  %v3729_v5 = vld [vmem:[#allocation7 + $0x388] sm:$0xff]  ;;  %v9971_v15 = vpack.c.bf16 %v3726_v6, %v3722_v26 }
 0xb5c   :  { %8734 = vpow2.f32 %v6623_v14  ;;  %v3698_v14 = vld [vmem:[#allocation7 + $0x290] sm:$0xff] }
 0xb5d   :  { %8736 = vpow2.f32 %v6624_v44  ;;  %v3702_v44 = vld [vmem:[#allocation7 + $0x2b0] sm:$0xff] }
 0xb5e   :  { %8738 = vpow2.f32 %v6625_v17  ;;  %v9935_v58 = vpack.c.bf16 %v3702_v44, %v3698_v14  ;;  %v3705_v17 = vld [vmem:[#allocation7 + $0x2c8] sm:$0xff]  ;;  %v3731_v44 = vld [vmem:[#allocation7 + $0x398] sm:$0xff] }
 0xb5f   :  { %8740 = vtanh.f32 %v3406_v63  ;;  %v3709_v63 = vld [vmem:[#allocation7 + $0x2e8] sm:$0xff] }
 0xb60   :  { %v3733_v14 = vld [vmem:[#allocation7 + $0x3a8] sm:$0xff] }
 0xb66   :  { %v8735_v48 = vpop.eup %8734 }
 0xb67   :  { %v8737_v47 = vpop.eup %8736  ;;  %v3411_v33 = vadd.f32 1.0, %v8735_v48  ;;  %v3707_v48 = vld [vmem:[#allocation7 + $0x2d8] sm:$0xff] }
 0xb68   :  { %v3417_v43 = vadd.f32 1.0, %v8737_v47  ;;  %v8739_v50 = vpop.eup %8738  ;;  %v9940_v47 = vpack.c.bf16 %v3709_v63, %v3705_v17  ;;  %v3735_v17 = vld [vmem:[#allocation7 + $0x3b8] sm:$0xff]  ;;  %v9974_v63 = vpack.c.bf16 %v3733_v14, %v3729_v5 }
 0xb69   :  { %8742 = vrcp.f32 %v3411_v33  ;;  %v8741_v20 = vpop.eup %8740  ;;  %v3424_v42 = vadd.f32 1.0, %v8739_v50  ;;  %v3711_v33 = vld [vmem:[#allocation7 + $0x2f8] sm:$0xff]  ;;  %v3708_v50 = vld [vmem:[#allocation7 + $0x2e0] sm:$0xff] }
 0xb6a   :  { %8744 = vrcp.f32 %v3417_v43  ;;  %v3704_v43 = vld [vmem:[#allocation7 + $0x2c0] sm:$0xff] }
 0xb6b   :  { %8746 = vrcp.f32 %v3424_v42 }
 0xb73   :  { %v8743_v24 = vpop.eup %8742 }
 0xb74   :  { %v8745_v37 = vpop.eup %8744  ;;  %v3428_v10 = vmul.f32 %v8743_v24, %v8741_v20  ;;  %v9942_v20 = vpack.c.bf16 %v3711_v33, %v3707_v48  ;;  %v9944_v24 = vpack.c.bf16 %v3708_v50, %v3704_v43  ;;  %v9976_v48 = vpack.c.bf16 %v3735_v17, %v3731_v44  ;;  %v3728_v33 = vld [vmem:[#allocation7 + $0x380] sm:$0xff]  ;;  %v3730_v50 = vld [vmem:[#allocation7 + $0x390] sm:$0xff] }
 0xb75   :  { %v3427_v51 = vmul.f32 %v8745_v37, %v9851_v57  ;;  %v8747_v45 = vpop.eup %8746  ;;  %v3697_v57 = vld [vmem:[#allocation7 + $0x288] sm:$0xff]  ;;  %v3706_v37 = vld [vmem:[#allocation7 + $0x2d0] sm:$0xff]  ;;  %v3732_v43 = vld [vmem:[#allocation7 + $0x3a0] sm:$0xff] }
 0xb76   :  { %v9928_v9 = vpack.c.bf16 %v3701_v29, %v3697_v57  ;;  %v9966_v57 = vpack.c.bf16 %v3727_v40, %v3723_v23  ;;  %v9968_v29 = vpack.c.bf16 %v3724_v61, %v3720_v8  ;;  %v3742_v23 = vld [vmem:[#allocation7 + $0x3f0] sm:$0xff]  ;;  %v9991_v40 = vpack.c.bf16 %v3740_v46, %v3736_v52 }
 0xb77   :  { %v9895_v54 = vadd.f32 %v3428_v10, %v3427_v51  ;;  %v3710_v10 = vld [vmem:[#allocation7 + $0x2f0] sm:$0xff]  ;;  %v3713_v51 = vld [vmem:[#allocation7 + $0x308] sm:$0xff]  ;;  %v9995_v8 = vpack.c.bf16 %v3742_v23, %v3738_v27 }
 0xb78   :  { %v9947_v42 = vpack.c.bf16 %v3710_v10, %v3706_v37  ;;  %v9979_v37 = vpack.c.bf16 %v3732_v43, %v3728_v33  ;;  %v3734_v10 = vld [vmem:[#allocation7 + $0x3b0] sm:$0xff] }
 0xb79   :  { %8748 = vtanh.f32 %v9895_v54 }
 0xb83   :  { %v8749_v16 = vpop.eup %8748 }
 0xb84   :  { %v9898_v18 = vmul.f32 %v8749_v16, %v8747_v45  ;;  %v3717_v45 = vld [vmem:[#allocation7 + $0x328] sm:$0xff]  ;;  %v3715_v16 = vld [vmem:[#allocation7 + $0x318] sm:$0xff] }
 0xb85   :  { %v9952_v59 = vpack.c.bf16 %v3717_v45, %v3713_v51  ;;  %v9954_v25 = vpack.c.bf16 %v3719_v22, %v3715_v16  ;;  %v3737_v51 = vld [vmem:[#allocation7 + $0x3c8] sm:$0xff]  ;;  %v9983_v16 = vpack.c.bf16 %v3734_v10, %v3730_v50 }
 0xb86   :  { %3566 = vmatmul.mubr.f32.vlgmr.msra.gmra.mrb[22].mxu0 %v9898_v18  ;;  %3637 = vmatmul.mubr.f32.vlgmr.msra.gmra.mrb[22].mxu1 %v9898_v18  ;;  %v3741_v45 = vld [vmem:[#allocation7 + $0x3e8] sm:$0xff] }
 0xb87   :  { %3808 = vmatprep.mubr.f32.mxu0 %v9010_v1  ;;  %3879 = vmatprep.mubr.f32.mxu1 %v9010_v1  ;;  %v9985_v22 = vpack.c.bf16 %v3741_v45, %v3737_v51 }
 0xb88   :  { %7618 = vmatpush1.bf16.msra.mxu0 %v9908_v19  ;;  %7650 = vmatpush1.bf16.msra.mxu1 %v9911_v11 }
 0xb89   :  { %7620 = vmatprep.subr.bf16.mxu0 %v9916_v2  ;;  %7652 = vmatprep.subr.bf16.mxu1 %v9918_v53 }
 0xb8c   :  { %7622 = vmatpush1.bf16.msra.mxu0 %v9920_v60  ;;  %7654 = vmatpush1.bf16.msra.mxu1 %v9923_v34 }
 0xb8d   :  { %7624 = vmatprep.subr.bf16.mxu0 %v9928_v9  ;;  %7656 = vmatprep.subr.bf16.mxu1 %v9930_v12 }
 0xb90   :  { %7626 = vmatpush1.bf16.msra.mxu0 %v9932_v21  ;;  %7658 = vmatpush1.bf16.msra.mxu1 %v9935_v58 }
 0xb91   :  { %7628 = vmatprep.subr.bf16.mxu0 %v9940_v47  ;;  %7660 = vmatprep.subr.bf16.mxu1 %v9942_v20 }
 0xb94   :  { %7630 = vmatpush1.bf16.msra.mxu0 %v9944_v24  ;;  %7662 = vmatpush1.bf16.msra.mxu1 %v9947_v42 }
 0xb95   :  { %7632 = vmatprep.subr.bf16.mxu0 %v9952_v59  ;;  %7664 = vmatprep.subr.bf16.mxu1 %v9954_v25 }
 0xb98   :  { %7634 = vmatpush1.bf16.msra.mxu0 %v9956_v4  ;;  %7666 = vmatpush1.bf16.msra.mxu1 %v9959_v38 }
 0xb99   :  { %7636 = vmatprep.subr.bf16.mxu0 %v9963_v28  ;;  %7668 = vmatprep.subr.bf16.mxu1 %v9966_v57 }
 0xb9c   :  { %7638 = vmatpush1.bf16.msra.mxu0 %v9968_v29  ;;  %7670 = vmatpush1.bf16.msra.mxu1 %v9971_v15 }
 0xb9d   :  { %7640 = vmatprep.subr.bf16.mxu0 %v9974_v63  ;;  %7672 = vmatprep.subr.bf16.mxu1 %v9976_v48 }
 0xba0   :  { %7642 = vmatpush1.bf16.msra.mxu0 %v9979_v37  ;;  %7674 = vmatpush1.bf16.msra.mxu1 %v9983_v16 }
 0xba1   :  { %7644 = vmatprep.subr.bf16.mxu0 %v9985_v22  ;;  %7676 = vmatprep.subr.bf16.mxu1 %v9988_v36 }
 0xba4   :  { %7646 = vmatpush1.bf16.msra.mxu0 %v9991_v40  ;;  %7678 = vmatpush1.bf16.msra.mxu1 %v9995_v8 }
 0xba5   :  { %7680 = vmatprep.subr.bf16.mxu0 %v9904_v0  ;;  %7712 = vmatprep.subr.bf16.mxu1 %v9906_v30 }
 0xc59   :  { %v3567_v61 = vpop.f32.mrb[22].mxu0  ;;  %v3638_v26 = vpop.f32.mrb[22].mxu1 }
 0xc5a   :  { %v3647_v6 = vadd.f32 %v3567_v61, %v9790_v41  ;;  %v3569_v5 = vpop.f32.mrb[23].mxu0  ;;  %v3640_v14 = vpop.f32.mrb[23].mxu1  ;;  %v3649_v10 = vadd.f32 %v3638_v26, %v9802_v49 }
 0xc5b   :  { %v3648_v44 = vadd.f32 %v3569_v5, %v9793_v55  ;;  %v3650_v43 = vadd.f32 %v3640_v14, %v9798_v7 }
 0xc5c   :  { %v6626_v17 = vmul.f32 -1.442695, %v3647_v6 }
 0xc5d   :  { %v6627_v33 = vmul.f32 -1.442695, %v3648_v44  ;;  %v6628_v50 = vmul.f32 -1.442695, %v3650_v43 }
 0xc5e   :  { %8750 = vpow2.f32 %v6626_v17 }
 0xc5f   :  { %8752 = vpow2.f32 %v6627_v33 }
 0xc60   :  { %8754 = vpow2.f32 %v6628_v50 }
 0xc61   :  { %8756 = vtanh.f32 %v3649_v10 }
 0xc68   :  { %v8751_v51 = vpop.eup %8750 }
 0xc69   :  { %v8753_v45 = vpop.eup %8752  ;;  %v3654_v13 = vadd.f32 1.0, %v8751_v51 }
 0xc6a   :  { %v3660_v3 = vadd.f32 1.0, %v8753_v45  ;;  %v8755_v52 = vpop.eup %8754 }
 0xc6b   :  { %8758 = vrcp.f32 %v3654_v13  ;;  %v8757_v46 = vpop.eup %8756  ;;  %v3667_v6 = vadd.f32 1.0, %v8755_v52 }
 0xc6c   :  { %8760 = vrcp.f32 %v3660_v3 }
 0xc6d   :  { %8762 = vrcp.f32 %v3667_v6 }
 0xc75   :  { %v8759_v27 = vpop.eup %8758 }
 0xc76   :  { %v8761_v23 = vpop.eup %8760  ;;  %v3671_v61 = vmul.f32 %v8759_v27, %v8757_v46 }
 0xc77   :  { %v3670_v5 = vmul.f32 %v8761_v23, %v9895_v54  ;;  %v8763_v26 = vpop.eup %8762 }
 0xc79   :  { %v10007_v14 = vadd.f32 %v3671_v61, %v3670_v5 }
 0xc7b   :  { %8764 = vtanh.f32 %v10007_v14 }
 0xc85   :  { %v8765_v44 = vpop.eup %8764 }
 0xc86   :  { %v10010_v17 = vmul.f32 %v8765_v44, %v8763_v26 }
 0xc88   :  { %3809 = vmatmul.mubr.f32.vlgmr.msra.gmra.mrb[24].mxu0 %v10010_v17  ;;  %3880 = vmatmul.mubr.f32.vlgmr.msra.gmra.mrb[24].mxu1 %v10010_v17 }
 0xc89   :  { %7682 = vmatpush1.bf16.msra.mxu0 %v9908_v19  ;;  %7714 = vmatpush1.bf16.msra.mxu1 %v9911_v11 }
 0xc8a   :  { %7684 = vmatprep.subr.bf16.mxu0 %v9916_v2  ;;  %7716 = vmatprep.subr.bf16.mxu1 %v9918_v53 }
 0xc8b   :  { %4051 = vmatprep.mubr.f32.mxu0 %v9010_v1  ;;  %4122 = vmatprep.mubr.f32.mxu1 %v9010_v1 }
 0xc8d   :  { %7686 = vmatpush1.bf16.msra.mxu0 %v9920_v60  ;;  %7718 = vmatpush1.bf16.msra.mxu1 %v9923_v34 }
 0xc8e   :  { %7688 = vmatprep.subr.bf16.mxu0 %v9928_v9  ;;  %7720 = vmatprep.subr.bf16.mxu1 %v9930_v12 }
 0xc91   :  { %7690 = vmatpush1.bf16.msra.mxu0 %v9932_v21  ;;  %7722 = vmatpush1.bf16.msra.mxu1 %v9935_v58 }
 0xc92   :  { %7692 = vmatprep.subr.bf16.mxu0 %v9940_v47  ;;  %7724 = vmatprep.subr.bf16.mxu1 %v9942_v20 }
 0xc95   :  { %7694 = vmatpush1.bf16.msra.mxu0 %v9944_v24  ;;  %7726 = vmatpush1.bf16.msra.mxu1 %v9947_v42 }
 0xc96   :  { %7696 = vmatprep.subr.bf16.mxu0 %v9952_v59  ;;  %7728 = vmatprep.subr.bf16.mxu1 %v9954_v25 }
 0xc99   :  { %7698 = vmatpush1.bf16.msra.mxu0 %v9956_v4  ;;  %7730 = vmatpush1.bf16.msra.mxu1 %v9959_v38 }
 0xc9a   :  { %7700 = vmatprep.subr.bf16.mxu0 %v9963_v28  ;;  %7732 = vmatprep.subr.bf16.mxu1 %v9966_v57 }
 0xc9d   :  { %7702 = vmatpush1.bf16.msra.mxu0 %v9968_v29  ;;  %7734 = vmatpush1.bf16.msra.mxu1 %v9971_v15 }
 0xc9e   :  { %7704 = vmatprep.subr.bf16.mxu0 %v9974_v63  ;;  %7736 = vmatprep.subr.bf16.mxu1 %v9976_v48 }
 0xca1   :  { %7706 = vmatpush1.bf16.msra.mxu0 %v9979_v37  ;;  %7738 = vmatpush1.bf16.msra.mxu1 %v9983_v16 }
 0xca2   :  { %7708 = vmatprep.subr.bf16.mxu0 %v9985_v22  ;;  %7740 = vmatprep.subr.bf16.mxu1 %v9988_v36 }
 0xca5   :  { %7710 = vmatpush1.bf16.msra.mxu0 %v9991_v40  ;;  %7742 = vmatpush1.bf16.msra.mxu1 %v9995_v8 }
 0xca6   :  { %7744 = vmatprep.subr.bf16.mxu0 %v9904_v0  ;;  %7776 = vmatprep.subr.bf16.mxu1 %v9906_v30 }
 0xd5b   :  { %v3810_v54 = vpop.f32.mrb[24].mxu0  ;;  %v3881_v33 = vpop.f32.mrb[24].mxu1 }
 0xd5c   :  { %v3890_v43 = vadd.f32 %v3810_v54, %v9790_v41  ;;  %v3812_v50 = vpop.f32.mrb[25].mxu0  ;;  %v3883_v10 = vpop.f32.mrb[25].mxu1  ;;  %v3892_v46 = vadd.f32 %v3881_v33, %v9802_v49 }
 0xd5d   :  { %v3891_v51 = vadd.f32 %v3812_v50, %v9793_v55  ;;  %v3893_v3 = vadd.f32 %v3883_v10, %v9798_v7 }
 0xd5e   :  { %v6629_v45 = vmul.f32 -1.442695, %v3890_v43 }
 0xd5f   :  { %v6630_v13 = vmul.f32 -1.442695, %v3891_v51  ;;  %v6631_v52 = vmul.f32 -1.442695, %v3893_v3 }
 0xd60   :  { %8766 = vpow2.f32 %v6629_v45 }
 0xd61   :  { %8768 = vpow2.f32 %v6630_v13 }
 0xd62   :  { %8770 = vpow2.f32 %v6631_v52 }
 0xd63   :  { %8772 = vtanh.f32 %v3892_v46 }
 0xd6a   :  { %v8767_v27 = vpop.eup %8766 }
 0xd6b   :  { %v8769_v23 = vpop.eup %8768  ;;  %v3897_v61 = vadd.f32 1.0, %v8767_v27 }
 0xd6c   :  { %v3903_v6 = vadd.f32 1.0, %v8769_v23  ;;  %v8771_v5 = vpop.eup %8770 }
 0xd6d   :  { %8774 = vrcp.f32 %v3897_v61  ;;  %v8773_v26 = vpop.eup %8772  ;;  %v3910_v50 = vadd.f32 1.0, %v8771_v5 }
 0xd6e   :  { %8776 = vrcp.f32 %v3903_v6 }
 0xd6f   :  { %8778 = vrcp.f32 %v3910_v50 }
 0xd77   :  { %v8775_v44 = vpop.eup %8774 }
 0xd78   :  { %v8777_v54 = vpop.eup %8776  ;;  %v3914_v43 = vmul.f32 %v8775_v44, %v8773_v26 }
 0xd79   :  { %v3913_v51 = vmul.f32 %v8777_v54, %v10007_v14  ;;  %v8779_v33 = vpop.eup %8778 }
 0xd7b   :  { %v10053_v10 = vadd.f32 %v3914_v43, %v3913_v51 }
 0xd7d   :  { %8780 = vtanh.f32 %v10053_v10 }
 0xd87   :  { %v8781_v45 = vpop.eup %8780 }
 0xd88   :  { %v10056_v13 = vmul.f32 %v8781_v45, %v8779_v33 }
 0xd8a   :  { %4052 = vmatmul.mubr.f32.vlgmr.msra.gmra.mrb[26].mxu0 %v10056_v13  ;;  %4123 = vmatmul.mubr.f32.vlgmr.msra.gmra.mrb[26].mxu1 %v10056_v13 }
 0xd8b   :  { %7746 = vmatpush1.bf16.msra.mxu0 %v9908_v19  ;;  %7778 = vmatpush1.bf16.msra.mxu1 %v9911_v11 }
 0xd8c   :  { %7748 = vmatprep.subr.bf16.mxu0 %v9916_v2  ;;  %7780 = vmatprep.subr.bf16.mxu1 %v9918_v53 }
 0xd8d   :  { %4294 = vmatprep.mubr.f32.mxu0 %v9010_v1  ;;  %4365 = vmatprep.mubr.f32.mxu1 %v9010_v1 }
 0xd8f   :  { %7750 = vmatpush1.bf16.msra.mxu0 %v9920_v60  ;;  %7782 = vmatpush1.bf16.msra.mxu1 %v9923_v34 }
 0xd90   :  { %7752 = vmatprep.subr.bf16.mxu0 %v9928_v9  ;;  %7784 = vmatprep.subr.bf16.mxu1 %v9930_v12 }
 0xd93   :  { %7754 = vmatpush1.bf16.msra.mxu0 %v9932_v21  ;;  %7786 = vmatpush1.bf16.msra.mxu1 %v9935_v58 }
 0xd94   :  { %7756 = vmatprep.subr.bf16.mxu0 %v9940_v47  ;;  %7788 = vmatprep.subr.bf16.mxu1 %v9942_v20 }
 0xd97   :  { %7758 = vmatpush1.bf16.msra.mxu0 %v9944_v24  ;;  %7790 = vmatpush1.bf16.msra.mxu1 %v9947_v42 }
 0xd98   :  { %7760 = vmatprep.subr.bf16.mxu0 %v9952_v59  ;;  %7792 = vmatprep.subr.bf16.mxu1 %v9954_v25 }
 0xd9b   :  { %7762 = vmatpush1.bf16.msra.mxu0 %v9956_v4  ;;  %7794 = vmatpush1.bf16.msra.mxu1 %v9959_v38 }
 0xd9c   :  { %7764 = vmatprep.subr.bf16.mxu0 %v9963_v28  ;;  %7796 = vmatprep.subr.bf16.mxu1 %v9966_v57 }
 0xd9f   :  { %7766 = vmatpush1.bf16.msra.mxu0 %v9968_v29  ;;  %7798 = vmatpush1.bf16.msra.mxu1 %v9971_v15 }
 0xda0   :  { %7768 = vmatprep.subr.bf16.mxu0 %v9974_v63  ;;  %7800 = vmatprep.subr.bf16.mxu1 %v9976_v48 }
 0xda3   :  { %7770 = vmatpush1.bf16.msra.mxu0 %v9979_v37  ;;  %7802 = vmatpush1.bf16.msra.mxu1 %v9983_v16 }
 0xda4   :  { %7772 = vmatprep.subr.bf16.mxu0 %v9985_v22  ;;  %7804 = vmatprep.subr.bf16.mxu1 %v9988_v36 }
 0xda7   :  { %7774 = vmatpush1.bf16.msra.mxu0 %v9991_v40  ;;  %7806 = vmatpush1.bf16.msra.mxu1 %v9995_v8 }
 0xda8   :  { %7808 = vmatprep.subr.bf16.mxu0 %v9904_v0  ;;  %7840 = vmatprep.subr.bf16.mxu1 %v9906_v30 }
 0xe5d   :  { %v4053_v14 = vpop.f32.mrb[26].mxu0  ;;  %v4124_v3 = vpop.f32.mrb[26].mxu1 }
 0xe5e   :  { %v4133_v52 = vadd.f32 %v4053_v14, %v9790_v41  ;;  %v4055_v46 = vpop.f32.mrb[27].mxu0  ;;  %v4126_v27 = vpop.f32.mrb[27].mxu1  ;;  %v4135_v44 = vadd.f32 %v4124_v3, %v9802_v49 }
 0xe5f   :  { %v4134_v23 = vadd.f32 %v4055_v46, %v9793_v55  ;;  %v4136_v5 = vadd.f32 %v4126_v27, %v9798_v7 }
 0xe60   :  { %v6632_v61 = vmul.f32 -1.442695, %v4133_v52 }
 0xe61   :  { %v6633_v6 = vmul.f32 -1.442695, %v4134_v23  ;;  %v6634_v26 = vmul.f32 -1.442695, %v4136_v5  ;;  %v4663_v5 = vld [vmem:[#allocation5 + $0x430] sm:$0xff] }
 0xe62   :  { %8782 = vpow2.f32 %v6632_v61 }
 0xe63   :  { %8784 = vpow2.f32 %v6633_v6  ;;  %v4659_v6 = vld [vmem:[#allocation5 + $0x410] sm:$0xff] }
 0xe64   :  { %8786 = vpow2.f32 %v6634_v26  ;;  %v4666_v26 = vld [vmem:[#allocation5 + $0x448] sm:$0xff] }
 0xe65   :  { %8788 = vtanh.f32 %v4135_v44  ;;  %v4670_v44 = vld [vmem:[#allocation5 + $0x468] sm:$0xff] }
 0xe6c   :  { %v8783_v0 = vpop.eup %8782 }
 0xe6d   :  { %v8785_v54 = vpop.eup %8784  ;;  %v4140_v30 = vadd.f32 1.0, %v8783_v0  ;;  %v4668_v0 = vld [vmem:[#allocation5 + $0x458] sm:$0xff] }
 0xe6e   :  { %v4146_v43 = vadd.f32 1.0, %v8785_v54  ;;  %v8787_v50 = vpop.eup %8786  ;;  %v4672_v54 = vld [vmem:[#allocation5 + $0x478] sm:$0xff] }
 0xe6f   :  { %8790 = vrcp.f32 %v4140_v30  ;;  %v8789_v51 = vpop.eup %8788  ;;  %v4153_v52 = vadd.f32 1.0, %v8787_v50 }
 0xe70   :  { %8792 = vrcp.f32 %v4146_v43 }
 0xe71   :  { %8794 = vrcp.f32 %v4153_v52  ;;  %v7875_v52 = vpack.c.bf16 %v4670_v44, %v4666_v26  ;;  %v4691_v44 = vld [vmem:[#allocation5 + $0x510] sm:$0xff] }
 0xe79   :  { %v8791_v33 = vpop.eup %8790 }
 0xe7a   :  { %v8793_v45 = vpop.eup %8792  ;;  %v4157_v14 = vmul.f32 %v8791_v33, %v8789_v51  ;;  %v7905_v51 = vpack.c.bf16 %v4663_v5, %v4659_v6  ;;  %v4665_v33 = vld [vmem:[#allocation5 + $0x440] sm:$0xff] }
 0xe7b   :  { %v4156_v46 = vmul.f32 %v8793_v45, %v10053_v10  ;;  %v8795_v3 = vpop.eup %8794  ;;  %v4661_v10 = vld [vmem:[#allocation5 + $0x420] sm:$0xff] }
 0xe7c   :  { %v4669_v45 = vld [vmem:[#allocation5 + $0x460] sm:$0xff] }
 0xe7d   :  { %v10099_v27 = vadd.f32 %v4157_v14, %v4156_v46  ;;  %v7907_v46 = vpack.c.bf16 %v4672_v54, %v4668_v0  ;;  %v4693_v6 = vld [vmem:[#allocation5 + $0x520] sm:$0xff]  ;;  %v4695_v0 = vld [vmem:[#allocation5 + $0x530] sm:$0xff]  ;;  %v4698_v54 = vld [vmem:[#allocation5 + $0x548] sm:$0xff] }
 0xe7f   :  { %8796 = vtanh.f32 %v10099_v27 }
 0xe89   :  { %v8797_v23 = vpop.eup %8796 }
 0xe8a   :  { %v10102_v61 = vmul.f32 %v8797_v23, %v8795_v3  ;;  %v4671_v3 = vld [vmem:[#allocation5 + $0x470] sm:$0xff]  ;;  %v4674_v23 = vld [vmem:[#allocation5 + $0x488] sm:$0xff] }
 0xe8c   :  { %4295 = vmatmul.mubr.f32.vlgmr.msra.gmra.mrb[28].mxu0 %v10102_v61  ;;  %4366 = vmatmul.mubr.f32.vlgmr.msra.gmra.mrb[28].mxu1 %v10102_v61 }
 0xe8d   :  { %7810 = vmatpush1.bf16.msra.mxu0 %v9908_v19  ;;  %7842 = vmatpush1.bf16.msra.mxu1 %v9911_v11  ;;  %v4658_v19 = vld [vmem:[#allocation5 + $0x408] sm:$0xff] }
 0xe8e   :  { %7812 = vmatprep.subr.bf16.mxu0 %v9916_v2  ;;  %7844 = vmatprep.subr.bf16.mxu1 %v9918_v53  ;;  %v4662_v11 = vld [vmem:[#allocation5 + $0x428] sm:$0xff]  ;;  %v4660_v2 = vld [vmem:[#allocation5 + $0x418] sm:$0xff] }
 0xe8f   :  { %4537 = vmatprep.mubr.f32.mxu0 %v9010_v1  ;;  %4608 = vmatprep.mubr.f32.mxu1 %v9010_v1  ;;  %v7871_v53 = vpack.c.bf16 %v4662_v11, %v4658_v19  ;;  %v4678_v19 = vld [vmem:[#allocation5 + $0x4a8] sm:$0xff]  ;;  %v4676_v11 = vld [vmem:[#allocation5 + $0x498] sm:$0xff] }
 0xe91   :  { %7814 = vmatpush1.bf16.msra.mxu0 %v9920_v60  ;;  %7846 = vmatpush1.bf16.msra.mxu1 %v9923_v34  ;;  %v4664_v60 = vld [vmem:[#allocation5 + $0x438] sm:$0xff] }
 0xe92   :  { %7816 = vmatprep.subr.bf16.mxu0 %v9928_v9  ;;  %7848 = vmatprep.subr.bf16.mxu1 %v9930_v12  ;;  %v7903_v34 = vpack.c.bf16 %v4664_v60, %v4660_v2  ;;  %v4680_v2 = vld [vmem:[#allocation5 + $0x4b8] sm:$0xff] }
 0xe95   :  { %7818 = vmatpush1.bf16.msra.mxu0 %v9932_v21  ;;  %7850 = vmatpush1.bf16.msra.mxu1 %v9935_v58 }
 0xe96   :  { %7820 = vmatprep.subr.bf16.mxu0 %v9940_v47  ;;  %7852 = vmatprep.subr.bf16.mxu1 %v9942_v20 }
 0xe99   :  { %7822 = vmatpush1.bf16.msra.mxu0 %v9944_v24  ;;  %7854 = vmatpush1.bf16.msra.mxu1 %v9947_v42 }
 0xe9a   :  { %7824 = vmatprep.subr.bf16.mxu0 %v9952_v59  ;;  %7856 = vmatprep.subr.bf16.mxu1 %v9954_v25 }
 0xe9d   :  { %7826 = vmatpush1.bf16.msra.mxu0 %v9956_v4  ;;  %7858 = vmatpush1.bf16.msra.mxu1 %v9959_v38 }
 0xe9e   :  { %7828 = vmatprep.subr.bf16.mxu0 %v9963_v28  ;;  %7860 = vmatprep.subr.bf16.mxu1 %v9966_v57 }
 0xea1   :  { %7830 = vmatpush1.bf16.msra.mxu0 %v9968_v29  ;;  %7862 = vmatpush1.bf16.msra.mxu1 %v9971_v15 }
 0xea2   :  { %7832 = vmatprep.subr.bf16.mxu0 %v9974_v63  ;;  %7864 = vmatprep.subr.bf16.mxu1 %v9976_v48 }
 0xea5   :  { %7834 = vmatpush1.bf16.msra.mxu0 %v9979_v37  ;;  %7866 = vmatpush1.bf16.msra.mxu1 %v9983_v16 }
 0xea6   :  { %7836 = vmatprep.subr.bf16.mxu0 %v9985_v22  ;;  %7868 = vmatprep.subr.bf16.mxu1 %v9988_v36 }
 0xea9   :  { %7838 = vmatpush1.bf16.msra.mxu0 %v9991_v40  ;;  %7870 = vmatpush1.bf16.msra.mxu1 %v9995_v8  ;;  %v4657_v8 = vld [vmem:[#allocation5 + $0x400] sm:$0xff] }
 0xeaa   :  { %7872 = vmatprep.subr.bf16.mxu0 %v7871_v53  ;;  %7904 = vmatprep.subr.bf16.mxu1 %v7903_v34  ;;  %v7873_v50 = vpack.c.bf16 %v4661_v10, %v4657_v8  ;;  %v7877_v53 = vpack.c.bf16 %v4669_v45, %v4665_v33  ;;  %v4673_v34 = vld [vmem:[#allocation5 + $0x480] sm:$0xff]  ;;  %v7921_v33 = vpack.c.bf16 %v4695_v0, %v4691_v44  ;;  %v5018_v44 = vld [vmem:[#allocation7 + $0x458] sm:$0xff] }
 0xeab   :  { %v4689_v10 = vld [vmem:[#allocation5 + $0x500] sm:$0xff] }
 0xeac   :  { %v4697_v45 = vld [vmem:[#allocation5 + $0x540] sm:$0xff] }
 0xf5f   :  { %v4296_v9 = vpop.f32.mrb[28].mxu0  ;;  %v4367_v12 = vpop.f32.mrb[28].mxu1 }
 0xf60   :  { %v4376_v21 = vadd.f32 %v4296_v9, %v9790_v41  ;;  %v4298_v58 = vpop.f32.mrb[29].mxu0  ;;  %v4369_v47 = vpop.f32.mrb[29].mxu1  ;;  %v4378_v4 = vadd.f32 %v4367_v12, %v9802_v49  ;;  %v4677_v9 = vld [vmem:[#allocation5 + $0x4a0] sm:$0xff]  ;;  %v7879_v12 = vpack.c.bf16 %v4678_v19, %v4674_v23  ;;  %v4703_v23 = vld [vmem:[#allocation5 + $0x570] sm:$0xff]  ;;  %v4706_v19 = vld [vmem:[#allocation5 + $0x588] sm:$0xff] }
 0xf61   :  { %v4377_v20 = vadd.f32 %v4298_v58, %v9793_v55  ;;  %v4379_v59 = vadd.f32 %v4369_v47, %v9798_v7  ;;  %v4675_v58 = vld [vmem:[#allocation5 + $0x490] sm:$0xff] }
 0xf62   :  { %v6635_v24 = vmul.f32 -1.442695, %v4376_v21  ;;  %v7911_v21 = vpack.c.bf16 %v4680_v2, %v4676_v11  ;;  %v4679_v47 = vld [vmem:[#allocation5 + $0x4b0] sm:$0xff]  ;;  %v4710_v11 = vld [vmem:[#allocation5 + $0x5a8] sm:$0xff]  ;;  %v4708_v2 = vld [vmem:[#allocation5 + $0x598] sm:$0xff] }
 0xf63   :  { %v6636_v42 = vmul.f32 -1.442695, %v4377_v20  ;;  %v6637_v25 = vmul.f32 -1.442695, %v4379_v59  ;;  %v4682_v20 = vld [vmem:[#allocation5 + $0x4c8] sm:$0xff]  ;;  %v4688_v59 = vld [vmem:[#allocation5 + $0x4f8] sm:$0xff] }
 0xf64   :  { %8798 = vpow2.f32 %v6635_v24  ;;  %v4686_v24 = vld [vmem:[#allocation5 + $0x4e8] sm:$0xff] }
 0xf65   :  { %8800 = vpow2.f32 %v6636_v42  ;;  %v4684_v42 = vld [vmem:[#allocation5 + $0x4d8] sm:$0xff] }
 0xf66   :  { %8802 = vpow2.f32 %v6637_v25  ;;  %v7881_v25 = vpack.c.bf16 %v4677_v9, %v4673_v34  ;;  %v4705_v9 = vld [vmem:[#allocation5 + $0x580] sm:$0xff] }
 0xf67   :  { %8804 = vtanh.f32 %v4378_v4  ;;  %v7913_v4 = vpack.c.bf16 %v4679_v47, %v4675_v58  ;;  %v4707_v47 = vld [vmem:[#allocation5 + $0x590] sm:$0xff] }
 0xf6e   :  { %v8799_v38 = vpop.eup %8798 }
 0xf6f   :  { %v8801_v28 = vpop.eup %8800  ;;  %v4383_v57 = vadd.f32 1.0, %v8799_v38  ;;  %v4681_v38 = vld [vmem:[#allocation5 + $0x4c0] sm:$0xff] }
 0xf70   :  { %v4389_v29 = vadd.f32 1.0, %v8801_v28  ;;  %v8803_v15 = vpop.eup %8802  ;;  %v4685_v28 = vld [vmem:[#allocation5 + $0x4e0] sm:$0xff] }
 0xf71   :  { %8806 = vrcp.f32 %v4383_v57  ;;  %v8805_v63 = vpop.eup %8804  ;;  %v4396_v22 = vadd.f32 1.0, %v8803_v15  ;;  %v7883_v57 = vpack.c.bf16 %v4686_v24, %v4682_v20  ;;  %v4683_v15 = vld [vmem:[#allocation5 + $0x4d0] sm:$0xff]  ;;  %v4714_v24 = vld [vmem:[#allocation5 + $0x5c8] sm:$0xff] }
 0xf72   :  { %8808 = vrcp.f32 %v4389_v29  ;;  %v7915_v29 = vpack.c.bf16 %v4688_v59, %v4684_v42  ;;  %v4711_v20 = vld [vmem:[#allocation5 + $0x5b0] sm:$0xff]  ;;  %v4718_v42 = vld [vmem:[#allocation5 + $0x5e8] sm:$0xff]  ;;  %v4716_v59 = vld [vmem:[#allocation5 + $0x5d8] sm:$0xff] }
 0xf73   :  { %8810 = vrcp.f32 %v4396_v22  ;;  %v4696_v22 = vld [vmem:[#allocation5 + $0x538] sm:$0xff] }
 0xf7b   :  { %v8807_v48 = vpop.eup %8806 }
 0xf7c   :  { %v8809_v37 = vpop.eup %8808  ;;  %v4400_v16 = vmul.f32 %v8807_v48, %v8805_v63  ;;  %v4687_v63 = vld [vmem:[#allocation5 + $0x4f0] sm:$0xff]  ;;  %v4690_v48 = vld [vmem:[#allocation5 + $0x508] sm:$0xff] }
 0xf7d   :  { %v4399_v36 = vmul.f32 %v8809_v37, %v10099_v27  ;;  %v8811_v30 = vpop.eup %8810  ;;  %v4667_v27 = vld [vmem:[#allocation5 + $0x450] sm:$0xff]  ;;  %v4694_v37 = vld [vmem:[#allocation5 + $0x528] sm:$0xff]  ;;  %v7917_v8 = vpack.c.bf16 %v4687_v63, %v4683_v15  ;;  %v4717_v15 = vld [vmem:[#allocation5 + $0x5e0] sm:$0xff] }
 0xf7e   :  { %v7909_v60 = vpack.c.bf16 %v4671_v3, %v4667_v27  ;;  %v7887_v5 = vpack.c.bf16 %v4694_v37, %v4690_v48  ;;  %v4699_v3 = vld [vmem:[#allocation5 + $0x550] sm:$0xff] }
 0xf7f   :  { %v10143_v40 = vadd.f32 %v4400_v16, %v4399_v36  ;;  %v4692_v16 = vld [vmem:[#allocation5 + $0x518] sm:$0xff]  ;;  %v7885_v36 = vpack.c.bf16 %v4685_v28, %v4681_v38  ;;  %v7925_v34 = vpack.c.bf16 %v4703_v23, %v4699_v3  ;;  %v7929_v38 = vpack.c.bf16 %v4711_v20, %v4707_v47  ;;  %v4713_v28 = vld [vmem:[#allocation5 + $0x5c0] sm:$0xff]  ;;  %v4715_v63 = vld [vmem:[#allocation5 + $0x5d0] sm:$0xff] }
 0xf80   :  { %v7919_v26 = vpack.c.bf16 %v4696_v22, %v4692_v16  ;;  %v4719_v48 = vld [vmem:[#allocation5 + $0x5f0] sm:$0xff]  ;;  %v7901_v37 = vpack.c.bf16 %v4717_v15, %v4713_v28  ;;  %v5007_v22 = vld [vmem:[#allocation7 + $0x400] sm:$0xff]  ;;  %v5026_v3 = vld [vmem:[#allocation7 + $0x498] sm:$0xff] }
 0xf81   :  { %8812 = vtanh.f32 %v10143_v40  ;;  %v7933_v16 = vpack.c.bf16 %v4719_v48, %v4715_v63  ;;  %v5034_v47 = vld [vmem:[#allocation7 + $0x4d8] sm:$0xff]  ;;  %v5037_v28 = vld [vmem:[#allocation7 + $0x4f0] sm:$0xff]  ;;  %v5044_v15 = vld [vmem:[#allocation7 + $0x528] sm:$0xff] }
 0xf82   :  { %v5042_v63 = vld [vmem:[#allocation7 + $0x518] sm:$0xff] }
 0xf83   :  { %v5046_v48 = vld [vmem:[#allocation7 + $0x538] sm:$0xff] }
 0xf8b   :  { %v8813_v43 = vpop.eup %8812 }
 0xf8c   :  { %v10146_v14 = vmul.f32 %v8813_v43, %v8811_v30  ;;  %v4702_v30 = vld [vmem:[#allocation5 + $0x568] sm:$0xff]  ;;  %v4700_v43 = vld [vmem:[#allocation5 + $0x558] sm:$0xff] }
 0xf8e   :  { %4538 = vmatmul.mubr.f32.vlgmr.msra.gmra.mrb[30].mxu0 %v10146_v14  ;;  %4609 = vmatmul.mubr.f32.vlgmr.msra.gmra.mrb[30].mxu1 %v10146_v14 }
 0xf8f   :  { %7874 = vmatpush1.bf16.msra.mxu0 %v7873_v50  ;;  %7906 = vmatpush1.bf16.msra.mxu1 %v7905_v51  ;;  %v4704_v50 = vld [vmem:[#allocation5 + $0x578] sm:$0xff]  ;;  %v7889_v51 = vpack.c.bf16 %v4693_v6, %v4689_v10  ;;  %v5009_v10 = vld [vmem:[#allocation7 + $0x410] sm:$0xff] }
 0xf90   :  { %7876 = vmatprep.subr.bf16.mxu0 %v7875_v52  ;;  %7908 = vmatprep.subr.bf16.mxu1 %v7907_v46  ;;  %v4701_v52 = vld [vmem:[#allocation5 + $0x560] sm:$0xff]  ;;  %v7891_v46 = vpack.c.bf16 %v4702_v30, %v4698_v54  ;;  %v7923_v27 = vpack.c.bf16 %v4704_v50, %v4700_v43  ;;  %v5013_v6 = vld [vmem:[#allocation7 + $0x430] sm:$0xff]  ;;  %v5022_v54 = vld [vmem:[#allocation7 + $0x478] sm:$0xff] }
 0xf91   :  { %4785 = vmatprep.mubr.f32.mxu0 %v9010_v1  ;;  %4898 = vmatprep.mubr.f32.mxu1 %v9010_v1  ;;  %v5015_v30 = vld [vmem:[#allocation7 + $0x440] sm:$0xff]  ;;  %v10194_v50 = vpack.c.bf16 %v5022_v54, %v5018_v44  ;;  %v5054_v44 = vld [vmem:[#allocation7 + $0x578] sm:$0xff] }
 0xf92   :  { %v5019_v43 = vld [vmem:[#allocation7 + $0x460] sm:$0xff] }
 0xf93   :  { %7878 = vmatpush1.bf16.msra.mxu0 %v7877_v53  ;;  %7910 = vmatpush1.bf16.msra.mxu1 %v7909_v60  ;;  %v4712_v53 = vld [vmem:[#allocation5 + $0x5b8] sm:$0xff]  ;;  %v7893_v60 = vpack.c.bf16 %v4701_v52, %v4697_v45  ;;  %v5021_v45 = vld [vmem:[#allocation7 + $0x470] sm:$0xff]  ;;  %v5047_v54 = vld [vmem:[#allocation7 + $0x540] sm:$0xff] }
 0xf94   :  { %7880 = vmatprep.subr.bf16.mxu0 %v7879_v12  ;;  %7912 = vmatprep.subr.bf16.mxu1 %v7911_v21  ;;  %v4709_v12 = vld [vmem:[#allocation5 + $0x5a0] sm:$0xff]  ;;  %v7895_v21 = vpack.c.bf16 %v4710_v11, %v4706_v19  ;;  %v7927_v58 = vpack.c.bf16 %v4712_v53, %v4708_v2  ;;  %v5030_v19 = vld [vmem:[#allocation7 + $0x4b8] sm:$0xff] }
 0xf95   :  { %v5023_v11 = vld [vmem:[#allocation7 + $0x480] sm:$0xff]  ;;  %v10206_v53 = vpack.c.bf16 %v5030_v19, %v5026_v3  ;;  %v5060_v3 = vld [vmem:[#allocation7 + $0x5a8] sm:$0xff]  ;;  %v5058_v19 = vld [vmem:[#allocation7 + $0x598] sm:$0xff] }
 0xf96   :  { %v5027_v2 = vld [vmem:[#allocation7 + $0x4a0] sm:$0xff] }
 0xf97   :  { %7882 = vmatpush1.bf16.msra.mxu0 %v7881_v25  ;;  %7914 = vmatpush1.bf16.msra.mxu1 %v7913_v4  ;;  %v4720_v25 = vld [vmem:[#allocation5 + $0x5f8] sm:$0xff]  ;;  %v7897_v4 = vpack.c.bf16 %v4709_v12, %v4705_v9  ;;  %v5029_v9 = vld [vmem:[#allocation7 + $0x4b0] sm:$0xff] }
 0xf98   :  { %7884 = vmatprep.subr.bf16.mxu0 %v7883_v57  ;;  %7916 = vmatprep.subr.bf16.mxu1 %v7915_v29  ;;  %v7899_v57 = vpack.c.bf16 %v4718_v42, %v4714_v24  ;;  %v7931_v29 = vpack.c.bf16 %v4720_v25, %v4716_v59  ;;  %v5038_v24 = vld [vmem:[#allocation7 + $0x4f8] sm:$0xff]  ;;  %v5031_v42 = vld [vmem:[#allocation7 + $0x4c0] sm:$0xff] }
 0xf99   :  { %v5035_v59 = vld [vmem:[#allocation7 + $0x4e0] sm:$0xff]  ;;  %v10218_v25 = vpack.c.bf16 %v5038_v24, %v5034_v47  ;;  %v5057_v47 = vld [vmem:[#allocation7 + $0x590] sm:$0xff] }
 0xf9a   :  { %v5061_v24 = vld [vmem:[#allocation7 + $0x5b0] sm:$0xff] }
 0xf9b   :  { %7886 = vmatpush1.bf16.msra.mxu0 %v7885_v36  ;;  %7918 = vmatpush1.bf16.msra.mxu1 %v7917_v8 }
 0xf9c   :  { %7888 = vmatprep.subr.bf16.mxu0 %v7887_v5  ;;  %7920 = vmatprep.subr.bf16.mxu1 %v7919_v26  ;;  %v5016_v5 = vld [vmem:[#allocation7 + $0x448] sm:$0xff] }
 0xf9d   :  { %v5020_v26 = vld [vmem:[#allocation7 + $0x468] sm:$0xff] }
 0xf9e   :  { %v10192_v0 = vpack.c.bf16 %v5020_v26, %v5016_v5  ;;  %v5050_v26 = vld [vmem:[#allocation7 + $0x558] sm:$0xff] }
 0xf9f   :  { %7890 = vmatpush1.bf16.msra.mxu0 %v7889_v51  ;;  %7922 = vmatpush1.bf16.msra.mxu1 %v7921_v33  ;;  %v10196_v51 = vpack.c.bf16 %v5019_v43, %v5015_v30  ;;  %v5017_v33 = vld [vmem:[#allocation7 + $0x450] sm:$0xff]  ;;  %v10240_v30 = vpack.c.bf16 %v5054_v44, %v5050_v26  ;;  %v5051_v43 = vld [vmem:[#allocation7 + $0x560] sm:$0xff] }
 0xfa0   :  { %7892 = vmatprep.subr.bf16.mxu0 %v7891_v46  ;;  %7924 = vmatprep.subr.bf16.mxu1 %v7923_v27  ;;  %v10199_v52 = vpack.c.bf16 %v5021_v45, %v5017_v33  ;;  %v5024_v46 = vld [vmem:[#allocation7 + $0x488] sm:$0xff]  ;;  %v5049_v33 = vld [vmem:[#allocation7 + $0x550] sm:$0xff] }
 0xfa1   :  { %v5028_v27 = vld [vmem:[#allocation7 + $0x4a8] sm:$0xff]  ;;  %v5053_v45 = vld [vmem:[#allocation7 + $0x570] sm:$0xff] }
 0xfa2   :  { %v10204_v23 = vpack.c.bf16 %v5028_v27, %v5024_v46  ;;  %v10243_v46 = vpack.c.bf16 %v5051_v43, %v5047_v54  ;;  %v5056_v27 = vld [vmem:[#allocation7 + $0x588] sm:$0xff] }
 0xfa3   :  { %7894 = vmatpush1.bf16.msra.mxu0 %v7893_v60  ;;  %7926 = vmatpush1.bf16.msra.mxu1 %v7925_v34  ;;  %v10208_v60 = vpack.c.bf16 %v5027_v2, %v5023_v11  ;;  %v5025_v34 = vld [vmem:[#allocation7 + $0x490] sm:$0xff]  ;;  %v10247_v11 = vpack.c.bf16 %v5053_v45, %v5049_v33  ;;  %v10249_v2 = vpack.c.bf16 %v5060_v3, %v5056_v27 }
 0xfa4   :  { %7896 = vmatprep.subr.bf16.mxu0 %v7895_v21  ;;  %7928 = vmatprep.subr.bf16.mxu1 %v7927_v58  ;;  %v10211_v12 = vpack.c.bf16 %v5029_v9, %v5025_v34  ;;  %v5032_v21 = vld [vmem:[#allocation7 + $0x4c8] sm:$0xff]  ;;  %v5062_v34 = vld [vmem:[#allocation7 + $0x5b8] sm:$0xff]  ;;  %v5055_v9 = vld [vmem:[#allocation7 + $0x580] sm:$0xff] }
 0xfa5   :  { %v5036_v58 = vld [vmem:[#allocation7 + $0x4e8] sm:$0xff] }
 0xfa6   :  { %v10216_v20 = vpack.c.bf16 %v5036_v58, %v5032_v21  ;;  %v5059_v21 = vld [vmem:[#allocation7 + $0x5a0] sm:$0xff]  ;;  %v10252_v58 = vpack.c.bf16 %v5062_v34, %v5058_v19 }
 0xfa7   :  { %7898 = vmatpush1.bf16.msra.mxu0 %v7897_v4  ;;  %7930 = vmatpush1.bf16.msra.mxu1 %v7929_v38  ;;  %v10220_v4 = vpack.c.bf16 %v5035_v59, %v5031_v42  ;;  %v5033_v38 = vld [vmem:[#allocation7 + $0x4d0] sm:$0xff]  ;;  %v10255_v42 = vpack.c.bf16 %v5059_v21, %v5055_v9  ;;  %v10259_v59 = vpack.c.bf16 %v5061_v24, %v5057_v47 }
 0xfa8   :  { %7900 = vmatprep.subr.bf16.mxu0 %v7899_v57  ;;  %7932 = vmatprep.subr.bf16.mxu1 %v7931_v29  ;;  %v5040_v57 = vld [vmem:[#allocation7 + $0x508] sm:$0xff]  ;;  %v10223_v29 = vpack.c.bf16 %v5037_v28, %v5033_v38 }
 0xfa9   :  { %v5064_v38 = vld [vmem:[#allocation7 + $0x5c8] sm:$0xff] }
 0xfaa   :  { %v5068_v28 = vld [vmem:[#allocation7 + $0x5e8] sm:$0xff] }
 0xfab   :  { %7902 = vmatpush1.bf16.msra.mxu0 %v7901_v37  ;;  %7934 = vmatpush1.bf16.msra.mxu1 %v7933_v16  ;;  %v10227_v37 = vpack.c.bf16 %v5044_v15, %v5040_v57  ;;  %v10229_v16 = vpack.c.bf16 %v5046_v48, %v5042_v63  ;;  %v5066_v57 = vld [vmem:[#allocation7 + $0x5d8] sm:$0xff]  ;;  %v10264_v15 = vpack.c.bf16 %v5068_v28, %v5064_v38  ;;  %v5063_v48 = vld [vmem:[#allocation7 + $0x5c0] sm:$0xff] }
 0xfac   :  { %v5070_v63 = vld [vmem:[#allocation7 + $0x5f8] sm:$0xff] }
 0xfae   :  { %4786 = vmatmul.mubr.f32.vlgmr.msra.gmra.mrb[32].mxu0 %v9808_v31  ;;  %4899 = vmatmul.mubr.f32.vlgmr.msra.gmra.mrb[32].mxu1 %v9808_v31  ;;  %v5008_v31 = vld [vmem:[#allocation7 + $0x408] sm:$0xff] }
 0xfaf   :  { %4791 = vmatprep.mubr.f32.mxu0 %v9010_v1  ;;  %4904 = vmatprep.mubr.f32.mxu1 %v9010_v1 }
 0xfb2   :  { %4792 = vmatmul.mubr.f32.gmra.mrb[34].mxu0 %v9854_v62  ;;  %4905 = vmatmul.mubr.f32.gmra.mrb[34].mxu1 %v9854_v62  ;;  %v5012_v62 = vld [vmem:[#allocation7 + $0x428] sm:$0xff] }
 0xfb3   :  { %4797 = vmatprep.mubr.f32.mxu0 %v9010_v1  ;;  %4910 = vmatprep.mubr.f32.mxu1 %v9010_v1 }
 0xfb6   :  { %4798 = vmatmul.mubr.f32.gmra.mrb[36].mxu0 %v9898_v18  ;;  %4911 = vmatmul.mubr.f32.gmra.mrb[36].mxu1 %v9898_v18  ;;  %v5010_v18 = vld [vmem:[#allocation7 + $0x418] sm:$0xff] }
 0xfb7   :  { %4803 = vmatprep.mubr.f32.mxu0 %v9010_v1  ;;  %4916 = vmatprep.mubr.f32.mxu1 %v9010_v1 }
 0xfba   :  { %4804 = vmatmul.mubr.f32.gmra.mrb[38].mxu0 %v10010_v17  ;;  %4917 = vmatmul.mubr.f32.gmra.mrb[38].mxu1 %v10010_v17  ;;  %v10180_v17 = vpack.c.bf16 %v5012_v62, %v5008_v31  ;;  %v5039_v31 = vld [vmem:[#allocation7 + $0x500] sm:$0xff] }
 0xfbb   :  { %4809 = vmatprep.mubr.f32.mxu0 %v9010_v1  ;;  %4922 = vmatprep.mubr.f32.mxu1 %v9010_v1  ;;  %v5043_v62 = vld [vmem:[#allocation7 + $0x520] sm:$0xff] }
 0xfbc   :  { %7936 = vmatprep.subr.bf16.mxu0 %v10180_v17 }
 0xfbe   :  { %4810 = vmatmul.mubr.f32.gmra.mrb[40].mxu0 %v10056_v13  ;;  %4923 = vmatmul.mubr.f32.gmra.mrb[40].mxu1 %v10056_v13  ;;  %v5014_v13 = vld [vmem:[#allocation7 + $0x438] sm:$0xff] }
 0xfbf   :  { %4815 = vmatprep.mubr.f32.mxu0 %v9010_v1  ;;  %4928 = vmatprep.mubr.f32.mxu1 %v9010_v1  ;;  %v10182_v36 = vpack.c.bf16 %v5014_v13, %v5010_v18  ;;  %v5041_v18 = vld [vmem:[#allocation7 + $0x510] sm:$0xff]  ;;  %v10232_v13 = vpack.c.bf16 %v5043_v62, %v5039_v31  ;;  %v5067_v31 = vld [vmem:[#allocation7 + $0x5e0] sm:$0xff]  ;;  %v10266_v62 = vpack.c.bf16 %v5070_v63, %v5066_v57 }
 0xfc1   :  { %7968 = vmatprep.subr.bf16.mxu1 %v10182_v36 }
 0xfc2   :  { %4816 = vmatmul.mubr.f32.gmra.mrb[42].mxu0 %v10102_v61  ;;  %4929 = vmatmul.mubr.f32.gmra.mrb[42].mxu1 %v10102_v61  ;;  %v5011_v61 = vld [vmem:[#allocation7 + $0x420] sm:$0xff] }
 0xfc3   :  { %4821 = vmatprep.mubr.f32.mxu0 %v9010_v1  ;;  %4934 = vmatprep.mubr.f32.mxu1 %v9010_v1  ;;  %v10184_v8 = vpack.c.bf16 %v5011_v61, %v5007_v22  ;;  %v5045_v22 = vld [vmem:[#allocation7 + $0x530] sm:$0xff]  ;;  %v5048_v61 = vld [vmem:[#allocation7 + $0x548] sm:$0xff] }
 0xfc5   :  { %7938 = vmatpush1.bf16.msra.mxu0 %v10184_v8 }
 0xfc6   :  { %4822 = vmatmul.mubr.f32.gmra.mrb[44].mxu0 %v10146_v14  ;;  %4935 = vmatmul.mubr.f32.gmra.mrb[44].mxu1 %v10146_v14  ;;  %v10187_v14 = vpack.c.bf16 %v5013_v6, %v5009_v10  ;;  %v5052_v10 = vld [vmem:[#allocation7 + $0x568] sm:$0xff]  ;;  %v10236_v6 = vpack.c.bf16 %v5045_v22, %v5041_v18  ;;  %v10268_v18 = vpack.c.bf16 %v5067_v31, %v5063_v48  ;;  %v5065_v22 = vld [vmem:[#allocation7 + $0x5d0] sm:$0xff] }
 0xfc7   :  { %4827 = vmatprep.mubr.f32.mxu0 %v9010_v1  ;;  %4940 = vmatprep.mubr.f32.mxu1 %v9010_v1  ;;  %v10238_v5 = vpack.c.bf16 %v5052_v10, %v5048_v61  ;;  %v5069_v61 = vld [vmem:[#allocation7 + $0x5f0] sm:$0xff] }
 0xfc8   :  { %7970 = vmatpush1.bf16.msra.mxu1 %v10187_v14  ;;  %7940 = vmatprep.subr.bf16.mxu0 %v10192_v0  ;;  %v10271_v10 = vpack.c.bf16 %v5069_v61, %v5065_v22 }
 0xfc9   :  { %7972 = vmatprep.subr.bf16.mxu1 %v10194_v50  ;;  %7942 = vmatpush1.bf16.msra.mxu0 %v10196_v51 }
 0xfca   :  { %7944 = vmatprep.subr.bf16.mxu0 %v10204_v23 }
 0xfcc   :  { %7974 = vmatpush1.bf16.msra.mxu1 %v10199_v52 }
 0xfcd   :  { %7976 = vmatprep.subr.bf16.mxu1 %v10206_v53  ;;  %7946 = vmatpush1.bf16.msra.mxu0 %v10208_v60 }
 0xfce   :  { %7948 = vmatprep.subr.bf16.mxu0 %v10216_v20 }
 0xfd0   :  { %7978 = vmatpush1.bf16.msra.mxu1 %v10211_v12 }
 0xfd1   :  { %7980 = vmatprep.subr.bf16.mxu1 %v10218_v25  ;;  %7950 = vmatpush1.bf16.msra.mxu0 %v10220_v4 }
 0xfd2   :  { %7952 = vmatprep.subr.bf16.mxu0 %v10227_v37 }
 0xfd4   :  { %7982 = vmatpush1.bf16.msra.mxu1 %v10223_v29 }
 0xfd5   :  { %7984 = vmatprep.subr.bf16.mxu1 %v10229_v16  ;;  %7954 = vmatpush1.bf16.msra.mxu0 %v10232_v13 }
 0xfd6   :  { %7956 = vmatprep.subr.bf16.mxu0 %v10238_v5 }
 0xfd8   :  { %7986 = vmatpush1.bf16.msra.mxu1 %v10236_v6 }
 0xfd9   :  { %7988 = vmatprep.subr.bf16.mxu1 %v10240_v30  ;;  %7958 = vmatpush1.bf16.msra.mxu0 %v10243_v46 }
 0xfda   :  { %7960 = vmatprep.subr.bf16.mxu0 %v10249_v2 }
 0xfdc   :  { %7990 = vmatpush1.bf16.msra.mxu1 %v10247_v11 }
 0xfdd   :  { %7992 = vmatprep.subr.bf16.mxu1 %v10252_v58  ;;  %7962 = vmatpush1.bf16.msra.mxu0 %v10255_v42 }
 0xfde   :  { %7964 = vmatprep.subr.bf16.mxu0 %v10264_v15 }
 0xfe0   :  { %7994 = vmatpush1.bf16.msra.mxu1 %v10259_v59 }
 0xfe1   :  { %7996 = vmatprep.subr.bf16.mxu1 %v10266_v62  ;;  %7966 = vmatpush1.bf16.msra.mxu0 %v10268_v18 }
 0xfe2   :  { %8000 = vmatprep.subr.bf16.mxu0 %v10180_v17 }
 0xfe4   :  { %7998 = vmatpush1.bf16.msra.mxu1 %v10271_v10 }
 0xfe5   :  { %8032 = vmatprep.subr.bf16.mxu1 %v10182_v36 }
0x1061   :  { %v4539_v26 = vpop.f32.mrb[30].mxu0  ;;  %v4610_v44 = vpop.f32.mrb[30].mxu1 }
0x1062   :  { %v4619_v54 = vadd.f32 %v4539_v26, %v9790_v41  ;;  %v4541_v43 = vpop.f32.mrb[31].mxu0  ;;  %v4612_v33 = vpop.f32.mrb[31].mxu1  ;;  %v4621_v9 = vadd.f32 %v4610_v44, %v9802_v49 }
0x1063   :  { %v4620_v45 = vadd.f32 %v4541_v43, %v9793_v55  ;;  %v4622_v19 = vadd.f32 %v4612_v33, %v9798_v7 }
0x1064   :  { %v6638_v27 = vmul.f32 -1.442695, %v4619_v54 }
0x1065   :  { %v6639_v3 = vmul.f32 -1.442695, %v4620_v45  ;;  %v6640_v34 = vmul.f32 -1.442695, %v4622_v19 }
0x1066   :  { %8814 = vpow2.f32 %v6638_v27 }
0x1067   :  { %8816 = vpow2.f32 %v6639_v3 }
0x1068   :  { %8818 = vpow2.f32 %v6640_v34 }
0x1069   :  { %8820 = vtanh.f32 %v4621_v9 }
0x1070   :  { %v8815_v21 = vpop.eup %8814 }
0x1071   :  { %v8817_v47 = vpop.eup %8816  ;;  %v4626_v24 = vadd.f32 1.0, %v8815_v21 }
0x1072   :  { %v4632_v38 = vadd.f32 1.0, %v8817_v47  ;;  %v8819_v41 = vpop.eup %8818 }
0x1073   :  { %8822 = vrcp.f32 %v4626_v24  ;;  %v8821_v28 = vpop.eup %8820  ;;  %v4639_v48 = vadd.f32 1.0, %v8819_v41 }
0x1074   :  { %8824 = vrcp.f32 %v4632_v38 }
0x1075   :  { %8826 = vrcp.f32 %v4639_v48 }
0x107d   :  { %v8823_v55 = vpop.eup %8822 }
0x107e   :  { %v8825_v57 = vpop.eup %8824  ;;  %v4643_v63 = vmul.f32 %v8823_v55, %v8821_v28 }
0x107f   :  { %v4642_v31 = vmul.f32 %v8825_v57, %v10143_v40  ;;  %v8827_v49 = vpop.eup %8826  ;;  %v6641_v40 = vld [vmem:[%s10653_s3 + $0x8] sm:$0xf] }
0x1080   :  { %v10325_v26 = vrot.slane %v6641_v40, %v9251_v32  ;;  %v10328_v44 = vrot.slane %v6641_v40, %v9256_v35  ;;  %v10333_v9 = vrot.slane %v6641_v40, %v9264_v39  ;;  %v10337_v35 = vrot.slane %v6641_v40, %v9271_v56 }
0x1081   :  { %v4644_v7 = vadd.f32 %v4643_v63, %v4642_v31 }
0x1083   :  { %8828 = vtanh.f32 %v4644_v7 }
0x108d   :  { %v8829_v22 = vpop.eup %8828 }
0x108e   :  { %v4646_v61 = vmul.f32 %v8829_v22, %v8827_v49 }
0x1090   :  { %4828 = vmatmul.mubr.f32.gmra.mrb[46].mxu0 %v4646_v61  ;;  %4941 = vmatmul.mubr.f32.gmra.mrb[46].mxu1 %v4646_v61 }
0x1091   :  { %5135 = vmatprep.mubr.f32.mxu0 %v9010_v1  ;;  %5206 = vmatprep.mubr.f32.mxu1 %v9010_v1 }
0x1094   :  { %5136 = vmatmul.mubr.f32.vlgmr.msra.gmra.mrb[32].mxu0 %v9010_v1  ;;  %5207 = vmatmul.mubr.f32.vlgmr.msra.gmra.mrb[32].mxu1 %v9010_v1 }
0x1095   :  { %8002 = vmatpush1.bf16.msra.mxu0 %v10184_v8  ;;  %8034 = vmatpush1.bf16.msra.mxu1 %v10187_v14 }
0x1096   :  { %8004 = vmatprep.subr.bf16.mxu0 %v10192_v0  ;;  %8036 = vmatprep.subr.bf16.mxu1 %v10194_v50 }
0x1097   :  { %5313 = vmatprep.mubr.f32.mxu0 %v9010_v1  ;;  %5384 = vmatprep.mubr.f32.mxu1 %v9010_v1 }
0x1099   :  { %8006 = vmatpush1.bf16.msra.mxu0 %v10196_v51  ;;  %8038 = vmatpush1.bf16.msra.mxu1 %v10199_v52 }
0x109a   :  { %8008 = vmatprep.subr.bf16.mxu0 %v10204_v23  ;;  %8040 = vmatprep.subr.bf16.mxu1 %v10206_v53 }
0x109d   :  { %8010 = vmatpush1.bf16.msra.mxu0 %v10208_v60  ;;  %8042 = vmatpush1.bf16.msra.mxu1 %v10211_v12 }
0x109e   :  { %8012 = vmatprep.subr.bf16.mxu0 %v10216_v20  ;;  %8044 = vmatprep.subr.bf16.mxu1 %v10218_v25 }
0x10a1   :  { %8014 = vmatpush1.bf16.msra.mxu0 %v10220_v4  ;;  %8046 = vmatpush1.bf16.msra.mxu1 %v10223_v29 }
0x10a2   :  { %8016 = vmatprep.subr.bf16.mxu0 %v10227_v37  ;;  %8048 = vmatprep.subr.bf16.mxu1 %v10229_v16 }
0x10a5   :  { %8018 = vmatpush1.bf16.msra.mxu0 %v10232_v13  ;;  %8050 = vmatpush1.bf16.msra.mxu1 %v10236_v6 }
0x10a6   :  { %8020 = vmatprep.subr.bf16.mxu0 %v10238_v5  ;;  %8052 = vmatprep.subr.bf16.mxu1 %v10240_v30 }
0x10a9   :  { %8022 = vmatpush1.bf16.msra.mxu0 %v10243_v46  ;;  %8054 = vmatpush1.bf16.msra.mxu1 %v10247_v11 }
0x10aa   :  { %8024 = vmatprep.subr.bf16.mxu0 %v10249_v2  ;;  %8056 = vmatprep.subr.bf16.mxu1 %v10252_v58 }
0x10ad   :  { %8026 = vmatpush1.bf16.msra.mxu0 %v10255_v42  ;;  %8058 = vmatpush1.bf16.msra.mxu1 %v10259_v59 }
0x10ae   :  { %8028 = vmatprep.subr.bf16.mxu0 %v10264_v15  ;;  %8060 = vmatprep.subr.bf16.mxu1 %v10266_v62 }
0x10b1   :  { %8030 = vmatpush1.bf16.msra.mxu0 %v10268_v18  ;;  %8062 = vmatpush1.bf16.msra.mxu1 %v10271_v10 }
0x10b2   :  { %8064 = vmatprep.subr.bf16.mxu0 %v10180_v17  ;;  %8096 = vmatprep.subr.bf16.mxu1 %v10182_v36 }
0x1167   :  { %v5137_v54 = vpop.f32.mrb[32].mxu0  ;;  %v5208_v43 = vpop.f32.mrb[32].mxu1 }
0x1168   :  { %v5217_v33 = vadd.f32 %v5137_v54, %v10325_v26  ;;  %v5139_v45 = vpop.f32.mrb[33].mxu0  ;;  %v5210_v27 = vpop.f32.mrb[33].mxu1  ;;  %v5219_v47 = vadd.f32 %v5208_v43, %v10337_v35 }
0x1169   :  { %v5218_v3 = vadd.f32 %v5139_v45, %v10328_v44  ;;  %v5220_v32 = vadd.f32 %v5210_v27, %v10333_v9 }
0x116a   :  { %v6642_v19 = vmul.f32 -1.442695, %v5217_v33 }
0x116b   :  { %v6643_v34 = vmul.f32 -1.442695, %v5218_v3  ;;  %v6644_v21 = vmul.f32 -1.442695, %v5220_v32 }
0x116c   :  { %8830 = vpow2.f32 %v6642_v19 }
0x116d   :  { %8832 = vpow2.f32 %v6643_v34 }
0x116e   :  { %8834 = vpow2.f32 %v6644_v21 }
0x116f   :  { %8836 = vtanh.f32 %v5219_v47 }
0x1176   :  { %v8831_v24 = vpop.eup %8830 }
0x1177   :  { %v8833_v38 = vpop.eup %8832  ;;  %v5224_v41 = vadd.f32 1.0, %v8831_v24 }
0x1178   :  { %v5230_v28 = vadd.f32 1.0, %v8833_v38  ;;  %v8835_v39 = vpop.eup %8834 }
0x1179   :  { %8838 = vrcp.f32 %v5224_v41  ;;  %v8837_v55 = vpop.eup %8836  ;;  %v5237_v31 = vadd.f32 1.0, %v8835_v39 }
0x117a   :  { %8840 = vrcp.f32 %v5230_v28 }
0x117b   :  { %8842 = vrcp.f32 %v5237_v31 }
0x1183   :  { %v8839_v57 = vpop.eup %8838 }
0x1184   :  { %v8841_v63 = vpop.eup %8840  ;;  %v5241_v48 = vmul.f32 %v8839_v57, %v8837_v55 }
0x1185   :  { %v5240_v7 = vmul.f32 0.0, %v8841_v63  ;;  %v8843_v49 = vpop.eup %8842 }
0x1187   :  { %v10340_v56 = vadd.f32 %v5241_v48, %v5240_v7 }
0x1189   :  { %8844 = vtanh.f32 %v10340_v56 }
0x1193   :  { %v8845_v22 = vpop.eup %8844 }
0x1194   :  { %v5244_v61 = vmul.f32 %v8845_v22, %v8843_v49 }
0x1196   :  { %5314 = vmatmul.mubr.f32.vlgmr.msra.gmra.mrb[34].mxu0 %v5244_v61  ;;  %5385 = vmatmul.mubr.f32.vlgmr.msra.gmra.mrb[34].mxu1 %v5244_v61 }
0x1197   :  { %8066 = vmatpush1.bf16.msra.mxu0 %v10184_v8  ;;  %8098 = vmatpush1.bf16.msra.mxu1 %v10187_v14 }
0x1198   :  { %8068 = vmatprep.subr.bf16.mxu0 %v10192_v0  ;;  %8100 = vmatprep.subr.bf16.mxu1 %v10194_v50 }
0x1199   :  { %5491 = vmatprep.mubr.f32.mxu0 %v9010_v1  ;;  %5562 = vmatprep.mubr.f32.mxu1 %v9010_v1 }
0x119b   :  { %8070 = vmatpush1.bf16.msra.mxu0 %v10196_v51  ;;  %8102 = vmatpush1.bf16.msra.mxu1 %v10199_v52 }
0x119c   :  { %8072 = vmatprep.subr.bf16.mxu0 %v10204_v23  ;;  %8104 = vmatprep.subr.bf16.mxu1 %v10206_v53 }
0x119f   :  { %8074 = vmatpush1.bf16.msra.mxu0 %v10208_v60  ;;  %8106 = vmatpush1.bf16.msra.mxu1 %v10211_v12 }
0x11a0   :  { %8076 = vmatprep.subr.bf16.mxu0 %v10216_v20  ;;  %8108 = vmatprep.subr.bf16.mxu1 %v10218_v25 }
0x11a3   :  { %8078 = vmatpush1.bf16.msra.mxu0 %v10220_v4  ;;  %8110 = vmatpush1.bf16.msra.mxu1 %v10223_v29 }
0x11a4   :  { %8080 = vmatprep.subr.bf16.mxu0 %v10227_v37  ;;  %8112 = vmatprep.subr.bf16.mxu1 %v10229_v16 }
0x11a7   :  { %8082 = vmatpush1.bf16.msra.mxu0 %v10232_v13  ;;  %8114 = vmatpush1.bf16.msra.mxu1 %v10236_v6 }
0x11a8   :  { %8084 = vmatprep.subr.bf16.mxu0 %v10238_v5  ;;  %8116 = vmatprep.subr.bf16.mxu1 %v10240_v30 }
0x11ab   :  { %8086 = vmatpush1.bf16.msra.mxu0 %v10243_v46  ;;  %8118 = vmatpush1.bf16.msra.mxu1 %v10247_v11 }
0x11ac   :  { %8088 = vmatprep.subr.bf16.mxu0 %v10249_v2  ;;  %8120 = vmatprep.subr.bf16.mxu1 %v10252_v58 }
0x11af   :  { %8090 = vmatpush1.bf16.msra.mxu0 %v10255_v42  ;;  %8122 = vmatpush1.bf16.msra.mxu1 %v10259_v59 }
0x11b0   :  { %8092 = vmatprep.subr.bf16.mxu0 %v10264_v15  ;;  %8124 = vmatprep.subr.bf16.mxu1 %v10266_v62 }
0x11b3   :  { %8094 = vmatpush1.bf16.msra.mxu0 %v10268_v18  ;;  %8126 = vmatpush1.bf16.msra.mxu1 %v10271_v10 }
0x11b4   :  { %8128 = vmatprep.subr.bf16.mxu0 %v10180_v17  ;;  %8160 = vmatprep.subr.bf16.mxu1 %v10182_v36 }
0x1269   :  { %v5315_v40 = vpop.f32.mrb[34].mxu0  ;;  %v5386_v54 = vpop.f32.mrb[34].mxu1 }
0x126a   :  { %v5395_v43 = vadd.f32 %v5315_v40, %v10325_v26  ;;  %v5317_v33 = vpop.f32.mrb[35].mxu0  ;;  %v5388_v45 = vpop.f32.mrb[35].mxu1  ;;  %v5397_v21 = vadd.f32 %v5386_v54, %v10337_v35 }
0x126b   :  { %v5396_v27 = vadd.f32 %v5317_v33, %v10328_v44  ;;  %v5398_v34 = vadd.f32 %v5388_v45, %v10333_v9 }
0x126c   :  { %v6645_v3 = vmul.f32 -1.442695, %v5395_v43 }
0x126d   :  { %v6646_v19 = vmul.f32 -1.442695, %v5396_v27  ;;  %v6647_v32 = vmul.f32 -1.442695, %v5398_v34 }
0x126e   :  { %8846 = vpow2.f32 %v6645_v3 }
0x126f   :  { %8848 = vpow2.f32 %v6646_v19 }
0x1270   :  { %8850 = vpow2.f32 %v6647_v32 }
0x1271   :  { %8852 = vtanh.f32 %v5397_v21 }
0x1278   :  { %v8847_v47 = vpop.eup %8846 }
0x1279   :  { %v8849_v24 = vpop.eup %8848  ;;  %v5402_v38 = vadd.f32 1.0, %v8847_v47 }
0x127a   :  { %v5408_v41 = vadd.f32 1.0, %v8849_v24  ;;  %v8851_v28 = vpop.eup %8850 }
0x127b   :  { %8854 = vrcp.f32 %v5402_v38  ;;  %v8853_v39 = vpop.eup %8852  ;;  %v5415_v48 = vadd.f32 1.0, %v8851_v28 }
0x127c   :  { %8856 = vrcp.f32 %v5408_v41 }
0x127d   :  { %8858 = vrcp.f32 %v5415_v48 }
0x1285   :  { %v8855_v55 = vpop.eup %8854 }
0x1286   :  { %v8857_v57 = vpop.eup %8856  ;;  %v5419_v63 = vmul.f32 %v8855_v55, %v8853_v39 }
0x1287   :  { %v5418_v31 = vmul.f32 %v8857_v57, %v10340_v56  ;;  %v8859_v49 = vpop.eup %8858 }
0x1289   :  { %v10382_v7 = vadd.f32 %v5419_v63, %v5418_v31 }
0x128b   :  { %8860 = vtanh.f32 %v10382_v7 }
0x1295   :  { %v8861_v22 = vpop.eup %8860 }
0x1296   :  { %v5422_v61 = vmul.f32 %v8861_v22, %v8859_v49 }
0x1298   :  { %5492 = vmatmul.mubr.f32.vlgmr.msra.gmra.mrb[36].mxu0 %v5422_v61  ;;  %5563 = vmatmul.mubr.f32.vlgmr.msra.gmra.mrb[36].mxu1 %v5422_v61 }
0x1299   :  { %8130 = vmatpush1.bf16.msra.mxu0 %v10184_v8  ;;  %8162 = vmatpush1.bf16.msra.mxu1 %v10187_v14 }
0x129a   :  { %8132 = vmatprep.subr.bf16.mxu0 %v10192_v0  ;;  %8164 = vmatprep.subr.bf16.mxu1 %v10194_v50 }
0x129b   :  { %5669 = vmatprep.mubr.f32.mxu0 %v9010_v1  ;;  %5740 = vmatprep.mubr.f32.mxu1 %v9010_v1 }
0x129d   :  { %8134 = vmatpush1.bf16.msra.mxu0 %v10196_v51  ;;  %8166 = vmatpush1.bf16.msra.mxu1 %v10199_v52 }
0x129e   :  { %8136 = vmatprep.subr.bf16.mxu0 %v10204_v23  ;;  %8168 = vmatprep.subr.bf16.mxu1 %v10206_v53 }
0x12a1   :  { %8138 = vmatpush1.bf16.msra.mxu0 %v10208_v60  ;;  %8170 = vmatpush1.bf16.msra.mxu1 %v10211_v12 }
0x12a2   :  { %8140 = vmatprep.subr.bf16.mxu0 %v10216_v20  ;;  %8172 = vmatprep.subr.bf16.mxu1 %v10218_v25 }
0x12a5   :  { %8142 = vmatpush1.bf16.msra.mxu0 %v10220_v4  ;;  %8174 = vmatpush1.bf16.msra.mxu1 %v10223_v29 }
0x12a6   :  { %8144 = vmatprep.subr.bf16.mxu0 %v10227_v37  ;;  %8176 = vmatprep.subr.bf16.mxu1 %v10229_v16 }
0x12a9   :  { %8146 = vmatpush1.bf16.msra.mxu0 %v10232_v13  ;;  %8178 = vmatpush1.bf16.msra.mxu1 %v10236_v6 }
0x12aa   :  { %8148 = vmatprep.subr.bf16.mxu0 %v10238_v5  ;;  %8180 = vmatprep.subr.bf16.mxu1 %v10240_v30 }
0x12ad   :  { %8150 = vmatpush1.bf16.msra.mxu0 %v10243_v46  ;;  %8182 = vmatpush1.bf16.msra.mxu1 %v10247_v11 }
0x12ae   :  { %8152 = vmatprep.subr.bf16.mxu0 %v10249_v2  ;;  %8184 = vmatprep.subr.bf16.mxu1 %v10252_v58 }
0x12b1   :  { %8154 = vmatpush1.bf16.msra.mxu0 %v10255_v42  ;;  %8186 = vmatpush1.bf16.msra.mxu1 %v10259_v59 }
0x12b2   :  { %8156 = vmatprep.subr.bf16.mxu0 %v10264_v15  ;;  %8188 = vmatprep.subr.bf16.mxu1 %v10266_v62 }
0x12b5   :  { %8158 = vmatpush1.bf16.msra.mxu0 %v10268_v18  ;;  %8190 = vmatpush1.bf16.msra.mxu1 %v10271_v10 }
0x12b6   :  { %8192 = vmatprep.subr.bf16.mxu0 %v10180_v17  ;;  %8224 = vmatprep.subr.bf16.mxu1 %v10182_v36 }
0x136b   :  { %v5493_v56 = vpop.f32.mrb[36].mxu0  ;;  %v5564_v40 = vpop.f32.mrb[36].mxu1 }
0x136c   :  { %v5573_v54 = vadd.f32 %v5493_v56, %v10325_v26  ;;  %v5495_v43 = vpop.f32.mrb[37].mxu0  ;;  %v5566_v33 = vpop.f32.mrb[37].mxu1  ;;  %v5575_v32 = vadd.f32 %v5564_v40, %v10337_v35 }
0x136d   :  { %v5574_v45 = vadd.f32 %v5495_v43, %v10328_v44  ;;  %v5576_v19 = vadd.f32 %v5566_v33, %v10333_v9 }
0x136e   :  { %v6648_v27 = vmul.f32 -1.442695, %v5573_v54 }
0x136f   :  { %v6649_v3 = vmul.f32 -1.442695, %v5574_v45  ;;  %v6650_v34 = vmul.f32 -1.442695, %v5576_v19 }
0x1370   :  { %8862 = vpow2.f32 %v6648_v27 }
0x1371   :  { %8864 = vpow2.f32 %v6649_v3 }
0x1372   :  { %8866 = vpow2.f32 %v6650_v34 }
0x1373   :  { %8868 = vtanh.f32 %v5575_v32 }
0x137a   :  { %v8863_v21 = vpop.eup %8862 }
0x137b   :  { %v8865_v47 = vpop.eup %8864  ;;  %v5580_v24 = vadd.f32 1.0, %v8863_v21 }
0x137c   :  { %v5586_v38 = vadd.f32 1.0, %v8865_v47  ;;  %v8867_v41 = vpop.eup %8866 }
0x137d   :  { %8870 = vrcp.f32 %v5580_v24  ;;  %v8869_v28 = vpop.eup %8868  ;;  %v5593_v63 = vadd.f32 1.0, %v8867_v41 }
0x137e   :  { %8872 = vrcp.f32 %v5586_v38 }
0x137f   :  { %8874 = vrcp.f32 %v5593_v63 }
0x1387   :  { %v8871_v39 = vpop.eup %8870 }
0x1388   :  { %v8873_v55 = vpop.eup %8872  ;;  %v5597_v57 = vmul.f32 %v8871_v39, %v8869_v28 }
0x1389   :  { %v5596_v48 = vmul.f32 %v8873_v55, %v10382_v7  ;;  %v8875_v49 = vpop.eup %8874 }
0x138b   :  { %v10424_v31 = vadd.f32 %v5597_v57, %v5596_v48 }
0x138d   :  { %8876 = vtanh.f32 %v10424_v31 }
0x1397   :  { %v8877_v22 = vpop.eup %8876 }
0x1398   :  { %v5600_v61 = vmul.f32 %v8877_v22, %v8875_v49 }
0x139a   :  { %5670 = vmatmul.mubr.f32.vlgmr.msra.gmra.mrb[38].mxu0 %v5600_v61  ;;  %5741 = vmatmul.mubr.f32.vlgmr.msra.gmra.mrb[38].mxu1 %v5600_v61 }
0x139b   :  { %8194 = vmatpush1.bf16.msra.mxu0 %v10184_v8  ;;  %8226 = vmatpush1.bf16.msra.mxu1 %v10187_v14 }
0x139c   :  { %8196 = vmatprep.subr.bf16.mxu0 %v10192_v0  ;;  %8228 = vmatprep.subr.bf16.mxu1 %v10194_v50 }
0x139d   :  { %5847 = vmatprep.mubr.f32.mxu0 %v9010_v1  ;;  %5918 = vmatprep.mubr.f32.mxu1 %v9010_v1 }
0x139f   :  { %8198 = vmatpush1.bf16.msra.mxu0 %v10196_v51  ;;  %8230 = vmatpush1.bf16.msra.mxu1 %v10199_v52 }
0x13a0   :  { %8200 = vmatprep.subr.bf16.mxu0 %v10204_v23  ;;  %8232 = vmatprep.subr.bf16.mxu1 %v10206_v53 }
0x13a3   :  { %8202 = vmatpush1.bf16.msra.mxu0 %v10208_v60  ;;  %8234 = vmatpush1.bf16.msra.mxu1 %v10211_v12 }
0x13a4   :  { %8204 = vmatprep.subr.bf16.mxu0 %v10216_v20  ;;  %8236 = vmatprep.subr.bf16.mxu1 %v10218_v25 }
0x13a7   :  { %8206 = vmatpush1.bf16.msra.mxu0 %v10220_v4  ;;  %8238 = vmatpush1.bf16.msra.mxu1 %v10223_v29 }
0x13a8   :  { %8208 = vmatprep.subr.bf16.mxu0 %v10227_v37  ;;  %8240 = vmatprep.subr.bf16.mxu1 %v10229_v16 }
0x13ab   :  { %8210 = vmatpush1.bf16.msra.mxu0 %v10232_v13  ;;  %8242 = vmatpush1.bf16.msra.mxu1 %v10236_v6 }
0x13ac   :  { %8212 = vmatprep.subr.bf16.mxu0 %v10238_v5  ;;  %8244 = vmatprep.subr.bf16.mxu1 %v10240_v30 }
0x13af   :  { %8214 = vmatpush1.bf16.msra.mxu0 %v10243_v46  ;;  %8246 = vmatpush1.bf16.msra.mxu1 %v10247_v11 }
0x13b0   :  { %8216 = vmatprep.subr.bf16.mxu0 %v10249_v2  ;;  %8248 = vmatprep.subr.bf16.mxu1 %v10252_v58 }
0x13b3   :  { %8218 = vmatpush1.bf16.msra.mxu0 %v10255_v42  ;;  %8250 = vmatpush1.bf16.msra.mxu1 %v10259_v59 }
0x13b4   :  { %8220 = vmatprep.subr.bf16.mxu0 %v10264_v15  ;;  %8252 = vmatprep.subr.bf16.mxu1 %v10266_v62 }
0x13b7   :  { %8222 = vmatpush1.bf16.msra.mxu0 %v10268_v18  ;;  %8254 = vmatpush1.bf16.msra.mxu1 %v10271_v10 }
0x13b8   :  { %8256 = vmatprep.subr.bf16.mxu0 %v10180_v17  ;;  %8288 = vmatprep.subr.bf16.mxu1 %v10182_v36 }
0x146d   :  { %v5671_v7 = vpop.f32.mrb[38].mxu0  ;;  %v5742_v56 = vpop.f32.mrb[38].mxu1 }
0x146e   :  { %v5751_v40 = vadd.f32 %v5671_v7, %v10325_v26  ;;  %v5673_v54 = vpop.f32.mrb[39].mxu0  ;;  %v5744_v43 = vpop.f32.mrb[39].mxu1  ;;  %v5753_v34 = vadd.f32 %v5742_v56, %v10337_v35 }
0x146f   :  { %v5752_v33 = vadd.f32 %v5673_v54, %v10328_v44  ;;  %v5754_v3 = vadd.f32 %v5744_v43, %v10333_v9 }
0x1470   :  { %v6651_v45 = vmul.f32 -1.442695, %v5751_v40 }
0x1471   :  { %v6652_v27 = vmul.f32 -1.442695, %v5752_v33  ;;  %v6653_v19 = vmul.f32 -1.442695, %v5754_v3 }
0x1472   :  { %8878 = vpow2.f32 %v6651_v45 }
0x1473   :  { %8880 = vpow2.f32 %v6652_v27 }
0x1474   :  { %8882 = vpow2.f32 %v6653_v19 }
0x1475   :  { %8884 = vtanh.f32 %v5753_v34 }
0x147c   :  { %v8879_v32 = vpop.eup %8878 }
0x147d   :  { %v8881_v21 = vpop.eup %8880  ;;  %v5758_v47 = vadd.f32 1.0, %v8879_v32 }
0x147e   :  { %v5764_v24 = vadd.f32 1.0, %v8881_v21  ;;  %v8883_v38 = vpop.eup %8882 }
0x147f   :  { %8886 = vrcp.f32 %v5758_v47  ;;  %v8885_v41 = vpop.eup %8884  ;;  %v5771_v57 = vadd.f32 1.0, %v8883_v38 }
0x1480   :  { %8888 = vrcp.f32 %v5764_v24 }
0x1481   :  { %8890 = vrcp.f32 %v5771_v57 }
0x1489   :  { %v8887_v28 = vpop.eup %8886 }
0x148a   :  { %v8889_v39 = vpop.eup %8888  ;;  %v5775_v55 = vmul.f32 %v8887_v28, %v8885_v41 }
0x148b   :  { %v5774_v63 = vmul.f32 %v8889_v39, %v10424_v31  ;;  %v8891_v49 = vpop.eup %8890 }
0x148d   :  { %v10466_v48 = vadd.f32 %v5775_v55, %v5774_v63 }
0x148f   :  { %8892 = vtanh.f32 %v10466_v48 }
0x1499   :  { %v8893_v22 = vpop.eup %8892 }
0x149a   :  { %v5778_v61 = vmul.f32 %v8893_v22, %v8891_v49 }
0x149c   :  { %5848 = vmatmul.mubr.f32.vlgmr.msra.gmra.mrb[40].mxu0 %v5778_v61  ;;  %5919 = vmatmul.mubr.f32.vlgmr.msra.gmra.mrb[40].mxu1 %v5778_v61 }
0x149d   :  { %8258 = vmatpush1.bf16.msra.mxu0 %v10184_v8  ;;  %8290 = vmatpush1.bf16.msra.mxu1 %v10187_v14 }
0x149e   :  { %8260 = vmatprep.subr.bf16.mxu0 %v10192_v0  ;;  %8292 = vmatprep.subr.bf16.mxu1 %v10194_v50 }
0x149f   :  { %6025 = vmatprep.mubr.f32.mxu0 %v9010_v1  ;;  %6096 = vmatprep.mubr.f32.mxu1 %v9010_v1 }
0x14a1   :  { %8262 = vmatpush1.bf16.msra.mxu0 %v10196_v51  ;;  %8294 = vmatpush1.bf16.msra.mxu1 %v10199_v52 }
0x14a2   :  { %8264 = vmatprep.subr.bf16.mxu0 %v10204_v23  ;;  %8296 = vmatprep.subr.bf16.mxu1 %v10206_v53 }
0x14a5   :  { %8266 = vmatpush1.bf16.msra.mxu0 %v10208_v60  ;;  %8298 = vmatpush1.bf16.msra.mxu1 %v10211_v12 }
0x14a6   :  { %8268 = vmatprep.subr.bf16.mxu0 %v10216_v20  ;;  %8300 = vmatprep.subr.bf16.mxu1 %v10218_v25 }
0x14a9   :  { %8270 = vmatpush1.bf16.msra.mxu0 %v10220_v4  ;;  %8302 = vmatpush1.bf16.msra.mxu1 %v10223_v29 }
0x14aa   :  { %8272 = vmatprep.subr.bf16.mxu0 %v10227_v37  ;;  %8304 = vmatprep.subr.bf16.mxu1 %v10229_v16 }
0x14ad   :  { %8274 = vmatpush1.bf16.msra.mxu0 %v10232_v13  ;;  %8306 = vmatpush1.bf16.msra.mxu1 %v10236_v6 }
0x14ae   :  { %8276 = vmatprep.subr.bf16.mxu0 %v10238_v5  ;;  %8308 = vmatprep.subr.bf16.mxu1 %v10240_v30 }
0x14b1   :  { %8278 = vmatpush1.bf16.msra.mxu0 %v10243_v46  ;;  %8310 = vmatpush1.bf16.msra.mxu1 %v10247_v11 }
0x14b2   :  { %8280 = vmatprep.subr.bf16.mxu0 %v10249_v2  ;;  %8312 = vmatprep.subr.bf16.mxu1 %v10252_v58 }
0x14b5   :  { %8282 = vmatpush1.bf16.msra.mxu0 %v10255_v42  ;;  %8314 = vmatpush1.bf16.msra.mxu1 %v10259_v59 }
0x14b6   :  { %8284 = vmatprep.subr.bf16.mxu0 %v10264_v15  ;;  %8316 = vmatprep.subr.bf16.mxu1 %v10266_v62 }
0x14b9   :  { %8286 = vmatpush1.bf16.msra.mxu0 %v10268_v18  ;;  %8318 = vmatpush1.bf16.msra.mxu1 %v10271_v10 }
0x14ba   :  { %8320 = vmatprep.subr.bf16.mxu0 %v10180_v17  ;;  %8352 = vmatprep.subr.bf16.mxu1 %v10182_v36 }
0x156f   :  { %v5849_v31 = vpop.f32.mrb[40].mxu0  ;;  %v5920_v7 = vpop.f32.mrb[40].mxu1 }
0x1570   :  { %v5929_v56 = vadd.f32 %v5849_v31, %v10325_v26  ;;  %v5851_v40 = vpop.f32.mrb[41].mxu0  ;;  %v5922_v54 = vpop.f32.mrb[41].mxu1  ;;  %v5931_v19 = vadd.f32 %v5920_v7, %v10337_v35 }
0x1571   :  { %v5930_v43 = vadd.f32 %v5851_v40, %v10328_v44  ;;  %v5932_v27 = vadd.f32 %v5922_v54, %v10333_v9 }
0x1572   :  { %v6654_v33 = vmul.f32 -1.442695, %v5929_v56 }
0x1573   :  { %v6655_v45 = vmul.f32 -1.442695, %v5930_v43  ;;  %v6656_v3 = vmul.f32 -1.442695, %v5932_v27 }
0x1574   :  { %8894 = vpow2.f32 %v6654_v33 }
0x1575   :  { %8896 = vpow2.f32 %v6655_v45 }
0x1576   :  { %8898 = vpow2.f32 %v6656_v3 }
0x1577   :  { %8900 = vtanh.f32 %v5931_v19 }
0x157e   :  { %v8895_v34 = vpop.eup %8894 }
0x157f   :  { %v8897_v32 = vpop.eup %8896  ;;  %v5936_v21 = vadd.f32 1.0, %v8895_v34 }
0x1580   :  { %v5942_v47 = vadd.f32 1.0, %v8897_v32  ;;  %v8899_v24 = vpop.eup %8898 }
0x1581   :  { %8902 = vrcp.f32 %v5936_v21  ;;  %v8901_v38 = vpop.eup %8900  ;;  %v5949_v55 = vadd.f32 1.0, %v8899_v24 }
0x1582   :  { %8904 = vrcp.f32 %v5942_v47 }
0x1583   :  { %8906 = vrcp.f32 %v5949_v55 }
0x158b   :  { %v8903_v41 = vpop.eup %8902 }
0x158c   :  { %v8905_v28 = vpop.eup %8904  ;;  %v5953_v39 = vmul.f32 %v8903_v41, %v8901_v38 }
0x158d   :  { %v5952_v57 = vmul.f32 %v8905_v28, %v10466_v48  ;;  %v8907_v49 = vpop.eup %8906 }
0x158f   :  { %v10508_v63 = vadd.f32 %v5953_v39, %v5952_v57 }
0x1591   :  { %8908 = vtanh.f32 %v10508_v63 }
0x159b   :  { %v8909_v22 = vpop.eup %8908 }
0x159c   :  { %v5956_v61 = vmul.f32 %v8909_v22, %v8907_v49  ;;  %v6494_v22 = vld [vmem:[%s10654_s4 + $0x18] sm:$0xff] }
0x159e   :  { %6026 = vmatmul.mubr.f32.vlgmr.msra.gmra.mrb[42].mxu0 %v5956_v61  ;;  %6097 = vmatmul.mubr.f32.vlgmr.msra.gmra.mrb[42].mxu1 %v5956_v61 }
0x159f   :  { %8322 = vmatpush1.bf16.msra.mxu0 %v10184_v8  ;;  %8354 = vmatpush1.bf16.msra.mxu1 %v10187_v14 }
0x15a0   :  { %8324 = vmatprep.subr.bf16.mxu0 %v10192_v0  ;;  %8356 = vmatprep.subr.bf16.mxu1 %v10194_v50 }
0x15a1   :  { %6203 = vmatprep.mubr.f32.mxu0 %v9010_v1  ;;  %6274 = vmatprep.mubr.f32.mxu1 %v9010_v1 }
0x15a3   :  { %8326 = vmatpush1.bf16.msra.mxu0 %v10196_v51  ;;  %8358 = vmatpush1.bf16.msra.mxu1 %v10199_v52 }
0x15a4   :  { %8328 = vmatprep.subr.bf16.mxu0 %v10204_v23  ;;  %8360 = vmatprep.subr.bf16.mxu1 %v10206_v53 }
0x15a7   :  { %8330 = vmatpush1.bf16.msra.mxu0 %v10208_v60  ;;  %8362 = vmatpush1.bf16.msra.mxu1 %v10211_v12 }
0x15a8   :  { %8332 = vmatprep.subr.bf16.mxu0 %v10216_v20  ;;  %8364 = vmatprep.subr.bf16.mxu1 %v10218_v25 }
0x15ab   :  { %8334 = vmatpush1.bf16.msra.mxu0 %v10220_v4  ;;  %8366 = vmatpush1.bf16.msra.mxu1 %v10223_v29 }
0x15ac   :  { %8336 = vmatprep.subr.bf16.mxu0 %v10227_v37  ;;  %8368 = vmatprep.subr.bf16.mxu1 %v10229_v16 }
0x15af   :  { %8338 = vmatpush1.bf16.msra.mxu0 %v10232_v13  ;;  %8370 = vmatpush1.bf16.msra.mxu1 %v10236_v6 }
0x15b0   :  { %8340 = vmatprep.subr.bf16.mxu0 %v10238_v5  ;;  %8372 = vmatprep.subr.bf16.mxu1 %v10240_v30 }
0x15b3   :  { %8342 = vmatpush1.bf16.msra.mxu0 %v10243_v46  ;;  %8374 = vmatpush1.bf16.msra.mxu1 %v10247_v11 }
0x15b4   :  { %8344 = vmatprep.subr.bf16.mxu0 %v10249_v2  ;;  %8376 = vmatprep.subr.bf16.mxu1 %v10252_v58 }
0x15b7   :  { %8346 = vmatpush1.bf16.msra.mxu0 %v10255_v42  ;;  %8378 = vmatpush1.bf16.msra.mxu1 %v10259_v59 }
0x15b8   :  { %8348 = vmatprep.subr.bf16.mxu0 %v10264_v15  ;;  %8380 = vmatprep.subr.bf16.mxu1 %v10266_v62 }
0x15bb   :  { %8350 = vmatpush1.bf16.msra.mxu0 %v10268_v18  ;;  %8382 = vmatpush1.bf16.msra.mxu1 %v10271_v10 }
0x15bc   :  { %8384 = vmatprep.subr.bf16.mxu0 %v10180_v17  ;;  %8416 = vmatprep.subr.bf16.mxu1 %v10182_v36 }
0x1671   :  { %v6027_v48 = vpop.f32.mrb[42].mxu0  ;;  %v6098_v31 = vpop.f32.mrb[42].mxu1 }
0x1672   :  { %v6107_v7 = vadd.f32 %v6027_v48, %v10325_v26  ;;  %v6029_v56 = vpop.f32.mrb[43].mxu0  ;;  %v6100_v40 = vpop.f32.mrb[43].mxu1  ;;  %v6109_v3 = vadd.f32 %v6098_v31, %v10337_v35  ;;  %v6495_v48 = vld [vmem:[%s10654_s4 + $0x20] sm:$0xff]  ;;  %v6496_v31 = vld [vmem:[%s10654_s4 + $0x28] sm:$0xff] }
0x1673   :  { %v6108_v54 = vadd.f32 %v6029_v56, %v10328_v44  ;;  %v6110_v45 = vadd.f32 %v6100_v40, %v10333_v9  ;;  %v6497_v56 = vld [vmem:[%s10654_s4 + $0x30] sm:$0xff]  ;;  %v6498_v40 = vld [vmem:[%s10654_s4 + $0x38] sm:$0xff] }
0x1674   :  { %v6657_v43 = vmul.f32 -1.442695, %v6107_v7  ;;  %v8454_v7 = vpack.c.bf16 %v6496_v31, %v6495_v48 }
0x1675   :  { %v6658_v33 = vmul.f32 -1.442695, %v6108_v54  ;;  %v6659_v27 = vmul.f32 -1.442695, %v6110_v45  ;;  %v8457_v54 = vpack.c.bf16 %v6498_v40, %v6497_v56 }
0x1676   :  { %8910 = vpow2.f32 %v6657_v43  ;;  %v6499_v43 = vld [vmem:[%s10654_s4 + $0x40] sm:$0xff] }
0x1677   :  { %8912 = vpow2.f32 %v6658_v33  ;;  %v6500_v33 = vld [vmem:[%s10654_s4 + $0x48] sm:$0xff] }
0x1678   :  { %8914 = vpow2.f32 %v6659_v27  ;;  %v8460_v45 = vpack.c.bf16 %v6500_v33, %v6499_v43  ;;  %v6501_v27 = vld [vmem:[%s10654_s4 + $0x50] sm:$0xff] }
0x1679   :  { %8916 = vtanh.f32 %v6109_v3  ;;  %v6502_v3 = vld [vmem:[%s10654_s4 + $0x58] sm:$0xff] }
0x1680   :  { %v8911_v17 = vpop.eup %8910 }
0x1681   :  { %v8913_v19 = vpop.eup %8912  ;;  %v6114_v36 = vadd.f32 1.0, %v8911_v17  ;;  %v6503_v17 = vld [vmem:[%s10654_s4 + $0x60] sm:$0xff] }
0x1682   :  { %v6120_v34 = vadd.f32 1.0, %v8913_v19  ;;  %v8915_v32 = vpop.eup %8914  ;;  %v8463_v19 = vpack.c.bf16 %v6502_v3, %v6501_v27 }
0x1683   :  { %8918 = vrcp.f32 %v6114_v36  ;;  %v8917_v21 = vpop.eup %8916  ;;  %v6127_v41 = vadd.f32 1.0, %v8915_v32  ;;  %v6504_v36 = vld [vmem:[%s10654_s4 + $0x68] sm:$0xff]  ;;  %v6505_v32 = vld [vmem:[%s10654_s4 + $0x70] sm:$0xff] }
0x1684   :  { %8920 = vrcp.f32 %v6120_v34  ;;  %v8466_v34 = vpack.c.bf16 %v6504_v36, %v6503_v17 }
0x1685   :  { %8922 = vrcp.f32 %v6127_v41 }
0x168d   :  { %v8919_v47 = vpop.eup %8918 }
0x168e   :  { %v8921_v24 = vpop.eup %8920  ;;  %v6131_v38 = vmul.f32 %v8919_v47, %v8917_v21  ;;  %v6506_v21 = vld [vmem:[%s10654_s4 + $0x78] sm:$0xff] }
0x168f   :  { %v6130_v28 = vmul.f32 %v8921_v24, %v10508_v63  ;;  %v8923_v55 = vpop.eup %8922  ;;  %v6493_v63 = vld [vmem:[%s10654_s4 + $0x10] sm:$0xff]  ;;  %v8469_v47 = vpack.c.bf16 %v6506_v21, %v6505_v32 }
0x1690   :  { %v8451_v61 = vpack.c.bf16 %v6494_v22, %v6493_v63 }
0x1691   :  { %v10550_v39 = vadd.f32 %v6131_v38, %v6130_v28 }
0x1693   :  { %8924 = vtanh.f32 %v10550_v39 }
0x169d   :  { %v8925_v57 = vpop.eup %8924 }
0x169e   :  { %v6134_v49 = vmul.f32 %v8925_v57, %v8923_v55 }
0x16a0   :  { %6204 = vmatmul.mubr.f32.vlgmr.msra.gmra.mrb[44].mxu0 %v6134_v49  ;;  %6275 = vmatmul.mubr.f32.vlgmr.msra.gmra.mrb[44].mxu1 %v6134_v49 }
0x16a1   :  { %8386 = vmatpush1.bf16.msra.mxu0 %v10184_v8  ;;  %8418 = vmatpush1.bf16.msra.mxu1 %v10187_v14 }
0x16a2   :  { %8388 = vmatprep.subr.bf16.mxu0 %v10192_v0  ;;  %8420 = vmatprep.subr.bf16.mxu1 %v10194_v50 }
0x16a3   :  { %6381 = vmatprep.mubr.f32.mxu0 %v9010_v1  ;;  %6452 = vmatprep.mubr.f32.mxu1 %v9010_v1 }
0x16a5   :  { %8390 = vmatpush1.bf16.msra.mxu0 %v10196_v51  ;;  %8422 = vmatpush1.bf16.msra.mxu1 %v10199_v52 }
0x16a6   :  { %8392 = vmatprep.subr.bf16.mxu0 %v10204_v23  ;;  %8424 = vmatprep.subr.bf16.mxu1 %v10206_v53 }
0x16a9   :  { %8394 = vmatpush1.bf16.msra.mxu0 %v10208_v60  ;;  %8426 = vmatpush1.bf16.msra.mxu1 %v10211_v12 }
0x16aa   :  { %8396 = vmatprep.subr.bf16.mxu0 %v10216_v20  ;;  %8428 = vmatprep.subr.bf16.mxu1 %v10218_v25 }
0x16ad   :  { %8398 = vmatpush1.bf16.msra.mxu0 %v10220_v4  ;;  %8430 = vmatpush1.bf16.msra.mxu1 %v10223_v29 }
0x16ae   :  { %8400 = vmatprep.subr.bf16.mxu0 %v10227_v37  ;;  %8432 = vmatprep.subr.bf16.mxu1 %v10229_v16 }
0x16b1   :  { %8402 = vmatpush1.bf16.msra.mxu0 %v10232_v13  ;;  %8434 = vmatpush1.bf16.msra.mxu1 %v10236_v6 }
0x16b2   :  { %8404 = vmatprep.subr.bf16.mxu0 %v10238_v5  ;;  %8436 = vmatprep.subr.bf16.mxu1 %v10240_v30 }
0x16b5   :  { %8406 = vmatpush1.bf16.msra.mxu0 %v10243_v46  ;;  %8438 = vmatpush1.bf16.msra.mxu1 %v10247_v11 }
0x16b6   :  { %8408 = vmatprep.subr.bf16.mxu0 %v10249_v2  ;;  %8440 = vmatprep.subr.bf16.mxu1 %v10252_v58 }
0x16b9   :  { %8410 = vmatpush1.bf16.msra.mxu0 %v10255_v42  ;;  %8442 = vmatpush1.bf16.msra.mxu1 %v10259_v59 }
0x16ba   :  { %8412 = vmatprep.subr.bf16.mxu0 %v10264_v15  ;;  %8444 = vmatprep.subr.bf16.mxu1 %v10266_v62  ;;  %v6491_v15 = vld [vmem:[%s10654_s4] sm:$0xff]  ;;  %v6492_v62 = vld [vmem:[%s10654_s4 + $0x8] sm:$0xff] }
0x16bd   :  { %8414 = vmatpush1.bf16.msra.mxu0 %v10268_v18  ;;  %8446 = vmatpush1.bf16.msra.mxu1 %v10271_v10  ;;  %v8448_v18 = vpack.c.bf16 %v6492_v62, %v6491_v15  ;;  %v9011_v10 = vmov 0.0|0.0  }
0x16be   :  { %8447 = vmatprep.subr.bf16.mxu0 %v9011_v10 }
0x1773   :  { %v6205_v8 = vpop.f32.mrb[44].mxu0  ;;  %v6276_v14 = vpop.f32.mrb[44].mxu1 }
0x1774   :  { %v6285_v0 = vadd.f32 %v6205_v8, %v10325_v26  ;;  %v6207_v50 = vpop.f32.mrb[45].mxu0  ;;  %v6278_v51 = vpop.f32.mrb[45].mxu1  ;;  %v6287_v20 = vadd.f32 %v6276_v14, %v10337_v35 }
0x1775   :  { %v6286_v52 = vadd.f32 %v6207_v50, %v10328_v44  ;;  %v6288_v60 = vadd.f32 %v6278_v51, %v10333_v9 }
0x1776   :  { %v6660_v23 = vmul.f32 -1.442695, %v6285_v0 }
0x1777   :  { %v6661_v53 = vmul.f32 -1.442695, %v6286_v52  ;;  %v6662_v12 = vmul.f32 -1.442695, %v6288_v60 }
0x1778   :  { %8926 = vpow2.f32 %v6660_v23 }
0x1779   :  { %8928 = vpow2.f32 %v6661_v53 }
0x177a   :  { %8930 = vpow2.f32 %v6662_v12 }
0x177b   :  { %8932 = vtanh.f32 %v6287_v20 }
0x1782   :  { %v8927_v25 = vpop.eup %8926 }
0x1783   :  { %v8929_v4 = vpop.eup %8928  ;;  %v6292_v29 = vadd.f32 1.0, %v8927_v25 }
0x1784   :  { %v6298_v37 = vadd.f32 1.0, %v8929_v4  ;;  %v8931_v16 = vpop.eup %8930 }
0x1785   :  { %8934 = vrcp.f32 %v6292_v29  ;;  %v8933_v13 = vpop.eup %8932  ;;  %v6305_v46 = vadd.f32 1.0, %v8931_v16  ;;  %v6666_v29 = vld [vmem:[#allocation4] ss:$0 sm:$0xff] }
0x1786   :  { %8936 = vrcp.f32 %v6298_v37 }
0x1787   :  { %8938 = vrcp.f32 %v6305_v46 }
0x178f   :  { %v8935_v6 = vpop.eup %8934 }
0x1790   :  { %v8937_v5 = vpop.eup %8936  ;;  %v6309_v30 = vmul.f32 %v8935_v6, %v8933_v13 }
0x1791   :  { %v6308_v11 = vmul.f32 %v8937_v5, %v10550_v39  ;;  %v8939_v58 = vpop.eup %8938 }
0x1793   :  { %v10590_v2 = vadd.f32 %v6309_v30, %v6308_v11 }
0x1795   :  { %8940 = vtanh.f32 %v10590_v2 }
0x179f   :  { %v8941_v42 = vpop.eup %8940 }
0x17a0   :  { %v6312_v59 = vmul.f32 %v8941_v42, %v8939_v58 }
0x17a2   :  { %6382 = vmatmul.mubr.f32.vlgmr.msra.gmra.mrb[46].mxu0 %v6312_v59  ;;  %6453 = vmatmul.mubr.f32.vlgmr.msra.gmra.mrb[46].mxu1 %v6312_v59 }
0x17a3   :  { %8449 = vmatpush3.bf16.msra.mxu0 %v8448_v18  ;;  %6716 = vmatprep.mubr.msk.f32.mxu0 %vm9012_vm0, %v9010_v1 }
0x17a4   :  { %8450 = vmatprep.subr.bf16.mxu0 %v9011_v10 }
0x17a7   :  { %8452 = vmatpush3.bf16.msra.mxu0 %v8451_v61 }
0x17a8   :  { %8453 = vmatprep.subr.bf16.mxu0 %v9011_v10 }
0x17ab   :  { %8455 = vmatpush3.bf16.msra.mxu0 %v8454_v7 }
0x17ac   :  { %8456 = vmatprep.subr.bf16.mxu0 %v9011_v10 }
0x17af   :  { %8458 = vmatpush3.bf16.msra.mxu0 %v8457_v54 }
0x17b0   :  { %8459 = vmatprep.subr.bf16.mxu0 %v9011_v10 }
0x17b3   :  { %8461 = vmatpush3.bf16.msra.mxu0 %v8460_v45 }
0x17b4   :  { %8462 = vmatprep.subr.bf16.mxu0 %v9011_v10 }
0x17b7   :  { %8464 = vmatpush3.bf16.msra.mxu0 %v8463_v19 }
0x17b8   :  { %8465 = vmatprep.subr.bf16.mxu0 %v9011_v10 }
0x17bb   :  { %8467 = vmatpush3.bf16.msra.mxu0 %v8466_v34 }
0x17bc   :  { %8468 = vmatprep.subr.bf16.mxu0 %v9011_v10 }
0x17bf   :  { %8470 = vmatpush3.bf16.msra.mxu0 %v8469_v47 }
0x1875   :  { %v6383_v24 = vpop.f32.mrb[46].mxu0  ;;  %v6454_v38 = vpop.f32.mrb[46].mxu1 }
0x1876   :  { %v6463_v41 = vadd.f32 %v6383_v24, %v10325_v26  ;;  %v6385_v1 = vpop.f32.mrb[47].mxu0  ;;  %v6456_v28 = vpop.f32.mrb[47].mxu1  ;;  %v6465_v14 = vadd.f32 %v6454_v38, %v10337_v35 }
0x1877   :  { %v6464_v39 = vadd.f32 %v6385_v1, %v10328_v44  ;;  %v6466_v49 = vadd.f32 %v6456_v28, %v10333_v9 }
0x1878   :  { %v6663_v55 = vmul.f32 -1.442695, %v6463_v41 }
0x1879   :  { %v6664_v57 = vmul.f32 -1.442695, %v6464_v39  ;;  %v6665_v8 = vmul.f32 -1.442695, %v6466_v49 }
0x187a   :  { %8942 = vpow2.f32 %v6663_v55 }
0x187b   :  { %8944 = vpow2.f32 %v6664_v57 }
0x187c   :  { %8946 = vpow2.f32 %v6665_v8 }
0x187d   :  { %8948 = vtanh.f32 %v6465_v14 }
0x1884   :  { %v8943_v0 = vpop.eup %8942 }
0x1885   :  { %v8945_v50 = vpop.eup %8944  ;;  %v6470_v51 = vadd.f32 1.0, %v8943_v0 }
0x1886   :  { %v6476_v52 = vadd.f32 1.0, %v8945_v50  ;;  %v8947_v26 = vpop.eup %8946 }
0x1887   :  { %8950 = vrcp.f32 %v6470_v51  ;;  %v8949_v23 = vpop.eup %8948  ;;  %v6483_v12 = vadd.f32 1.0, %v8947_v26 }
0x1888   :  { %8952 = vrcp.f32 %v6476_v52 }
0x1889   :  { %8954 = vrcp.f32 %v6483_v12 }
0x1891   :  { %v8951_v44 = vpop.eup %8950 }
0x1892   :  { %v8953_v53 = vpop.eup %8952  ;;  %v6487_v60 = vmul.f32 %v8951_v44, %v8949_v23 }
0x1893   :  { %v6486_v20 = vmul.f32 %v8953_v53, %v10590_v2  ;;  %v8955_v35 = vpop.eup %8954 }
0x1895   :  { %v6488_v9 = vadd.f32 %v6487_v60, %v6486_v20 }
0x1897   :  { %8956 = vtanh.f32 %v6488_v9 }
0x18a1   :  { %v8957_v25 = vpop.eup %8956 }
0x18a2   :  { %v6490_v4 = vmul.f32 %v8957_v25, %v8955_v35 }
0x18a4   :  { %6717 = vmatmul.mubr.f32.vlgmr.msra.gmra.mrb[48].mxu0 %v6490_v4 }
0x1977   :  { %v6580_v37 = vpop.f32.mrb[48].mxu0 }
0x1978   :  { %v6581_v16 = vadd.f32 %v6666_v29, %v6580_v37  ;;  %v6718_v13 = vpop.f32.mrb[49].mxu0 }
0x197a   :  { %6585 = vst.msk [vmem:[%s10656_s6] sm:$0xff] %vm6584_vm1, %v6581_v16 }
0x197b   :  { %6590 = vsyncpa [#allocation6], 1 }
0x197c   :  { %6591 = vsyncpa [#allocation8], 1 }

</bundles_post_ra>
